<compile_context>
chip_gen: v6e
topology: v6e:2x2x1
jax: 0.10.0
libtpu: 0.0.40
codegen_flags: <defaults>
</compile_context>

<pallas_src>
import math
import functools

import jax
import jax.numpy as jnp
from jax.experimental import pallas as pl
from jax.experimental.pallas import tpu as pltpu


# ------------------------------------------------------------------ helpers
def _round_up(x, m):
    return ((x + m - 1) // m) * m


_SQRT_2_OVER_PI = 0.7978845608028654


def _gelu(x):
    """tanh-approx GELU (one EUP tanh; ~1e-3 max abs deviation from erf-GELU)."""
    return 0.5 * x * (1.0 + jnp.tanh(_SQRT_2_OVER_PI * (x + 0.044715 * x * x * x)))


def _softmax_lastdim(s):
    """Numerically stable softmax; f32 max/sum, EUP approx reciprocal."""
    s = s - jnp.max(s, axis=-1, keepdims=True)
    p = jnp.exp(s)
    return p * pl.reciprocal(jnp.sum(p, axis=-1, keepdims=True), approx=True)


def _mean_all(x):
    """Mean over all elements of a 2D array (two single-axis reductions)."""
    return jnp.mean(jnp.mean(x, axis=-1, keepdims=True), axis=-2, keepdims=True)


def _layernorm_lastdim(x, eps=1e-5):
    mu = jnp.mean(x, axis=-1, keepdims=True)
    c = x - mu
    var = jnp.mean(c * c, axis=-1, keepdims=True)
    return c * jax.lax.rsqrt(var + eps)


def _layernorm_general(x, eps=1e-5):
    """LayerNormGeneral over all non-batch dims (per-sample statistics)."""
    mu = _mean_all(x)
    c = x - mu
    var = _mean_all(c * c)
    return c * jax.lax.rsqrt(var + eps)


def _batch_spec(shape):
    nd = len(shape)
    return pl.BlockSpec((1,) + tuple(shape[1:]),
                        lambda b: (b,) + (0,) * (nd - 1))


def _rep_spec(shape):
    nd = len(shape)
    return pl.BlockSpec(tuple(shape), lambda b: (0,) * nd)


def _fold_affine(gamma, beta, w, b):
    """Fold a preceding per-channel affine (gamma, beta) into a (K, N) matmul."""
    return w * gamma[:, None], b + beta @ w


# ------------------------------------------------------------------ kernels
def _make_sem2feat_kernel(Cls, N, C, H, scale):
    d = C // H

    def kernel(xcls_ref, xpat_ref, lng_ref, lnb_ref, wq_ref, bq_ref,
               wkv_ref, bkv_ref, wp_ref, bp_ref, ocls_ref, smap_ref):
        xc = xcls_ref[0].astype(jnp.float32)                      # (Cls, C)
        xp = xpat_ref[0].astype(jnp.float32)                      # (N, C)

        # q = (LayerNorm(x_cls) * g + b) @ Wq + bq
        xcn = _layernorm_lastdim(xc) * lng_ref[...] + lnb_ref[...]
        q = jnp.dot(xcn.astype(jnp.bfloat16), wq_ref[...],
                    preferred_element_type=jnp.float32) + bq_ref[...]

        # kv = LayerNormGeneral(x_patch) @ Wkv + bkv   (affine folded into Wkv)
        xpn = _layernorm_general(xp)
        kv = jnp.dot(xpn.astype(jnp.bfloat16), wkv_ref[...],
                     preferred_element_type=jnp.float32) + bkv_ref[...]
        k, v = kv[:, :C], kv[:, C:]

        # multi-head attention, heads unrolled in-kernel (one grid step / batch)
        heads = []
        for h in range(H):
            qh = q[:, h * d:(h + 1) * d].astype(jnp.bfloat16)     # (Cls, d)
            kh = k[:, h * d:(h + 1) * d].astype(jnp.bfloat16)     # (N, d)
            vh = v[:, h * d:(h + 1) * d].astype(jnp.bfloat16)     # (N, d)
            s = jax.lax.dot_general(qh, kh, (((1,), (1,)), ((), ())),
                                    preferred_element_type=jnp.float32) * scale
            p = _softmax_lastdim(s)
            heads.append(jnp.dot(p.astype(jnp.bfloat16), vh,
                                 preferred_element_type=jnp.float32))
        o = jnp.concatenate(heads, axis=-1)                       # (Cls, C)

        out_cls = jnp.dot(o.astype(jnp.bfloat16), wp_ref[...],
                          preferred_element_type=jnp.float32) + bp_ref[...] + xc
        ocls_ref[0] = out_cls.astype(ocls_ref.dtype)

        # sem_map = out_cls @ x_patch^T (only consumer is the 3x3-conv matmul)
        smap = jax.lax.dot_general(out_cls.astype(jnp.bfloat16),
                                   xp.astype(jnp.bfloat16),
                                   (((1,), (1,)), ((), ())),
                                   preferred_element_type=jnp.float32)
        smap_ref[0] = smap.astype(smap_ref.dtype)

    return kernel


def _make_f2s_scores_kernel(Cls, N, C, H, Cg, scale):
    d = C // H

    def kernel(pat_ref, ocls_ref, wc_ref, bc_ref, wq_ref, bq_ref,
               lng_ref, lnb_ref, wkv_ref, bkv_ref, w1_ref, b1_ref,
               npatch_ref, v2_ref, stok_ref, hfc1_ref, sim_ref):
        # 3x3 proj_patch conv as one K=9*Cls matmul (+ folded BN + GELU)
        new_patch = _gelu(jnp.dot(pat_ref[0], wc_ref[...],
                                  preferred_element_type=jnp.float32)
                          + bc_ref[...])                          # (N, C)
        npatch_ref[0] = new_patch.astype(npatch_ref.dtype)

        # query = LayerNormGeneral(new_patch) @ Wq + bq  (affine folded into Wq)
        xn = _layernorm_general(new_patch)
        qp = jnp.dot(xn.astype(jnp.bfloat16), wq_ref[...],
                     preferred_element_type=jnp.float32) + bq_ref[...]

        # kv = (LayerNorm(out_cls) * g + b) @ Wkv + bkv
        oc = ocls_ref[0].astype(jnp.float32)                      # (Cls, C)
        ocn = _layernorm_lastdim(oc) * lng_ref[...] + lnb_ref[...]
        kv = jnp.dot(ocn.astype(jnp.bfloat16), wkv_ref[...],
                     preferred_element_type=jnp.float32) + bkv_ref[...]
        k2, v2 = kv[:, :C], kv[:, C:]
        v2_ref[0] = v2.astype(v2_ref.dtype)

        # per-head pre-softmax scores laid out as grapher tokens (N, H*Cls)
        segs = []
        for h in range(H):
            qh = qp[:, h * d:(h + 1) * d].astype(jnp.bfloat16)    # (N, d)
            kh = k2[:, h * d:(h + 1) * d].astype(jnp.bfloat16)    # (Cls, d)
            segs.append(
                jax.lax.dot_general(qh, kh, (((1,), (1,)), ((), ())),
                                    preferred_element_type=jnp.float32) * scale)
        stok = jnp.concatenate(segs, axis=-1)                     # (N, Cg)
        stok_ref[0] = stok.astype(stok_ref.dtype)

        # grapher fc1 (+ folded BN)
        hfeat = jnp.dot(stok.astype(jnp.bfloat16), w1_ref[...],
                        preferred_element_type=jnp.float32) + b1_ref[...]
        hfc1_ref[0] = hfeat.astype(hfc1_ref.dtype)

        # cosine-similarity matrix for the dynamic-KNN graph (bf16 MXU operands)
        hn = hfeat * jax.lax.rsqrt(
            jnp.maximum(jnp.sum(hfeat * hfeat, axis=-1, keepdims=True), 1e-24))
        sim = jax.lax.dot_general(hn.astype(jnp.bfloat16), hn.astype(jnp.bfloat16),
                                  (((1,), (1,)), ((), ())),
                                  preferred_element_type=jnp.float32)
        sim_ref[0] = sim.astype(sim_ref.dtype)

    return kernel


def _make_f2s_out_kernel(Cls, N, C, H, Cg):
    d = C // H

    def kernel(hfc1_ref, nbmax_ref, stok_ref, v2_ref, npatch_ref,
               wgh_ref, wgr_ref, bg_ref, w2_ref, b2_ref, wp_ref, bp_ref,
               opatch_ref):
        hfeat = hfc1_ref[0].astype(jnp.float32)                   # (N, Cg)
        rel = nbmax_ref[0].astype(jnp.float32) - hfeat            # max-relative

        # grouped 1x1 graph conv (+ folded BN) + GELU.  The interleaved [h, rel]
        # concat is folded into the split weight rows (wgh / wgr).
        g = jnp.dot(hfeat.astype(jnp.bfloat16), wgh_ref[...],
                    preferred_element_type=jnp.float32)
        g = g + jnp.dot(rel.astype(jnp.bfloat16), wgr_ref[...],
                        preferred_element_type=jnp.float32)
        g = _gelu(g + bg_ref[...])                                # (N, 2*Cg)

        # grapher fc2 (+ folded BN) + grapher residual (its input tokens)
        gout = jnp.dot(g.astype(jnp.bfloat16), w2_ref[...],
                       preferred_element_type=jnp.float32) + b2_ref[...]
        gout = gout + stok_ref[0].astype(jnp.float32)             # (N, Cg)

        # per-head softmax over Cls, @ value, head merge
        v2 = v2_ref[0]                                            # (Cls, C) bf16
        heads = []
        for h in range(H):
            p = _softmax_lastdim(gout[:, h * Cls:(h + 1) * Cls])  # (N, Cls)
            vh = v2[:, h * d:(h + 1) * d]                         # (Cls, d)
            heads.append(jnp.dot(p.astype(jnp.bfloat16), vh,
                                 preferred_element_type=jnp.float32))
        o2 = jnp.concatenate(heads, axis=-1)                      # (N, C)

        out_patch = jnp.dot(o2.astype(jnp.bfloat16), wp_ref[...],
                            preferred_element_type=jnp.float32) + bp_ref[...]
        out_patch = out_patch + npatch_ref[0].astype(jnp.float32)
        opatch_ref[0] = out_patch.astype(opatch_ref.dtype)

    return kernel


def _mlp_kernel(x_ref, w1_ref, b1_ref, w2_ref, b2_ref, o_ref):
    """Fused MLP: GELU(x@W1+b1)@W2+b2 — the 4C hidden never leaves VMEM."""
    x = x_ref[...]                                                # bf16 (TM, C)
    h = jnp.dot(x, w1_ref[...], preferred_element_type=jnp.float32) + b1_ref[...]
    h = _gelu(h)
    y = jnp.dot(h.astype(jnp.bfloat16), w2_ref[...],
                preferred_element_type=jnp.float32) + b2_ref[...]
    o_ref[...] = y.astype(o_ref.dtype)


# ------------------------------------------------------------------ pallas wrappers
def _sem2feat_call(x_cls, x_patch_tok, w, num_heads):
    B, Cls, C = x_cls.shape
    N = x_patch_tok.shape[1]
    scale = float(C // num_heads) ** -0.5
    out_cls, sem_map = pl.pallas_call(
        _make_sem2feat_kernel(Cls, N, C, num_heads, scale),
        out_shape=(jax.ShapeDtypeStruct((B, Cls, C), jnp.float32),
                   jax.ShapeDtypeStruct((B, Cls, N), jnp.bfloat16)),
        grid=(B,),
        in_specs=[_batch_spec((B, Cls, C)), _batch_spec((B, N, C)),
                  _rep_spec((1, C)), _rep_spec((1, C)),
                  _rep_spec((C, C)), _rep_spec((1, C)),
                  _rep_spec((C, 2 * C)), _rep_spec((1, 2 * C)),
                  _rep_spec((C, C)), _rep_spec((1, C))],
        out_specs=(_batch_spec((B, Cls, C)), _batch_spec((B, Cls, N))),
        compiler_params=pltpu.CompilerParams(dimension_semantics=("parallel",)),
    )(x_cls, x_patch_tok, w["lng"], w["lnb"], w["wq"], w["bq"],
      w["wkv"], w["bkv"], w["wp"], w["bp"])
    return out_cls, sem_map


def _f2s_scores_call(patches, out_cls, w, num_heads):
    B, Cls, C = out_cls.shape
    N, Kc = patches.shape[1], patches.shape[2]
    Cg = num_heads * Cls
    scale = float(C // num_heads) ** -0.5
    return pl.pallas_call(
        _make_f2s_scores_kernel(Cls, N, C, num_heads, Cg, scale),
        out_shape=(jax.ShapeDtypeStruct((B, N, C), jnp.float32),      # new_patch
                   jax.ShapeDtypeStruct((B, Cls, C), jnp.bfloat16),   # value
                   jax.ShapeDtypeStruct((B, N, Cg), jnp.float32),     # grapher tokens
                   jax.ShapeDtypeStruct((B, N, Cg), jnp.float32),     # grapher fc1
                   jax.ShapeDtypeStruct((B, N, N), jnp.float32)),     # KNN similarity
        grid=(B,),
        in_specs=[_batch_spec((B, N, Kc)), _batch_spec((B, Cls, C)),
                  _rep_spec((Kc, C)), _rep_spec((1, C)),
                  _rep_spec((C, C)), _rep_spec((1, C)),
                  _rep_spec((1, C)), _rep_spec((1, C)),
                  _rep_spec((C, 2 * C)), _rep_spec((1, 2 * C)),
                  _rep_spec((Cg, Cg)), _rep_spec((1, Cg))],
        out_specs=(_batch_spec((B, N, C)), _batch_spec((B, Cls, C)),
                   _batch_spec((B, N, Cg)), _batch_spec((B, N, Cg)),
                   _batch_spec((B, N, N))),
        compiler_params=pltpu.CompilerParams(dimension_semantics=("parallel",)),
    )(patches, out_cls, w["wc"], w["bc"], w["wq"], w["bq"],
      w["lng"], w["lnb"], w["wkv"], w["bkv"], w["w1"], w["b1"])


def _f2s_out_call(hfc1, nbmax, stok, value, new_patch, w, num_heads):
    B, N, Cg = hfc1.shape
    Cls, C = value.shape[1], value.shape[2]
    return pl.pallas_call(
        _make_f2s_out_kernel(Cls, N, C, num_heads, Cg),
        out_shape=jax.ShapeDtypeStruct((B, N, C), jnp.float32),
        grid=(B,),
        in_specs=[_batch_spec((B, N, Cg)), _batch_spec((B, N, Cg)),
                  _batch_spec((B, N, Cg)), _batch_spec((B, Cls, C)),
                  _batch_spec((B, N, C)),
                  _rep_spec((Cg, 2 * Cg)), _rep_spec((Cg, 2 * Cg)),
                  _rep_spec((1, 2 * Cg)),
                  _rep_spec((2 * Cg, Cg)), _rep_spec((1, Cg)),
                  _rep_spec((C, C)), _rep_spec((1, C))],
        out_specs=_batch_spec((B, N, C)),
        compiler_params=pltpu.CompilerParams(dimension_semantics=("parallel",)),
    )(hfc1, nbmax, stok, value, new_patch,
      w["wgh"], w["wgr"], w["bg"], w["w2"], w["b2"], w["wp"], w["bp"])


def _ffn_call(x, w1, b1, w2, b2):
    """Fused MLP; >=2 grid steps (v7x dual TC), bf16 inputs, lane-dense output."""
    M, K = x.shape
    Hd, Nout = w1.shape[1], w2.shape[1]
    Hdp = _round_up(Hd, 128)
    Np = _round_up(Nout, 128)
    nt = max(2, -(-M // 512))
    TM = _round_up(-(-M // nt), 16)         # 16-aligned rows for bf16 input blocks
    Mp = TM * nt

    xq = jnp.pad(x.astype(jnp.bfloat16), ((0, Mp - M), (0, 0)))
    w1p = jnp.pad(w1, ((0, 0), (0, Hdp - Hd))).astype(jnp.bfloat16)
    b1p = jnp.pad(b1, (0, Hdp - Hd)).reshape(1, Hdp).astype(jnp.float32)
    w2p = jnp.pad(w2, ((0, Hdp - Hd), (0, Np - Nout))).astype(jnp.bfloat16)
    b2p = jnp.pad(b2, (0, Np - Nout)).reshape(1, Np).astype(jnp.float32)

    out = pl.pallas_call(
        _mlp_kernel,
        out_shape=jax.ShapeDtypeStruct((Mp, Np), jnp.float32),
        grid=(nt,),
        in_specs=[pl.BlockSpec((TM, K), lambda i: (i, 0)),
                  pl.BlockSpec((K, Hdp), lambda i: (0, 0)),
                  pl.BlockSpec((1, Hdp), lambda i: (0, 0)),
                  pl.BlockSpec((Hdp, Np), lambda i: (0, 0)),
                  pl.BlockSpec((1, Np), lambda i: (0, 0))],
        out_specs=pl.BlockSpec((TM, Np), lambda i: (i, 0)),
        compiler_params=pltpu.CompilerParams(dimension_semantics=("parallel",)),
    )(xq, w1p, b1p, w2p, b2p)
    return out[:M, :Nout]


# ------------------------------------------------------------------ weight preparation
def _prepare_weights(params, C, Cls, H):
    """Fold BN / LN affines into the following matmuls; cast weights to bf16."""
    s2f, f2s, gr, ffn = params["s2f"], params["f2s"], params["grapher"], params["ffn"]
    Cg = H * Cls
    bf = jnp.bfloat16

    kv_w, kv_b = _fold_affine(s2f["nx_g"], s2f["nx_b"], s2f["kv_w"], s2f["kv_b"])
    w_s2f = dict(
        lng=s2f["ncls_g"].reshape(1, C), lnb=s2f["ncls_b"].reshape(1, C),
        wq=s2f["q_w"].astype(bf), bq=s2f["q_b"].reshape(1, C),
        wkv=kv_w.astype(bf), bkv=kv_b.reshape(1, 2 * C),
        wp=s2f["proj_w"].astype(bf), bp=s2f["proj_b"].reshape(1, C))

    # 3x3 conv (BN pre-folded): (C, Cls, 3, 3) -> tap-major (9*Cls, C)
    wc = jnp.transpose(s2f["pp_w"], (2, 3, 1, 0)).reshape(9 * Cls, C)
    q_w2, q_b2 = _fold_affine(f2s["nx_g"], f2s["nx_b"], f2s["q_w"], f2s["q_b"])
    w_f2s_a = dict(
        wc=wc.astype(bf), bc=s2f["pp_b"].reshape(1, C),
        wq=q_w2.astype(bf), bq=q_b2.reshape(1, C),
        lng=f2s["ncls_g"].reshape(1, C), lnb=f2s["ncls_b"].reshape(1, C),
        wkv=f2s["kv_w"].astype(bf), bkv=f2s["kv_b"].reshape(1, 2 * C),
        w1=gr["fc1_w"].astype(bf), b1=gr["fc1_b"].reshape(1, Cg))

    # Split the interleaved [h, rel] rows of the graph-conv weight so the kernel
    # can skip the channel interleave (two dots instead of stack+reshape).
    w_f2s_b = dict(
        wgh=gr["gconv_w"][0::2, :].astype(bf),
        wgr=gr["gconv_w"][1::2, :].astype(bf),
        bg=gr["gconv_b"].reshape(1, 2 * Cg),
        w2=gr["fc2_w"].astype(bf), b2=gr["fc2_b"].reshape(1, Cg),
        wp=f2s["proj_w"].astype(bf), bp=f2s["proj_b"].reshape(1, C))

    return w_s2f, w_f2s_a, w_f2s_b, ffn


# ------------------------------------------------------------------ parameters
def init_params(key, C, Cls, H):
    Cg = H * Cls
    keys = iter(jax.random.split(key, 64))

    def nxt():
        return next(keys)

    def lin(cin, cout):
        w = jax.random.normal(nxt(), (cin, cout), jnp.float32) / math.sqrt(cin)
        b = 0.02 * jax.random.normal(nxt(), (cout,), jnp.float32)
        return w, b

    def ln_affine(c):
        g = 1.0 + 0.1 * jax.random.normal(nxt(), (c,), jnp.float32)
        b = 0.05 * jax.random.normal(nxt(), (c,), jnp.float32)
        return g, b

    def bn_fold(c):
        gamma = 1.0 + 0.1 * jax.random.normal(nxt(), (c,), jnp.float32)
        beta = 0.05 * jax.random.normal(nxt(), (c,), jnp.float32)
        mean = 0.05 * jax.random.normal(nxt(), (c,), jnp.float32)
        var = 1.0 + 0.1 * jax.random.uniform(nxt(), (c,), jnp.float32)
        s = gamma / jnp.sqrt(var + 1e-5)
        return s, beta - mean * s

    p = {}

    s2f = {}
    s2f["ncls_g"], s2f["ncls_b"] = ln_affine(C)
    s2f["q_w"], s2f["q_b"] = lin(C, C)
    s2f["nx_g"], s2f["nx_b"] = ln_affine(C)
    s2f["kv_w"], s2f["kv_b"] = lin(C, 2 * C)
    s2f["proj_w"], s2f["proj_b"] = lin(C, C)
    w_pp = jax.random.normal(nxt(), (C, Cls, 3, 3), jnp.float32) / math.sqrt(9 * Cls)
    b_pp = 0.02 * jax.random.normal(nxt(), (C,), jnp.float32)
    s_pp, t_pp = bn_fold(C)
    s2f["pp_w"] = w_pp * s_pp[:, None, None, None]
    s2f["pp_b"] = b_pp * s_pp + t_pp
    p["s2f"] = s2f

    f2s = {}
    f2s["nx_g"], f2s["nx_b"] = ln_affine(C)
    f2s["q_w"], f2s["q_b"] = lin(C, C)
    f2s["ncls_g"], f2s["ncls_b"] = ln_affine(C)
    f2s["kv_w"], f2s["kv_b"] = lin(C, 2 * C)
    f2s["proj_w"], f2s["proj_b"] = lin(C, C)
    p["f2s"] = f2s

    gr = {}
    w1, b1 = lin(Cg, Cg)
    s1, t1 = bn_fold(Cg)
    gr["fc1_w"], gr["fc1_b"] = w1 * s1[None, :], b1 * s1 + t1
    gsz = 2 * Cls                                       # grouped 1x1 conv, groups=H
    blocks = jax.random.normal(nxt(), (H, gsz, gsz), jnp.float32) / math.sqrt(gsz)
    wbd = jnp.zeros((2 * Cg, 2 * Cg), jnp.float32)
    for g in range(H):
        wbd = wbd.at[g * gsz:(g + 1) * gsz, g * gsz:(g + 1) * gsz].set(blocks[g])
    bg = 0.02 * jax.random.normal(nxt(), (2 * Cg,), jnp.float32)
    sg, tg = bn_fold(2 * Cg)
    gr["gconv_w"], gr["gconv_b"] = wbd * sg[None, :], bg * sg + tg
    w2, b2 = lin(2 * Cg, Cg)
    s2, t2 = bn_fold(Cg)
    gr["fc2_w"], gr["fc2_b"] = w2 * s2[None, :], b2 * s2 + t2
    p["grapher"] = gr

    ffn = {}
    ffn["w1"], ffn["b1"] = lin(C, 4 * C)
    ffn["w2"], ffn["b2"] = lin(4 * C, C)
    p["ffn"] = ffn
    return p


# ------------------------------------------------------------------ forward
def graph_attention_forward(x_cls, x_patch_nchw, params, num_heads):
    B, Cls, C = x_cls.shape
    _, _, Hp, Wp = x_patch_nchw.shape
    N = Hp * Wp

    w_s2f, w_f2s_a, w_f2s_b, ffn = _prepare_weights(params, C, Cls, num_heads)

    x_cls = x_cls.astype(jnp.float32)
    x_patch = jnp.transpose(x_patch_nchw, (0, 2, 3, 1)).reshape(B, N, C).astype(jnp.float32)

    # ---- Semantic2FeatureBlock: one fused kernel per batch element ----
    # NOTE: the reference forward assigns sem2feat's tuple to x_cls (would crash
    # in feat2sem); the intended unpacking is implemented here.
    out_cls, sem_map = _sem2feat_call(x_cls, x_patch, w_s2f, num_heads)

    # im2col for the 3x3 proj_patch conv (tiny bf16 tensor; layout-only, XLA)
    conv_in = jnp.transpose(sem_map, (0, 2, 1)).reshape(B, Hp, Wp, Cls)
    xpad = jnp.pad(conv_in, ((0, 0), (1, 1), (1, 1), (0, 0)))
    taps = [xpad[:, ky:ky + Hp, kx:kx + Wp, :]
            for ky in range(3) for kx in range(3)]
    patches = jnp.concatenate(taps, axis=-1).reshape(B, N, 9 * Cls)

    # ---- Feature2SemanticBlock part 1 (conv, projections, scores, KNN sim) ----
    new_patch, value, stok, hfc1, sim = _f2s_scores_call(patches, out_cls,
                                                         w_f2s_a, num_heads)

    # dynamic-KNN neighbour selection for the Grapher
    # TODO(synk): top-k + data-dependent neighbour gather stay in XLA; a Pallas
    # version would need a manual-DMA gather, not worth it at this scale.
    kk = min(9, N)
    _, nn_idx = jax.lax.top_k(sim, kk)                         # (B, N, k)
    h_nb = jax.vmap(lambda hb, ib: hb[ib])(hfc1, nn_idx)       # (B, N, k, Cg)
    nbmax = jnp.max(h_nb, axis=2)                              # (B, N, Cg)

    # ---- Feature2SemanticBlock part 2 (graph conv, softmax @ V, proj) ----
    out_patch = _f2s_out_call(hfc1, nbmax, stok, value, new_patch,
                              w_f2s_b, num_heads)

    # ---- FFN over concatenated [cls, patch] tokens ----
    tokens = jnp.concatenate([out_cls, out_patch], axis=1).reshape(B * (Cls + N), C)
    y = _ffn_call(tokens, ffn["w1"], ffn["b1"], ffn["w2"], ffn["b2"])
    y = y.reshape(B, Cls + N, C)
    y_cls = y[:, :Cls]
    y_patch = jnp.transpose(y[:, Cls:], (0, 2, 1)).reshape(B, C, Hp, Wp)
    return y_cls, y_patch


# ------------------------------------------------------------------ main
if __name__ == "__main__":
    key = jax.random.PRNGKey(0)
    B, C, Cls, H, Hp, Wp = 2, 32, 8, 4, 8, 8        # small synthetic config

    params = init_params(key, C, Cls, H)
    k1, k2 = jax.random.split(jax.random.fold_in(key, 123))
    x_cls = jax.random.normal(k1, (B, Cls, C), jnp.float32)
    x_patch = jax.random.normal(k2, (B, C, Hp, Wp), jnp.float32)

    fwd = jax.jit(functools.partial(graph_attention_forward, num_heads=H))
    out_cls, out_patch = fwd(x_cls, x_patch, params)
    out_cls, out_patch = jax.block_until_ready((out_cls, out_patch))

    assert out_cls.shape == (B, Cls, C), out_cls.shape
    assert out_patch.shape == (B, C, Hp, Wp), out_patch.shape
    assert bool(jnp.all(jnp.isfinite(out_cls)))
    assert bool(jnp.all(jnp.isfinite(out_patch)))

    print("KERNEL_OK")
</pallas_src>

<mosaic_0001>
module attributes {stable_mosaic.version = 11 : i64} {
  func.func @kernel(%arg0: i32, %arg1: memref<1x8x32xf32, #tpu.memory_space<vmem>>, %arg2: memref<1x64x32xf32, #tpu.memory_space<vmem>>, %arg3: memref<1x32xf32, #tpu.memory_space<vmem>>, %arg4: memref<1x32xf32, #tpu.memory_space<vmem>>, %arg5: memref<32x32xbf16, #tpu.memory_space<vmem>>, %arg6: memref<1x32xf32, #tpu.memory_space<vmem>>, %arg7: memref<32x64xbf16, #tpu.memory_space<vmem>>, %arg8: memref<1x64xf32, #tpu.memory_space<vmem>>, %arg9: memref<32x32xbf16, #tpu.memory_space<vmem>>, %arg10: memref<1x32xf32, #tpu.memory_space<vmem>>, %arg11: memref<1x8x32xf32, #tpu.memory_space<vmem>>, %arg12: memref<1x8x64xbf16, #tpu.memory_space<vmem>>) attributes {dimension_semantics = [#tpu.dimension_semantics<parallel>], iteration_bounds = array<i64: 2>, scalar_prefetch = 0 : i64, scratch_operands = 0 : i64, tpu.core_type = #tpu.core_type<tc>, window_params = [{transform_indices = @transform_0, window_bounds = array<i64: 1, 8, 32>}, {transform_indices = @transform_1, window_bounds = array<i64: 1, 64, 32>}, {pipeline_mode = #tpu.pipeline_mode<synchronous>, transform_indices = @transform_2, window_bounds = array<i64: 1, 32>}, {pipeline_mode = #tpu.pipeline_mode<synchronous>, transform_indices = @transform_3, window_bounds = array<i64: 1, 32>}, {pipeline_mode = #tpu.pipeline_mode<synchronous>, transform_indices = @transform_4, window_bounds = array<i64: 32, 32>}, {pipeline_mode = #tpu.pipeline_mode<synchronous>, transform_indices = @transform_5, window_bounds = array<i64: 1, 32>}, {pipeline_mode = #tpu.pipeline_mode<synchronous>, transform_indices = @transform_6, window_bounds = array<i64: 32, 64>}, {pipeline_mode = #tpu.pipeline_mode<synchronous>, transform_indices = @transform_7, window_bounds = array<i64: 1, 64>}, {pipeline_mode = #tpu.pipeline_mode<synchronous>, transform_indices = @transform_8, window_bounds = array<i64: 32, 32>}, {pipeline_mode = #tpu.pipeline_mode<synchronous>, transform_indices = @transform_9, window_bounds = array<i64: 1, 32>}, {transform_indices = @transform_10, window_bounds = array<i64: 1, 8, 32>}, {transform_indices = @transform_11, window_bounds = array<i64: 1, 8, 64>}]} {
    %c0 = arith.constant 0 : index
    %c0_0 = arith.constant 0 : index
    %c0_1 = arith.constant 0 : index
    %0 = vector.load %arg1[%c0, %c0_0, %c0_1] : memref<1x8x32xf32, #tpu.memory_space<vmem>>, vector<1x8x32xf32>
    %1 = vector.shape_cast %0 : vector<1x8x32xf32> to vector<8x32xf32>
    %c0_2 = arith.constant 0 : index
    %c0_3 = arith.constant 0 : index
    %c0_4 = arith.constant 0 : index
    %2 = vector.load %arg2[%c0_2, %c0_3, %c0_4] : memref<1x64x32xf32, #tpu.memory_space<vmem>>, vector<1x64x32xf32>
    %3 = vector.shape_cast %2 : vector<1x64x32xf32> to vector<64x32xf32>
    %cst = arith.constant dense<0.000000e+00> : vector<8xf32>
    %4 = vector.multi_reduction <add>, %1, %cst [1] : vector<8x32xf32> to vector<8xf32>
    %5 = vector.shape_cast %4 : vector<8xf32> to vector<8x1xf32>
    %cst_5 = arith.constant 3.200000e+01 : f32
    %6 = vector.broadcast %cst_5 : f32 to vector<8x1xf32>
    %7 = arith.divf %5, %6 : vector<8x1xf32>
    %8 = vector.broadcast %7 : vector<8x1xf32> to vector<8x32xf32>
    %9 = arith.subf %1, %8 : vector<8x32xf32>
    %10 = arith.mulf %9, %9 : vector<8x32xf32>
    %cst_6 = arith.constant dense<0.000000e+00> : vector<8xf32>
    %11 = vector.multi_reduction <add>, %10, %cst_6 [1] : vector<8x32xf32> to vector<8xf32>
    %12 = vector.shape_cast %11 : vector<8xf32> to vector<8x1xf32>
    %cst_7 = arith.constant 3.200000e+01 : f32
    %13 = vector.broadcast %cst_7 : f32 to vector<8x1xf32>
    %14 = arith.divf %12, %13 : vector<8x1xf32>
    %cst_8 = arith.constant 9.99999974E-6 : f32
    %15 = vector.broadcast %cst_8 : f32 to vector<8x1xf32>
    %16 = arith.addf %14, %15 : vector<8x1xf32>
    %17 = math.rsqrt %16 : vector<8x1xf32>
    %18 = vector.broadcast %17 : vector<8x1xf32> to vector<8x32xf32>
    %19 = arith.mulf %9, %18 : vector<8x32xf32>
    %c0_9 = arith.constant 0 : index
    %c0_10 = arith.constant 0 : index
    %20 = vector.load %arg3[%c0_9, %c0_10] : memref<1x32xf32, #tpu.memory_space<vmem>>, vector<1x32xf32>
    %21 = vector.broadcast %20 : vector<1x32xf32> to vector<8x32xf32>
    %22 = arith.mulf %19, %21 : vector<8x32xf32>
    %c0_11 = arith.constant 0 : index
    %c0_12 = arith.constant 0 : index
    %23 = vector.load %arg4[%c0_11, %c0_12] : memref<1x32xf32, #tpu.memory_space<vmem>>, vector<1x32xf32>
    %24 = vector.broadcast %23 : vector<1x32xf32> to vector<8x32xf32>
    %25 = arith.addf %22, %24 : vector<8x32xf32>
    %26 = arith.truncf %25 : vector<8x32xf32> to vector<8x32xbf16>
    %c0_13 = arith.constant 0 : index
    %c0_14 = arith.constant 0 : index
    %27 = vector.load %arg5[%c0_13, %c0_14] : memref<32x32xbf16, #tpu.memory_space<vmem>>, vector<32x32xbf16>
    %cst_15 = arith.constant dense<0.000000e+00> : vector<8x32xf32>
    %28 = tpu.matmul %26, %27, %cst_15 {dimension_numbers = #tpu.dot_dimension_numbers<[1], [0], [0], [1], [0, 0, 1, 1], [], []>} : vector<8x32xbf16>, vector<32x32xbf16>, vector<8x32xf32> -> vector<8x32xf32>
    %c0_16 = arith.constant 0 : index
    %c0_17 = arith.constant 0 : index
    %29 = vector.load %arg6[%c0_16, %c0_17] : memref<1x32xf32, #tpu.memory_space<vmem>>, vector<1x32xf32>
    %30 = vector.broadcast %29 : vector<1x32xf32> to vector<8x32xf32>
    %31 = arith.addf %28, %30 : vector<8x32xf32>
    %cst_18 = arith.constant dense<0.000000e+00> : vector<64xf32>
    %32 = vector.multi_reduction <add>, %3, %cst_18 [1] : vector<64x32xf32> to vector<64xf32>
    %33 = vector.shape_cast %32 : vector<64xf32> to vector<64x1xf32>
    %cst_19 = arith.constant 3.200000e+01 : f32
    %34 = vector.broadcast %cst_19 : f32 to vector<64x1xf32>
    %35 = arith.divf %33, %34 : vector<64x1xf32>
    %cst_20 = arith.constant dense<0.000000e+00> : vector<1xf32>
    %36 = vector.multi_reduction <add>, %35, %cst_20 [0] : vector<64x1xf32> to vector<1xf32>
    %37 = vector.shape_cast %36 : vector<1xf32> to vector<1x1xf32>
    %cst_21 = arith.constant 6.400000e+01 : f32
    %38 = vector.broadcast %cst_21 : f32 to vector<1x1xf32>
    %39 = arith.divf %37, %38 : vector<1x1xf32>
    %40 = vector.broadcast %39 : vector<1x1xf32> to vector<64x32xf32>
    %41 = arith.subf %3, %40 : vector<64x32xf32>
    %42 = arith.mulf %41, %41 : vector<64x32xf32>
    %cst_22 = arith.constant dense<0.000000e+00> : vector<64xf32>
    %43 = vector.multi_reduction <add>, %42, %cst_22 [1] : vector<64x32xf32> to vector<64xf32>
    %44 = vector.shape_cast %43 : vector<64xf32> to vector<64x1xf32>
    %cst_23 = arith.constant 3.200000e+01 : f32
    %45 = vector.broadcast %cst_23 : f32 to vector<64x1xf32>
    %46 = arith.divf %44, %45 : vector<64x1xf32>
    %cst_24 = arith.constant dense<0.000000e+00> : vector<1xf32>
    %47 = vector.multi_reduction <add>, %46, %cst_24 [0] : vector<64x1xf32> to vector<1xf32>
    %48 = vector.shape_cast %47 : vector<1xf32> to vector<1x1xf32>
    %cst_25 = arith.constant 6.400000e+01 : f32
    %49 = vector.broadcast %cst_25 : f32 to vector<1x1xf32>
    %50 = arith.divf %48, %49 : vector<1x1xf32>
    %cst_26 = arith.constant 9.99999974E-6 : f32
    %51 = vector.broadcast %cst_26 : f32 to vector<1x1xf32>
    %52 = arith.addf %50, %51 : vector<1x1xf32>
    %53 = math.rsqrt %52 : vector<1x1xf32>
    %54 = vector.broadcast %53 : vector<1x1xf32> to vector<64x32xf32>
    %55 = arith.mulf %41, %54 : vector<64x32xf32>
    %56 = arith.truncf %55 : vector<64x32xf32> to vector<64x32xbf16>
    %c0_27 = arith.constant 0 : index
    %c0_28 = arith.constant 0 : index
    %57 = vector.load %arg7[%c0_27, %c0_28] : memref<32x64xbf16, #tpu.memory_space<vmem>>, vector<32x64xbf16>
    %cst_29 = arith.constant dense<0.000000e+00> : vector<64x64xf32>
    %58 = tpu.matmul %56, %57, %cst_29 {dimension_numbers = #tpu.dot_dimension_numbers<[1], [0], [0], [1], [0, 0, 1, 1], [], []>} : vector<64x32xbf16>, vector<32x64xbf16>, vector<64x64xf32> -> vector<64x64xf32>
    %c0_30 = arith.constant 0 : index
    %c0_31 = arith.constant 0 : index
    %59 = vector.load %arg8[%c0_30, %c0_31] : memref<1x64xf32, #tpu.memory_space<vmem>>, vector<1x64xf32>
    %60 = vector.broadcast %59 : vector<1x64xf32> to vector<64x64xf32>
    %61 = arith.addf %58, %60 : vector<64x64xf32>
    %62 = vector.extract_strided_slice %61 {offsets = [0, 0], sizes = [64, 32], strides = [1, 1]} : vector<64x64xf32> to vector<64x32xf32>
    %63 = vector.extract_strided_slice %61 {offsets = [0, 32], sizes = [64, 32], strides = [1, 1]} : vector<64x64xf32> to vector<64x32xf32>
    %64 = vector.extract_strided_slice %31 {offsets = [0, 0], sizes = [8, 8], strides = [1, 1]} : vector<8x32xf32> to vector<8x8xf32>
    %65 = arith.truncf %64 : vector<8x8xf32> to vector<8x8xbf16>
    %66 = vector.extract_strided_slice %62 {offsets = [0, 0], sizes = [64, 8], strides = [1, 1]} : vector<64x32xf32> to vector<64x8xf32>
    %67 = arith.truncf %66 : vector<64x8xf32> to vector<64x8xbf16>
    %68 = vector.extract_strided_slice %63 {offsets = [0, 0], sizes = [64, 8], strides = [1, 1]} : vector<64x32xf32> to vector<64x8xf32>
    %69 = arith.truncf %68 : vector<64x8xf32> to vector<64x8xbf16>
    %cst_32 = arith.constant dense<0.000000e+00> : vector<8x64xf32>
    %70 = tpu.matmul %65, %67, %cst_32 {dimension_numbers = #tpu.dot_dimension_numbers<[1], [1], [0], [0], [0, 0, 1, 0], [], []>} : vector<8x8xbf16>, vector<64x8xbf16>, vector<8x64xf32> -> vector<8x64xf32>
    %cst_33 = arith.constant 0.353553385 : f32
    %71 = vector.broadcast %cst_33 : f32 to vector<8x64xf32>
    %72 = arith.mulf %70, %71 : vector<8x64xf32>
    %cst_34 = arith.constant dense<0xFF800000> : vector<8xf32>
    %73 = vector.multi_reduction <maximumf>, %72, %cst_34 [1] : vector<8x64xf32> to vector<8xf32>
    %74 = vector.shape_cast %73 : vector<8xf32> to vector<8x1xf32>
    %75 = vector.broadcast %74 : vector<8x1xf32> to vector<8x64xf32>
    %76 = arith.subf %72, %75 : vector<8x64xf32>
    %77 = math.exp %76 : vector<8x64xf32>
    %cst_35 = arith.constant dense<0.000000e+00> : vector<8xf32>
    %78 = vector.multi_reduction <add>, %77, %cst_35 [1] : vector<8x64xf32> to vector<8xf32>
    %79 = vector.shape_cast %78 : vector<8xf32> to vector<8x1xf32>
    %80 = tpu.reciprocal %79 {approx = true} : vector<8x1xf32> -> vector<8x1xf32>
    %81 = vector.broadcast %80 : vector<8x1xf32> to vector<8x64xf32>
    %82 = arith.mulf %77, %81 : vector<8x64xf32>
    %83 = arith.truncf %82 : vector<8x64xf32> to vector<8x64xbf16>
    %cst_36 = arith.constant dense<0.000000e+00> : vector<8x8xf32>
    %84 = tpu.matmul %83, %69, %cst_36 {dimension_numbers = #tpu.dot_dimension_numbers<[1], [0], [0], [1], [0, 0, 1, 1], [], []>} : vector<8x64xbf16>, vector<64x8xbf16>, vector<8x8xf32> -> vector<8x8xf32>
    %85 = vector.extract_strided_slice %31 {offsets = [0, 8], sizes = [8, 8], strides = [1, 1]} : vector<8x32xf32> to vector<8x8xf32>
    %86 = arith.truncf %85 : vector<8x8xf32> to vector<8x8xbf16>
    %87 = vector.extract_strided_slice %62 {offsets = [0, 8], sizes = [64, 8], strides = [1, 1]} : vector<64x32xf32> to vector<64x8xf32>
    %88 = arith.truncf %87 : vector<64x8xf32> to vector<64x8xbf16>
    %89 = vector.extract_strided_slice %63 {offsets = [0, 8], sizes = [64, 8], strides = [1, 1]} : vector<64x32xf32> to vector<64x8xf32>
    %90 = arith.truncf %89 : vector<64x8xf32> to vector<64x8xbf16>
    %cst_37 = arith.constant dense<0.000000e+00> : vector<8x64xf32>
    %91 = tpu.matmul %86, %88, %cst_37 {dimension_numbers = #tpu.dot_dimension_numbers<[1], [1], [0], [0], [0, 0, 1, 0], [], []>} : vector<8x8xbf16>, vector<64x8xbf16>, vector<8x64xf32> -> vector<8x64xf32>
    %cst_38 = arith.constant 0.353553385 : f32
    %92 = vector.broadcast %cst_38 : f32 to vector<8x64xf32>
    %93 = arith.mulf %91, %92 : vector<8x64xf32>
    %cst_39 = arith.constant dense<0xFF800000> : vector<8xf32>
    %94 = vector.multi_reduction <maximumf>, %93, %cst_39 [1] : vector<8x64xf32> to vector<8xf32>
    %95 = vector.shape_cast %94 : vector<8xf32> to vector<8x1xf32>
    %96 = vector.broadcast %95 : vector<8x1xf32> to vector<8x64xf32>
    %97 = arith.subf %93, %96 : vector<8x64xf32>
    %98 = math.exp %97 : vector<8x64xf32>
    %cst_40 = arith.constant dense<0.000000e+00> : vector<8xf32>
    %99 = vector.multi_reduction <add>, %98, %cst_40 [1] : vector<8x64xf32> to vector<8xf32>
    %100 = vector.shape_cast %99 : vector<8xf32> to vector<8x1xf32>
    %101 = tpu.reciprocal %100 {approx = true} : vector<8x1xf32> -> vector<8x1xf32>
    %102 = vector.broadcast %101 : vector<8x1xf32> to vector<8x64xf32>
    %103 = arith.mulf %98, %102 : vector<8x64xf32>
    %104 = arith.truncf %103 : vector<8x64xf32> to vector<8x64xbf16>
    %cst_41 = arith.constant dense<0.000000e+00> : vector<8x8xf32>
    %105 = tpu.matmul %104, %90, %cst_41 {dimension_numbers = #tpu.dot_dimension_numbers<[1], [0], [0], [1], [0, 0, 1, 1], [], []>} : vector<8x64xbf16>, vector<64x8xbf16>, vector<8x8xf32> -> vector<8x8xf32>
    %106 = vector.extract_strided_slice %31 {offsets = [0, 16], sizes = [8, 8], strides = [1, 1]} : vector<8x32xf32> to vector<8x8xf32>
    %107 = arith.truncf %106 : vector<8x8xf32> to vector<8x8xbf16>
    %108 = vector.extract_strided_slice %62 {offsets = [0, 16], sizes = [64, 8], strides = [1, 1]} : vector<64x32xf32> to vector<64x8xf32>
    %109 = arith.truncf %108 : vector<64x8xf32> to vector<64x8xbf16>
    %110 = vector.extract_strided_slice %63 {offsets = [0, 16], sizes = [64, 8], strides = [1, 1]} : vector<64x32xf32> to vector<64x8xf32>
    %111 = arith.truncf %110 : vector<64x8xf32> to vector<64x8xbf16>
    %cst_42 = arith.constant dense<0.000000e+00> : vector<8x64xf32>
    %112 = tpu.matmul %107, %109, %cst_42 {dimension_numbers = #tpu.dot_dimension_numbers<[1], [1], [0], [0], [0, 0, 1, 0], [], []>} : vector<8x8xbf16>, vector<64x8xbf16>, vector<8x64xf32> -> vector<8x64xf32>
    %cst_43 = arith.constant 0.353553385 : f32
    %113 = vector.broadcast %cst_43 : f32 to vector<8x64xf32>
    %114 = arith.mulf %112, %113 : vector<8x64xf32>
    %cst_44 = arith.constant dense<0xFF800000> : vector<8xf32>
    %115 = vector.multi_reduction <maximumf>, %114, %cst_44 [1] : vector<8x64xf32> to vector<8xf32>
    %116 = vector.shape_cast %115 : vector<8xf32> to vector<8x1xf32>
    %117 = vector.broadcast %116 : vector<8x1xf32> to vector<8x64xf32>
    %118 = arith.subf %114, %117 : vector<8x64xf32>
    %119 = math.exp %118 : vector<8x64xf32>
    %cst_45 = arith.constant dense<0.000000e+00> : vector<8xf32>
    %120 = vector.multi_reduction <add>, %119, %cst_45 [1] : vector<8x64xf32> to vector<8xf32>
    %121 = vector.shape_cast %120 : vector<8xf32> to vector<8x1xf32>
    %122 = tpu.reciprocal %121 {approx = true} : vector<8x1xf32> -> vector<8x1xf32>
    %123 = vector.broadcast %122 : vector<8x1xf32> to vector<8x64xf32>
    %124 = arith.mulf %119, %123 : vector<8x64xf32>
    %125 = arith.truncf %124 : vector<8x64xf32> to vector<8x64xbf16>
    %cst_46 = arith.constant dense<0.000000e+00> : vector<8x8xf32>
    %126 = tpu.matmul %125, %111, %cst_46 {dimension_numbers = #tpu.dot_dimension_numbers<[1], [0], [0], [1], [0, 0, 1, 1], [], []>} : vector<8x64xbf16>, vector<64x8xbf16>, vector<8x8xf32> -> vector<8x8xf32>
    %127 = vector.extract_strided_slice %31 {offsets = [0, 24], sizes = [8, 8], strides = [1, 1]} : vector<8x32xf32> to vector<8x8xf32>
    %128 = arith.truncf %127 : vector<8x8xf32> to vector<8x8xbf16>
    %129 = vector.extract_strided_slice %62 {offsets = [0, 24], sizes = [64, 8], strides = [1, 1]} : vector<64x32xf32> to vector<64x8xf32>
    %130 = arith.truncf %129 : vector<64x8xf32> to vector<64x8xbf16>
    %131 = vector.extract_strided_slice %63 {offsets = [0, 24], sizes = [64, 8], strides = [1, 1]} : vector<64x32xf32> to vector<64x8xf32>
    %132 = arith.truncf %131 : vector<64x8xf32> to vector<64x8xbf16>
    %cst_47 = arith.constant dense<0.000000e+00> : vector<8x64xf32>
    %133 = tpu.matmul %128, %130, %cst_47 {dimension_numbers = #tpu.dot_dimension_numbers<[1], [1], [0], [0], [0, 0, 1, 0], [], []>} : vector<8x8xbf16>, vector<64x8xbf16>, vector<8x64xf32> -> vector<8x64xf32>
    %cst_48 = arith.constant 0.353553385 : f32
    %134 = vector.broadcast %cst_48 : f32 to vector<8x64xf32>
    %135 = arith.mulf %133, %134 : vector<8x64xf32>
    %cst_49 = arith.constant dense<0xFF800000> : vector<8xf32>
    %136 = vector.multi_reduction <maximumf>, %135, %cst_49 [1] : vector<8x64xf32> to vector<8xf32>
    %137 = vector.shape_cast %136 : vector<8xf32> to vector<8x1xf32>
    %138 = vector.broadcast %137 : vector<8x1xf32> to vector<8x64xf32>
    %139 = arith.subf %135, %138 : vector<8x64xf32>
    %140 = math.exp %139 : vector<8x64xf32>
    %cst_50 = arith.constant dense<0.000000e+00> : vector<8xf32>
    %141 = vector.multi_reduction <add>, %140, %cst_50 [1] : vector<8x64xf32> to vector<8xf32>
    %142 = vector.shape_cast %141 : vector<8xf32> to vector<8x1xf32>
    %143 = tpu.reciprocal %142 {approx = true} : vector<8x1xf32> -> vector<8x1xf32>
    %144 = vector.broadcast %143 : vector<8x1xf32> to vector<8x64xf32>
    %145 = arith.mulf %140, %144 : vector<8x64xf32>
    %146 = arith.truncf %145 : vector<8x64xf32> to vector<8x64xbf16>
    %cst_51 = arith.constant dense<0.000000e+00> : vector<8x8xf32>
    %147 = tpu.matmul %146, %132, %cst_51 {dimension_numbers = #tpu.dot_dimension_numbers<[1], [0], [0], [1], [0, 0, 1, 1], [], []>} : vector<8x64xbf16>, vector<64x8xbf16>, vector<8x8xf32> -> vector<8x8xf32>
    %148 = tpu.concatenate %84, %105, %126, %147 in 1 : vector<8x8xf32>, vector<8x8xf32>, vector<8x8xf32>, vector<8x8xf32> -> vector<8x32xf32>
    %149 = arith.truncf %148 : vector<8x32xf32> to vector<8x32xbf16>
    %c0_52 = arith.constant 0 : index
    %c0_53 = arith.constant 0 : index
    %150 = vector.load %arg9[%c0_52, %c0_53] : memref<32x32xbf16, #tpu.memory_space<vmem>>, vector<32x32xbf16>
    %cst_54 = arith.constant dense<0.000000e+00> : vector<8x32xf32>
    %151 = tpu.matmul %149, %150, %cst_54 {dimension_numbers = #tpu.dot_dimension_numbers<[1], [0], [0], [1], [0, 0, 1, 1], [], []>} : vector<8x32xbf16>, vector<32x32xbf16>, vector<8x32xf32> -> vector<8x32xf32>
    %c0_55 = arith.constant 0 : index
    %c0_56 = arith.constant 0 : index
    %152 = vector.load %arg10[%c0_55, %c0_56] : memref<1x32xf32, #tpu.memory_space<vmem>>, vector<1x32xf32>
    %153 = vector.broadcast %152 : vector<1x32xf32> to vector<8x32xf32>
    %154 = arith.addf %151, %153 : vector<8x32xf32>
    %155 = arith.addf %154, %1 : vector<8x32xf32>
    %c0_57 = arith.constant 0 : index
    %c0_58 = arith.constant 0 : index
    %c0_59 = arith.constant 0 : index
    %156 = vector.load %arg11[%c0_57, %c0_58, %c0_59] : memref<1x8x32xf32, #tpu.memory_space<vmem>>, vector<1x8x32xf32>
    %157 = vector.shape_cast %156 : vector<1x8x32xf32> to vector<8x32xf32>
    %158 = vector.shape_cast %155 : vector<8x32xf32> to vector<1x8x32xf32>
    tpu.vector_store %arg11[%c0_57, %c0_58, %c0_59], %158 {strides = array<i32>} : memref<1x8x32xf32, #tpu.memory_space<vmem>>, vector<1x8x32xf32>,
    %159 = arith.truncf %155 : vector<8x32xf32> to vector<8x32xbf16>
    %160 = arith.truncf %3 : vector<64x32xf32> to vector<64x32xbf16>
    %cst_60 = arith.constant dense<0.000000e+00> : vector<8x64xf32>
    %161 = tpu.matmul %159, %160, %cst_60 {dimension_numbers = #tpu.dot_dimension_numbers<[1], [1], [0], [0], [0, 0, 1, 0], [], []>} : vector<8x32xbf16>, vector<64x32xbf16>, vector<8x64xf32> -> vector<8x64xf32>
    %162 = arith.truncf %161 : vector<8x64xf32> to vector<8x64xbf16>
    %c0_61 = arith.constant 0 : index
    %c0_62 = arith.constant 0 : index
    %c0_63 = arith.constant 0 : index
    %163 = vector.load %arg12[%c0_61, %c0_62, %c0_63] : memref<1x8x64xbf16, #tpu.memory_space<vmem>>, vector<1x8x64xbf16>
    %164 = vector.shape_cast %163 : vector<1x8x64xbf16> to vector<8x64xbf16>
    %165 = vector.shape_cast %162 : vector<8x64xbf16> to vector<1x8x64xbf16>
    tpu.vector_store %arg12[%c0_61, %c0_62, %c0_63], %165 {strides = array<i32>} : memref<1x8x64xbf16, #tpu.memory_space<vmem>>, vector<1x8x64xbf16>,
    return
  }
  func.func @transform_0(%arg0: i32) -> (i32, i32, i32) {
    %c0_i32 = arith.constant 0 : i32
    %c0_i32_0 = arith.constant 0 : i32
    %c0_i32_1 = arith.constant 0 : i32
    return %arg0, %c0_i32, %c0_i32_0 : i32, i32, i32
  }
  func.func @transform_1(%arg0: i32) -> (i32, i32, i32) {
    %c0_i32 = arith.constant 0 : i32
    %c0_i32_0 = arith.constant 0 : i32
    %c0_i32_1 = arith.constant 0 : i32
    return %arg0, %c0_i32, %c0_i32_0 : i32, i32, i32
  }
  func.func @transform_2(%arg0: i32) -> (i32, i32) {
    %c0_i32 = arith.constant 0 : i32
    %c0_i32_0 = arith.constant 0 : i32
    %c0_i32_1 = arith.constant 0 : i32
    return %c0_i32, %c0_i32_0 : i32, i32
  }
  func.func @transform_3(%arg0: i32) -> (i32, i32) {
    %c0_i32 = arith.constant 0 : i32
    %c0_i32_0 = arith.constant 0 : i32
    %c0_i32_1 = arith.constant 0 : i32
    return %c0_i32, %c0_i32_0 : i32, i32
  }
  func.func @transform_4(%arg0: i32) -> (i32, i32) {
    %c0_i32 = arith.constant 0 : i32
    %c0_i32_0 = arith.constant 0 : i32
    %c0_i32_1 = arith.constant 0 : i32
    return %c0_i32, %c0_i32_0 : i32, i32
  }
  func.func @transform_5(%arg0: i32) -> (i32, i32) {
    %c0_i32 = arith.constant 0 : i32
    %c0_i32_0 = arith.constant 0 : i32
    %c0_i32_1 = arith.constant 0 : i32
    return %c0_i32, %c0_i32_0 : i32, i32
  }
  func.func @transform_6(%arg0: i32) -> (i32, i32) {
    %c0_i32 = arith.constant 0 : i32
    %c0_i32_0 = arith.constant 0 : i32
    %c0_i32_1 = arith.constant 0 : i32
    return %c0_i32, %c0_i32_0 : i32, i32
  }
  func.func @transform_7(%arg0: i32) -> (i32, i32) {
    %c0_i32 = arith.constant 0 : i32
    %c0_i32_0 = arith.constant 0 : i32
    %c0_i32_1 = arith.constant 0 : i32
    return %c0_i32, %c0_i32_0 : i32, i32
  }
  func.func @transform_8(%arg0: i32) -> (i32, i32) {
    %c0_i32 = arith.constant 0 : i32
    %c0_i32_0 = arith.constant 0 : i32
    %c0_i32_1 = arith.constant 0 : i32
    return %c0_i32, %c0_i32_0 : i32, i32
  }
  func.func @transform_9(%arg0: i32) -> (i32, i32) {
    %c0_i32 = arith.constant 0 : i32
    %c0_i32_0 = arith.constant 0 : i32
    %c0_i32_1 = arith.constant 0 : i32
    return %c0_i32, %c0_i32_0 : i32, i32
  }
  func.func @transform_10(%arg0: i32) -> (i32, i32, i32) {
    %c0_i32 = arith.constant 0 : i32
    %c0_i32_0 = arith.constant 0 : i32
    %c0_i32_1 = arith.constant 0 : i32
    return %arg0, %c0_i32, %c0_i32_0 : i32, i32, i32
  }
  func.func @transform_11(%arg0: i32) -> (i32, i32, i32) {
    %c0_i32 = arith.constant 0 : i32
    %c0_i32_0 = arith.constant 0 : i32
    %c0_i32_1 = arith.constant 0 : i32
    return %arg0, %c0_i32, %c0_i32_0 : i32, i32, i32
  }
}

module attributes {stable_mosaic.version = 11 : i64} {
  func.func @kernel(%arg0: i32, %arg1: memref<1x64x72xbf16, #tpu.memory_space<vmem>>, %arg2: memref<1x8x32xf32, #tpu.memory_space<vmem>>, %arg3: memref<72x32xbf16, #tpu.memory_space<vmem>>, %arg4: memref<1x32xf32, #tpu.memory_space<vmem>>, %arg5: memref<32x32xbf16, #tpu.memory_space<vmem>>, %arg6: memref<1x32xf32, #tpu.memory_space<vmem>>, %arg7: memref<1x32xf32, #tpu.memory_space<vmem>>, %arg8: memref<1x32xf32, #tpu.memory_space<vmem>>, %arg9: memref<32x64xbf16, #tpu.memory_space<vmem>>, %arg10: memref<1x64xf32, #tpu.memory_space<vmem>>, %arg11: memref<32x32xbf16, #tpu.memory_space<vmem>>, %arg12: memref<1x32xf32, #tpu.memory_space<vmem>>, %arg13: memref<1x64x32xf32, #tpu.memory_space<vmem>>, %arg14: memref<1x8x32xbf16, #tpu.memory_space<vmem>>, %arg15: memref<1x64x32xf32, #tpu.memory_space<vmem>>, %arg16: memref<1x64x32xf32, #tpu.memory_space<vmem>>, %arg17: memref<1x64x64xf32, #tpu.memory_space<vmem>>) attributes {dimension_semantics = [#tpu.dimension_semantics<parallel>], iteration_bounds = array<i64: 2>, scalar_prefetch = 0 : i64, scratch_operands = 0 : i64, tpu.core_type = #tpu.core_type<tc>, window_params = [{transform_indices = @transform_0, window_bounds = array<i64: 1, 64, 72>}, {transform_indices = @transform_1, window_bounds = array<i64: 1, 8, 32>}, {pipeline_mode = #tpu.pipeline_mode<synchronous>, transform_indices = @transform_2, window_bounds = array<i64: 72, 32>}, {pipeline_mode = #tpu.pipeline_mode<synchronous>, transform_indices = @transform_3, window_bounds = array<i64: 1, 32>}, {pipeline_mode = #tpu.pipeline_mode<synchronous>, transform_indices = @transform_4, window_bounds = array<i64: 32, 32>}, {pipeline_mode = #tpu.pipeline_mode<synchronous>, transform_indices = @transform_5, window_bounds = array<i64: 1, 32>}, {pipeline_mode = #tpu.pipeline_mode<synchronous>, transform_indices = @transform_6, window_bounds = array<i64: 1, 32>}, {pipeline_mode = #tpu.pipeline_mode<synchronous>, transform_indices = @transform_7, window_bounds = array<i64: 1, 32>}, {pipeline_mode = #tpu.pipeline_mode<synchronous>, transform_indices = @transform_8, window_bounds = array<i64: 32, 64>}, {pipeline_mode = #tpu.pipeline_mode<synchronous>, transform_indices = @transform_9, window_bounds = array<i64: 1, 64>}, {pipeline_mode = #tpu.pipeline_mode<synchronous>, transform_indices = @transform_10, window_bounds = array<i64: 32, 32>}, {pipeline_mode = #tpu.pipeline_mode<synchronous>, transform_indices = @transform_11, window_bounds = array<i64: 1, 32>}, {transform_indices = @transform_12, window_bounds = array<i64: 1, 64, 32>}, {transform_indices = @transform_13, window_bounds = array<i64: 1, 8, 32>}, {transform_indices = @transform_14, window_bounds = array<i64: 1, 64, 32>}, {transform_indices = @transform_15, window_bounds = array<i64: 1, 64, 32>}, {transform_indices = @transform_16, window_bounds = array<i64: 1, 64, 64>}]} {
    %c0 = arith.constant 0 : index
    %c0_0 = arith.constant 0 : index
    %c0_1 = arith.constant 0 : index
    %0 = vector.load %arg1[%c0, %c0_0, %c0_1] : memref<1x64x72xbf16, #tpu.memory_space<vmem>>, vector<1x64x72xbf16>
    %1 = vector.shape_cast %0 : vector<1x64x72xbf16> to vector<64x72xbf16>
    %c0_2 = arith.constant 0 : index
    %c0_3 = arith.constant 0 : index
    %2 = vector.load %arg3[%c0_2, %c0_3] : memref<72x32xbf16, #tpu.memory_space<vmem>>, vector<72x32xbf16>
    %cst = arith.constant dense<0.000000e+00> : vector<64x32xf32>
    %3 = tpu.matmul %1, %2, %cst {dimension_numbers = #tpu.dot_dimension_numbers<[1], [0], [0], [1], [0, 0, 1, 1], [], []>} : vector<64x72xbf16>, vector<72x32xbf16>, vector<64x32xf32> -> vector<64x32xf32>
    %c0_4 = arith.constant 0 : index
    %c0_5 = arith.constant 0 : index
    %4 = vector.load %arg4[%c0_4, %c0_5] : memref<1x32xf32, #tpu.memory_space<vmem>>, vector<1x32xf32>
    %5 = vector.broadcast %4 : vector<1x32xf32> to vector<64x32xf32>
    %6 = arith.addf %3, %5 : vector<64x32xf32>
    %cst_6 = arith.constant 5.000000e-01 : f32
    %7 = vector.broadcast %cst_6 : f32 to vector<64x32xf32>
    %8 = arith.mulf %7, %6 : vector<64x32xf32>
    %cst_7 = arith.constant 4.471500e-02 : f32
    %9 = vector.broadcast %cst_7 : f32 to vector<64x32xf32>
    %10 = arith.mulf %9, %6 : vector<64x32xf32>
    %11 = arith.mulf %10, %6 : vector<64x32xf32>
    %12 = arith.mulf %11, %6 : vector<64x32xf32>
    %13 = arith.addf %6, %12 : vector<64x32xf32>
    %cst_8 = arith.constant 0.797884583 : f32
    %14 = vector.broadcast %cst_8 : f32 to vector<64x32xf32>
    %15 = arith.mulf %14, %13 : vector<64x32xf32>
    %16 = math.tanh %15 : vector<64x32xf32>
    %cst_9 = arith.constant 1.000000e+00 : f32
    %17 = vector.broadcast %cst_9 : f32 to vector<64x32xf32>
    %18 = arith.addf %17, %16 : vector<64x32xf32>
    %19 = arith.mulf %8, %18 : vector<64x32xf32>
    %c0_10 = arith.constant 0 : index
    %c0_11 = arith.constant 0 : index
    %c0_12 = arith.constant 0 : index
    %20 = vector.load %arg13[%c0_10, %c0_11, %c0_12] : memref<1x64x32xf32, #tpu.memory_space<vmem>>, vector<1x64x32xf32>
    %21 = vector.shape_cast %20 : vector<1x64x32xf32> to vector<64x32xf32>
    %22 = vector.shape_cast %19 : vector<64x32xf32> to vector<1x64x32xf32>
    tpu.vector_store %arg13[%c0_10, %c0_11, %c0_12], %22 {strides = array<i32>} : memref<1x64x32xf32, #tpu.memory_space<vmem>>, vector<1x64x32xf32>,
    %cst_13 = arith.constant dense<0.000000e+00> : vector<64xf32>
    %23 = vector.multi_reduction <add>, %19, %cst_13 [1] : vector<64x32xf32> to vector<64xf32>
    %24 = vector.shape_cast %23 : vector<64xf32> to vector<64x1xf32>
    %cst_14 = arith.constant 3.200000e+01 : f32
    %25 = vector.broadcast %cst_14 : f32 to vector<64x1xf32>
    %26 = arith.divf %24, %25 : vector<64x1xf32>
    %cst_15 = arith.constant dense<0.000000e+00> : vector<1xf32>
    %27 = vector.multi_reduction <add>, %26, %cst_15 [0] : vector<64x1xf32> to vector<1xf32>
    %28 = vector.shape_cast %27 : vector<1xf32> to vector<1x1xf32>
    %cst_16 = arith.constant 6.400000e+01 : f32
    %29 = vector.broadcast %cst_16 : f32 to vector<1x1xf32>
    %30 = arith.divf %28, %29 : vector<1x1xf32>
    %31 = vector.broadcast %30 : vector<1x1xf32> to vector<64x32xf32>
    %32 = arith.subf %19, %31 : vector<64x32xf32>
    %33 = arith.mulf %32, %32 : vector<64x32xf32>
    %cst_17 = arith.constant dense<0.000000e+00> : vector<64xf32>
    %34 = vector.multi_reduction <add>, %33, %cst_17 [1] : vector<64x32xf32> to vector<64xf32>
    %35 = vector.shape_cast %34 : vector<64xf32> to vector<64x1xf32>
    %cst_18 = arith.constant 3.200000e+01 : f32
    %36 = vector.broadcast %cst_18 : f32 to vector<64x1xf32>
    %37 = arith.divf %35, %36 : vector<64x1xf32>
    %cst_19 = arith.constant dense<0.000000e+00> : vector<1xf32>
    %38 = vector.multi_reduction <add>, %37, %cst_19 [0] : vector<64x1xf32> to vector<1xf32>
    %39 = vector.shape_cast %38 : vector<1xf32> to vector<1x1xf32>
    %cst_20 = arith.constant 6.400000e+01 : f32
    %40 = vector.broadcast %cst_20 : f32 to vector<1x1xf32>
    %41 = arith.divf %39, %40 : vector<1x1xf32>
    %cst_21 = arith.constant 9.99999974E-6 : f32
    %42 = vector.broadcast %cst_21 : f32 to vector<1x1xf32>
    %43 = arith.addf %41, %42 : vector<1x1xf32>
    %44 = math.rsqrt %43 : vector<1x1xf32>
    %45 = vector.broadcast %44 : vector<1x1xf32> to vector<64x32xf32>
    %46 = arith.mulf %32, %45 : vector<64x32xf32>
    %47 = arith.truncf %46 : vector<64x32xf32> to vector<64x32xbf16>
    %c0_22 = arith.constant 0 : index
    %c0_23 = arith.constant 0 : index
    %48 = vector.load %arg5[%c0_22, %c0_23] : memref<32x32xbf16, #tpu.memory_space<vmem>>, vector<32x32xbf16>
    %cst_24 = arith.constant dense<0.000000e+00> : vector<64x32xf32>
    %49 = tpu.matmul %47, %48, %cst_24 {dimension_numbers = #tpu.dot_dimension_numbers<[1], [0], [0], [1], [0, 0, 1, 1], [], []>} : vector<64x32xbf16>, vector<32x32xbf16>, vector<64x32xf32> -> vector<64x32xf32>
    %c0_25 = arith.constant 0 : index
    %c0_26 = arith.constant 0 : index
    %50 = vector.load %arg6[%c0_25, %c0_26] : memref<1x32xf32, #tpu.memory_space<vmem>>, vector<1x32xf32>
    %51 = vector.broadcast %50 : vector<1x32xf32> to vector<64x32xf32>
    %52 = arith.addf %49, %51 : vector<64x32xf32>
    %c0_27 = arith.constant 0 : index
    %c0_28 = arith.constant 0 : index
    %c0_29 = arith.constant 0 : index
    %53 = vector.load %arg2[%c0_27, %c0_28, %c0_29] : memref<1x8x32xf32, #tpu.memory_space<vmem>>, vector<1x8x32xf32>
    %54 = vector.shape_cast %53 : vector<1x8x32xf32> to vector<8x32xf32>
    %cst_30 = arith.constant dense<0.000000e+00> : vector<8xf32>
    %55 = vector.multi_reduction <add>, %54, %cst_30 [1] : vector<8x32xf32> to vector<8xf32>
    %56 = vector.shape_cast %55 : vector<8xf32> to vector<8x1xf32>
    %cst_31 = arith.constant 3.200000e+01 : f32
    %57 = vector.broadcast %cst_31 : f32 to vector<8x1xf32>
    %58 = arith.divf %56, %57 : vector<8x1xf32>
    %59 = vector.broadcast %58 : vector<8x1xf32> to vector<8x32xf32>
    %60 = arith.subf %54, %59 : vector<8x32xf32>
    %61 = arith.mulf %60, %60 : vector<8x32xf32>
    %cst_32 = arith.constant dense<0.000000e+00> : vector<8xf32>
    %62 = vector.multi_reduction <add>, %61, %cst_32 [1] : vector<8x32xf32> to vector<8xf32>
    %63 = vector.shape_cast %62 : vector<8xf32> to vector<8x1xf32>
    %cst_33 = arith.constant 3.200000e+01 : f32
    %64 = vector.broadcast %cst_33 : f32 to vector<8x1xf32>
    %65 = arith.divf %63, %64 : vector<8x1xf32>
    %cst_34 = arith.constant 9.99999974E-6 : f32
    %66 = vector.broadcast %cst_34 : f32 to vector<8x1xf32>
    %67 = arith.addf %65, %66 : vector<8x1xf32>
    %68 = math.rsqrt %67 : vector<8x1xf32>
    %69 = vector.broadcast %68 : vector<8x1xf32> to vector<8x32xf32>
    %70 = arith.mulf %60, %69 : vector<8x32xf32>
    %c0_35 = arith.constant 0 : index
    %c0_36 = arith.constant 0 : index
    %71 = vector.load %arg7[%c0_35, %c0_36] : memref<1x32xf32, #tpu.memory_space<vmem>>, vector<1x32xf32>
    %72 = vector.broadcast %71 : vector<1x32xf32> to vector<8x32xf32>
    %73 = arith.mulf %70, %72 : vector<8x32xf32>
    %c0_37 = arith.constant 0 : index
    %c0_38 = arith.constant 0 : index
    %74 = vector.load %arg8[%c0_37, %c0_38] : memref<1x32xf32, #tpu.memory_space<vmem>>, vector<1x32xf32>
    %75 = vector.broadcast %74 : vector<1x32xf32> to vector<8x32xf32>
    %76 = arith.addf %73, %75 : vector<8x32xf32>
    %77 = arith.truncf %76 : vector<8x32xf32> to vector<8x32xbf16>
    %c0_39 = arith.constant 0 : index
    %c0_40 = arith.constant 0 : index
    %78 = vector.load %arg9[%c0_39, %c0_40] : memref<32x64xbf16, #tpu.memory_space<vmem>>, vector<32x64xbf16>
    %cst_41 = arith.constant dense<0.000000e+00> : vector<8x64xf32>
    %79 = tpu.matmul %77, %78, %cst_41 {dimension_numbers = #tpu.dot_dimension_numbers<[1], [0], [0], [1], [0, 0, 1, 1], [], []>} : vector<8x32xbf16>, vector<32x64xbf16>, vector<8x64xf32> -> vector<8x64xf32>
    %c0_42 = arith.constant 0 : index
    %c0_43 = arith.constant 0 : index
    %80 = vector.load %arg10[%c0_42, %c0_43] : memref<1x64xf32, #tpu.memory_space<vmem>>, vector<1x64xf32>
    %81 = vector.broadcast %80 : vector<1x64xf32> to vector<8x64xf32>
    %82 = arith.addf %79, %81 : vector<8x64xf32>
    %83 = vector.extract_strided_slice %82 {offsets = [0, 0], sizes = [8, 32], strides = [1, 1]} : vector<8x64xf32> to vector<8x32xf32>
    %84 = vector.extract_strided_slice %82 {offsets = [0, 32], sizes = [8, 32], strides = [1, 1]} : vector<8x64xf32> to vector<8x32xf32>
    %85 = arith.truncf %84 : vector<8x32xf32> to vector<8x32xbf16>
    %c0_44 = arith.constant 0 : index
    %c0_45 = arith.constant 0 : index
    %c0_46 = arith.constant 0 : index
    %86 = vector.load %arg14[%c0_44, %c0_45, %c0_46] : memref<1x8x32xbf16, #tpu.memory_space<vmem>>, vector<1x8x32xbf16>
    %87 = vector.shape_cast %86 : vector<1x8x32xbf16> to vector<8x32xbf16>
    %88 = vector.shape_cast %85 : vector<8x32xbf16> to vector<1x8x32xbf16>
    tpu.vector_store %arg14[%c0_44, %c0_45, %c0_46], %88 {strides = array<i32>} : memref<1x8x32xbf16, #tpu.memory_space<vmem>>, vector<1x8x32xbf16>,
    %89 = vector.extract_strided_slice %52 {offsets = [0, 0], sizes = [64, 8], strides = [1, 1]} : vector<64x32xf32> to vector<64x8xf32>
    %90 = arith.truncf %89 : vector<64x8xf32> to vector<64x8xbf16>
    %91 = vector.extract_strided_slice %83 {offsets = [0, 0], sizes = [8, 8], strides = [1, 1]} : vector<8x32xf32> to vector<8x8xf32>
    %92 = arith.truncf %91 : vector<8x8xf32> to vector<8x8xbf16>
    %cst_47 = arith.constant dense<0.000000e+00> : vector<64x8xf32>
    %93 = tpu.matmul %90, %92, %cst_47 {dimension_numbers = #tpu.dot_dimension_numbers<[1], [1], [0], [0], [0, 0, 1, 0], [], []>} : vector<64x8xbf16>, vector<8x8xbf16>, vector<64x8xf32> -> vector<64x8xf32>
    %cst_48 = arith.constant 0.353553385 : f32
    %94 = vector.broadcast %cst_48 : f32 to vector<64x8xf32>
    %95 = arith.mulf %93, %94 : vector<64x8xf32>
    %96 = vector.extract_strided_slice %52 {offsets = [0, 8], sizes = [64, 8], strides = [1, 1]} : vector<64x32xf32> to vector<64x8xf32>
    %97 = arith.truncf %96 : vector<64x8xf32> to vector<64x8xbf16>
    %98 = vector.extract_strided_slice %83 {offsets = [0, 8], sizes = [8, 8], strides = [1, 1]} : vector<8x32xf32> to vector<8x8xf32>
    %99 = arith.truncf %98 : vector<8x8xf32> to vector<8x8xbf16>
    %cst_49 = arith.constant dense<0.000000e+00> : vector<64x8xf32>
    %100 = tpu.matmul %97, %99, %cst_49 {dimension_numbers = #tpu.dot_dimension_numbers<[1], [1], [0], [0], [0, 0, 1, 0], [], []>} : vector<64x8xbf16>, vector<8x8xbf16>, vector<64x8xf32> -> vector<64x8xf32>
    %cst_50 = arith.constant 0.353553385 : f32
    %101 = vector.broadcast %cst_50 : f32 to vector<64x8xf32>
    %102 = arith.mulf %100, %101 : vector<64x8xf32>
    %103 = vector.extract_strided_slice %52 {offsets = [0, 16], sizes = [64, 8], strides = [1, 1]} : vector<64x32xf32> to vector<64x8xf32>
    %104 = arith.truncf %103 : vector<64x8xf32> to vector<64x8xbf16>
    %105 = vector.extract_strided_slice %83 {offsets = [0, 16], sizes = [8, 8], strides = [1, 1]} : vector<8x32xf32> to vector<8x8xf32>
    %106 = arith.truncf %105 : vector<8x8xf32> to vector<8x8xbf16>
    %cst_51 = arith.constant dense<0.000000e+00> : vector<64x8xf32>
    %107 = tpu.matmul %104, %106, %cst_51 {dimension_numbers = #tpu.dot_dimension_numbers<[1], [1], [0], [0], [0, 0, 1, 0], [], []>} : vector<64x8xbf16>, vector<8x8xbf16>, vector<64x8xf32> -> vector<64x8xf32>
    %cst_52 = arith.constant 0.353553385 : f32
    %108 = vector.broadcast %cst_52 : f32 to vector<64x8xf32>
    %109 = arith.mulf %107, %108 : vector<64x8xf32>
    %110 = vector.extract_strided_slice %52 {offsets = [0, 24], sizes = [64, 8], strides = [1, 1]} : vector<64x32xf32> to vector<64x8xf32>
    %111 = arith.truncf %110 : vector<64x8xf32> to vector<64x8xbf16>
    %112 = vector.extract_strided_slice %83 {offsets = [0, 24], sizes = [8, 8], strides = [1, 1]} : vector<8x32xf32> to vector<8x8xf32>
    %113 = arith.truncf %112 : vector<8x8xf32> to vector<8x8xbf16>
    %cst_53 = arith.constant dense<0.000000e+00> : vector<64x8xf32>
    %114 = tpu.matmul %111, %113, %cst_53 {dimension_numbers = #tpu.dot_dimension_numbers<[1], [1], [0], [0], [0, 0, 1, 0], [], []>} : vector<64x8xbf16>, vector<8x8xbf16>, vector<64x8xf32> -> vector<64x8xf32>
    %cst_54 = arith.constant 0.353553385 : f32
    %115 = vector.broadcast %cst_54 : f32 to vector<64x8xf32>
    %116 = arith.mulf %114, %115 : vector<64x8xf32>
    %117 = tpu.concatenate %95, %102, %109, %116 in 1 : vector<64x8xf32>, vector<64x8xf32>, vector<64x8xf32>, vector<64x8xf32> -> vector<64x32xf32>
    %c0_55 = arith.constant 0 : index
    %c0_56 = arith.constant 0 : index
    %c0_57 = arith.constant 0 : index
    %118 = vector.load %arg15[%c0_55, %c0_56, %c0_57] : memref<1x64x32xf32, #tpu.memory_space<vmem>>, vector<1x64x32xf32>
    %119 = vector.shape_cast %118 : vector<1x64x32xf32> to vector<64x32xf32>
    %120 = vector.shape_cast %117 : vector<64x32xf32> to vector<1x64x32xf32>
    tpu.vector_store %arg15[%c0_55, %c0_56, %c0_57], %120 {strides = array<i32>} : memref<1x64x32xf32, #tpu.memory_space<vmem>>, vector<1x64x32xf32>,
    %121 = arith.truncf %117 : vector<64x32xf32> to vector<64x32xbf16>
    %c0_58 = arith.constant 0 : index
    %c0_59 = arith.constant 0 : index
    %122 = vector.load %arg11[%c0_58, %c0_59] : memref<32x32xbf16, #tpu.memory_space<vmem>>, vector<32x32xbf16>
    %cst_60 = arith.constant dense<0.000000e+00> : vector<64x32xf32>
    %123 = tpu.matmul %121, %122, %cst_60 {dimension_numbers = #tpu.dot_dimension_numbers<[1], [0], [0], [1], [0, 0, 1, 1], [], []>} : vector<64x32xbf16>, vector<32x32xbf16>, vector<64x32xf32> -> vector<64x32xf32>
    %c0_61 = arith.constant 0 : index
    %c0_62 = arith.constant 0 : index
    %124 = vector.load %arg12[%c0_61, %c0_62] : memref<1x32xf32, #tpu.memory_space<vmem>>, vector<1x32xf32>
    %125 = vector.broadcast %124 : vector<1x32xf32> to vector<64x32xf32>
    %126 = arith.addf %123, %125 : vector<64x32xf32>
    %c0_63 = arith.constant 0 : index
    %c0_64 = arith.constant 0 : index
    %c0_65 = arith.constant 0 : index
    %127 = vector.load %arg16[%c0_63, %c0_64, %c0_65] : memref<1x64x32xf32, #tpu.memory_space<vmem>>, vector<1x64x32xf32>
    %128 = vector.shape_cast %127 : vector<1x64x32xf32> to vector<64x32xf32>
    %129 = vector.shape_cast %126 : vector<64x32xf32> to vector<1x64x32xf32>
    tpu.vector_store %arg16[%c0_63, %c0_64, %c0_65], %129 {strides = array<i32>} : memref<1x64x32xf32, #tpu.memory_space<vmem>>, vector<1x64x32xf32>,
    %130 = arith.mulf %126, %126 : vector<64x32xf32>
    %cst_66 = arith.constant dense<0.000000e+00> : vector<64xf32>
    %131 = vector.multi_reduction <add>, %130, %cst_66 [1] : vector<64x32xf32> to vector<64xf32>
    %132 = vector.shape_cast %131 : vector<64xf32> to vector<64x1xf32>
    %cst_67 = arith.constant 1.000000e-24 : f32
    %133 = vector.broadcast %cst_67 : f32 to vector<64x1xf32>
    %134 = arith.maximumf %132, %133 : vector<64x1xf32>
    %135 = math.rsqrt %134 : vector<64x1xf32>
    %136 = vector.broadcast %135 : vector<64x1xf32> to vector<64x32xf32>
    %137 = arith.mulf %126, %136 : vector<64x32xf32>
    %138 = arith.truncf %137 : vector<64x32xf32> to vector<64x32xbf16>
    %139 = arith.truncf %137 : vector<64x32xf32> to vector<64x32xbf16>
    %cst_68 = arith.constant dense<0.000000e+00> : vector<64x64xf32>
    %140 = tpu.matmul %138, %139, %cst_68 {dimension_numbers = #tpu.dot_dimension_numbers<[1], [1], [0], [0], [0, 0, 1, 0], [], []>} : vector<64x32xbf16>, vector<64x32xbf16>, vector<64x64xf32> -> vector<64x64xf32>
    %c0_69 = arith.constant 0 : index
    %c0_70 = arith.constant 0 : index
    %c0_71 = arith.constant 0 : index
    %141 = vector.load %arg17[%c0_69, %c0_70, %c0_71] : memref<1x64x64xf32, #tpu.memory_space<vmem>>, vector<1x64x64xf32>
    %142 = vector.shape_cast %141 : vector<1x64x64xf32> to vector<64x64xf32>
    %143 = vector.shape_cast %140 : vector<64x64xf32> to vector<1x64x64xf32>
    tpu.vector_store %arg17[%c0_69, %c0_70, %c0_71], %143 {strides = array<i32>} : memref<1x64x64xf32, #tpu.memory_space<vmem>>, vector<1x64x64xf32>,
    return
  }
  func.func @transform_0(%arg0: i32) -> (i32, i32, i32) {
    %c0_i32 = arith.constant 0 : i32
    %c0_i32_0 = arith.constant 0 : i32
    %c0_i32_1 = arith.constant 0 : i32
    return %arg0, %c0_i32, %c0_i32_0 : i32, i32, i32
  }
  func.func @transform_1(%arg0: i32) -> (i32, i32, i32) {
    %c0_i32 = arith.constant 0 : i32
    %c0_i32_0 = arith.constant 0 : i32
    %c0_i32_1 = arith.constant 0 : i32
    return %arg0, %c0_i32, %c0_i32_0 : i32, i32, i32
  }
  func.func @transform_2(%arg0: i32) -> (i32, i32) {
    %c0_i32 = arith.constant 0 : i32
    %c0_i32_0 = arith.constant 0 : i32
    %c0_i32_1 = arith.constant 0 : i32
    return %c0_i32, %c0_i32_0 : i32, i32
  }
  func.func @transform_3(%arg0: i32) -> (i32, i32) {
    %c0_i32 = arith.constant 0 : i32
    %c0_i32_0 = arith.constant 0 : i32
    %c0_i32_1 = arith.constant 0 : i32
    return %c0_i32, %c0_i32_0 : i32, i32
  }
  func.func @transform_4(%arg0: i32) -> (i32, i32) {
    %c0_i32 = arith.constant 0 : i32
    %c0_i32_0 = arith.constant 0 : i32
    %c0_i32_1 = arith.constant 0 : i32
    return %c0_i32, %c0_i32_0 : i32, i32
  }
  func.func @transform_5(%arg0: i32) -> (i32, i32) {
    %c0_i32 = arith.constant 0 : i32
    %c0_i32_0 = arith.constant 0 : i32
    %c0_i32_1 = arith.constant 0 : i32
    return %c0_i32, %c0_i32_0 : i32, i32
  }
  func.func @transform_6(%arg0: i32) -> (i32, i32) {
    %c0_i32 = arith.constant 0 : i32
    %c0_i32_0 = arith.constant 0 : i32
    %c0_i32_1 = arith.constant 0 : i32
    return %c0_i32, %c0_i32_0 : i32, i32
  }
  func.func @transform_7(%arg0: i32) -> (i32, i32) {
    %c0_i32 = arith.constant 0 : i32
    %c0_i32_0 = arith.constant 0 : i32
    %c0_i32_1 = arith.constant 0 : i32
    return %c0_i32, %c0_i32_0 : i32, i32
  }
  func.func @transform_8(%arg0: i32) -> (i32, i32) {
    %c0_i32 = arith.constant 0 : i32
    %c0_i32_0 = arith.constant 0 : i32
    %c0_i32_1 = arith.constant 0 : i32
    return %c0_i32, %c0_i32_0 : i32, i32
  }
  func.func @transform_9(%arg0: i32) -> (i32, i32) {
    %c0_i32 = arith.constant 0 : i32
    %c0_i32_0 = arith.constant 0 : i32
    %c0_i32_1 = arith.constant 0 : i32
    return %c0_i32, %c0_i32_0 : i32, i32
  }
  func.func @transform_10(%arg0: i32) -> (i32, i32) {
    %c0_i32 = arith.constant 0 : i32
    %c0_i32_0 = arith.constant 0 : i32
    %c0_i32_1 = arith.constant 0 : i32
    return %c0_i32, %c0_i32_0 : i32, i32
  }
  func.func @transform_11(%arg0: i32) -> (i32, i32) {
    %c0_i32 = arith.constant 0 : i32
    %c0_i32_0 = arith.constant 0 : i32
    %c0_i32_1 = arith.constant 0 : i32
    return %c0_i32, %c0_i32_0 : i32, i32
  }
  func.func @transform_12(%arg0: i32) -> (i32, i32, i32) {
    %c0_i32 = arith.constant 0 : i32
    %c0_i32_0 = arith.constant 0 : i32
    %c0_i32_1 = arith.constant 0 : i32
    return %arg0, %c0_i32, %c0_i32_0 : i32, i32, i32
  }
  func.func @transform_13(%arg0: i32) -> (i32, i32, i32) {
    %c0_i32 = arith.constant 0 : i32
    %c0_i32_0 = arith.constant 0 : i32
    %c0_i32_1 = arith.constant 0 : i32
    return %arg0, %c0_i32, %c0_i32_0 : i32, i32, i32
  }
  func.func @transform_14(%arg0: i32) -> (i32, i32, i32) {
    %c0_i32 = arith.constant 0 : i32
    %c0_i32_0 = arith.constant 0 : i32
    %c0_i32_1 = arith.constant 0 : i32
    return %arg0, %c0_i32, %c0_i32_0 : i32, i32, i32
  }
  func.func @transform_15(%arg0: i32) -> (i32, i32, i32) {
    %c0_i32 = arith.constant 0 : i32
    %c0_i32_0 = arith.constant 0 : i32
    %c0_i32_1 = arith.constant 0 : i32
    return %arg0, %c0_i32, %c0_i32_0 : i32, i32, i32
  }
  func.func @transform_16(%arg0: i32) -> (i32, i32, i32) {
    %c0_i32 = arith.constant 0 : i32
    %c0_i32_0 = arith.constant 0 : i32
    %c0_i32_1 = arith.constant 0 : i32
    return %arg0, %c0_i32, %c0_i32_0 : i32, i32, i32
  }
}

module attributes {stable_mosaic.version = 11 : i64} {
  func.func @kernel(%arg0: i32, %arg1: memref<1x64x32xf32, #tpu.memory_space<vmem>>, %arg2: memref<1x64x32xf32, #tpu.memory_space<vmem>>, %arg3: memref<1x64x32xf32, #tpu.memory_space<vmem>>, %arg4: memref<1x8x32xbf16, #tpu.memory_space<vmem>>, %arg5: memref<1x64x32xf32, #tpu.memory_space<vmem>>, %arg6: memref<32x64xbf16, #tpu.memory_space<vmem>>, %arg7: memref<32x64xbf16, #tpu.memory_space<vmem>>, %arg8: memref<1x64xf32, #tpu.memory_space<vmem>>, %arg9: memref<64x32xbf16, #tpu.memory_space<vmem>>, %arg10: memref<1x32xf32, #tpu.memory_space<vmem>>, %arg11: memref<32x32xbf16, #tpu.memory_space<vmem>>, %arg12: memref<1x32xf32, #tpu.memory_space<vmem>>, %arg13: memref<1x64x32xf32, #tpu.memory_space<vmem>>) attributes {dimension_semantics = [#tpu.dimension_semantics<parallel>], iteration_bounds = array<i64: 2>, scalar_prefetch = 0 : i64, scratch_operands = 0 : i64, tpu.core_type = #tpu.core_type<tc>, window_params = [{transform_indices = @transform_0, window_bounds = array<i64: 1, 64, 32>}, {transform_indices = @transform_1, window_bounds = array<i64: 1, 64, 32>}, {transform_indices = @transform_2, window_bounds = array<i64: 1, 64, 32>}, {transform_indices = @transform_3, window_bounds = array<i64: 1, 8, 32>}, {transform_indices = @transform_4, window_bounds = array<i64: 1, 64, 32>}, {pipeline_mode = #tpu.pipeline_mode<synchronous>, transform_indices = @transform_5, window_bounds = array<i64: 32, 64>}, {pipeline_mode = #tpu.pipeline_mode<synchronous>, transform_indices = @transform_6, window_bounds = array<i64: 32, 64>}, {pipeline_mode = #tpu.pipeline_mode<synchronous>, transform_indices = @transform_7, window_bounds = array<i64: 1, 64>}, {pipeline_mode = #tpu.pipeline_mode<synchronous>, transform_indices = @transform_8, window_bounds = array<i64: 64, 32>}, {pipeline_mode = #tpu.pipeline_mode<synchronous>, transform_indices = @transform_9, window_bounds = array<i64: 1, 32>}, {pipeline_mode = #tpu.pipeline_mode<synchronous>, transform_indices = @transform_10, window_bounds = array<i64: 32, 32>}, {pipeline_mode = #tpu.pipeline_mode<synchronous>, transform_indices = @transform_11, window_bounds = array<i64: 1, 32>}, {transform_indices = @transform_12, window_bounds = array<i64: 1, 64, 32>}]} {
    %c0 = arith.constant 0 : index
    %c0_0 = arith.constant 0 : index
    %c0_1 = arith.constant 0 : index
    %0 = vector.load %arg1[%c0, %c0_0, %c0_1] : memref<1x64x32xf32, #tpu.memory_space<vmem>>, vector<1x64x32xf32>
    %1 = vector.shape_cast %0 : vector<1x64x32xf32> to vector<64x32xf32>
    %c0_2 = arith.constant 0 : index
    %c0_3 = arith.constant 0 : index
    %c0_4 = arith.constant 0 : index
    %2 = vector.load %arg2[%c0_2, %c0_3, %c0_4] : memref<1x64x32xf32, #tpu.memory_space<vmem>>, vector<1x64x32xf32>
    %3 = vector.shape_cast %2 : vector<1x64x32xf32> to vector<64x32xf32>
    %4 = arith.subf %3, %1 : vector<64x32xf32>
    %5 = arith.truncf %1 : vector<64x32xf32> to vector<64x32xbf16>
    %c0_5 = arith.constant 0 : index
    %c0_6 = arith.constant 0 : index
    %6 = vector.load %arg6[%c0_5, %c0_6] : memref<32x64xbf16, #tpu.memory_space<vmem>>, vector<32x64xbf16>
    %cst = arith.constant dense<0.000000e+00> : vector<64x64xf32>
    %7 = tpu.matmul %5, %6, %cst {dimension_numbers = #tpu.dot_dimension_numbers<[1], [0], [0], [1], [0, 0, 1, 1], [], []>} : vector<64x32xbf16>, vector<32x64xbf16>, vector<64x64xf32> -> vector<64x64xf32>
    %8 = arith.truncf %4 : vector<64x32xf32> to vector<64x32xbf16>
    %c0_7 = arith.constant 0 : index
    %c0_8 = arith.constant 0 : index
    %9 = vector.load %arg7[%c0_7, %c0_8] : memref<32x64xbf16, #tpu.memory_space<vmem>>, vector<32x64xbf16>
    %cst_9 = arith.constant dense<0.000000e+00> : vector<64x64xf32>
    %10 = tpu.matmul %8, %9, %cst_9 {dimension_numbers = #tpu.dot_dimension_numbers<[1], [0], [0], [1], [0, 0, 1, 1], [], []>} : vector<64x32xbf16>, vector<32x64xbf16>, vector<64x64xf32> -> vector<64x64xf32>
    %11 = arith.addf %7, %10 : vector<64x64xf32>
    %c0_10 = arith.constant 0 : index
    %c0_11 = arith.constant 0 : index
    %12 = vector.load %arg8[%c0_10, %c0_11] : memref<1x64xf32, #tpu.memory_space<vmem>>, vector<1x64xf32>
    %13 = vector.broadcast %12 : vector<1x64xf32> to vector<64x64xf32>
    %14 = arith.addf %11, %13 : vector<64x64xf32>
    %cst_12 = arith.constant 5.000000e-01 : f32
    %15 = vector.broadcast %cst_12 : f32 to vector<64x64xf32>
    %16 = arith.mulf %15, %14 : vector<64x64xf32>
    %cst_13 = arith.constant 4.471500e-02 : f32
    %17 = vector.broadcast %cst_13 : f32 to vector<64x64xf32>
    %18 = arith.mulf %17, %14 : vector<64x64xf32>
    %19 = arith.mulf %18, %14 : vector<64x64xf32>
    %20 = arith.mulf %19, %14 : vector<64x64xf32>
    %21 = arith.addf %14, %20 : vector<64x64xf32>
    %cst_14 = arith.constant 0.797884583 : f32
    %22 = vector.broadcast %cst_14 : f32 to vector<64x64xf32>
    %23 = arith.mulf %22, %21 : vector<64x64xf32>
    %24 = math.tanh %23 : vector<64x64xf32>
    %cst_15 = arith.constant 1.000000e+00 : f32
    %25 = vector.broadcast %cst_15 : f32 to vector<64x64xf32>
    %26 = arith.addf %25, %24 : vector<64x64xf32>
    %27 = arith.mulf %16, %26 : vector<64x64xf32>
    %28 = arith.truncf %27 : vector<64x64xf32> to vector<64x64xbf16>
    %c0_16 = arith.constant 0 : index
    %c0_17 = arith.constant 0 : index
    %29 = vector.load %arg9[%c0_16, %c0_17] : memref<64x32xbf16, #tpu.memory_space<vmem>>, vector<64x32xbf16>
    %cst_18 = arith.constant dense<0.000000e+00> : vector<64x32xf32>
    %30 = tpu.matmul %28, %29, %cst_18 {dimension_numbers = #tpu.dot_dimension_numbers<[1], [0], [0], [1], [0, 0, 1, 1], [], []>} : vector<64x64xbf16>, vector<64x32xbf16>, vector<64x32xf32> -> vector<64x32xf32>
    %c0_19 = arith.constant 0 : index
    %c0_20 = arith.constant 0 : index
    %31 = vector.load %arg10[%c0_19, %c0_20] : memref<1x32xf32, #tpu.memory_space<vmem>>, vector<1x32xf32>
    %32 = vector.broadcast %31 : vector<1x32xf32> to vector<64x32xf32>
    %33 = arith.addf %30, %32 : vector<64x32xf32>
    %c0_21 = arith.constant 0 : index
    %c0_22 = arith.constant 0 : index
    %c0_23 = arith.constant 0 : index
    %34 = vector.load %arg3[%c0_21, %c0_22, %c0_23] : memref<1x64x32xf32, #tpu.memory_space<vmem>>, vector<1x64x32xf32>
    %35 = vector.shape_cast %34 : vector<1x64x32xf32> to vector<64x32xf32>
    %36 = arith.addf %33, %35 : vector<64x32xf32>
    %c0_24 = arith.constant 0 : index
    %c0_25 = arith.constant 0 : index
    %c0_26 = arith.constant 0 : index
    %37 = vector.load %arg4[%c0_24, %c0_25, %c0_26] : memref<1x8x32xbf16, #tpu.memory_space<vmem>>, vector<1x8x32xbf16>
    %38 = vector.shape_cast %37 : vector<1x8x32xbf16> to vector<8x32xbf16>
    %39 = vector.extract_strided_slice %36 {offsets = [0, 0], sizes = [64, 8], strides = [1, 1]} : vector<64x32xf32> to vector<64x8xf32>
    %cst_27 = arith.constant dense<0xFF800000> : vector<64xf32>
    %40 = vector.multi_reduction <maximumf>, %39, %cst_27 [1] : vector<64x8xf32> to vector<64xf32>
    %41 = vector.shape_cast %40 : vector<64xf32> to vector<64x1xf32>
    %42 = vector.broadcast %41 : vector<64x1xf32> to vector<64x8xf32>
    %43 = arith.subf %39, %42 : vector<64x8xf32>
    %44 = math.exp %43 : vector<64x8xf32>
    %cst_28 = arith.constant dense<0.000000e+00> : vector<64xf32>
    %45 = vector.multi_reduction <add>, %44, %cst_28 [1] : vector<64x8xf32> to vector<64xf32>
    %46 = vector.shape_cast %45 : vector<64xf32> to vector<64x1xf32>
    %47 = tpu.reciprocal %46 {approx = true} : vector<64x1xf32> -> vector<64x1xf32>
    %48 = vector.broadcast %47 : vector<64x1xf32> to vector<64x8xf32>
    %49 = arith.mulf %44, %48 : vector<64x8xf32>
    %50 = vector.extract_strided_slice %38 {offsets = [0, 0], sizes = [8, 8], strides = [1, 1]} : vector<8x32xbf16> to vector<8x8xbf16>
    %51 = arith.truncf %49 : vector<64x8xf32> to vector<64x8xbf16>
    %cst_29 = arith.constant dense<0.000000e+00> : vector<64x8xf32>
    %52 = tpu.matmul %51, %50, %cst_29 {dimension_numbers = #tpu.dot_dimension_numbers<[1], [0], [0], [1], [0, 0, 1, 1], [], []>} : vector<64x8xbf16>, vector<8x8xbf16>, vector<64x8xf32> -> vector<64x8xf32>
    %53 = vector.extract_strided_slice %36 {offsets = [0, 8], sizes = [64, 8], strides = [1, 1]} : vector<64x32xf32> to vector<64x8xf32>
    %cst_30 = arith.constant dense<0xFF800000> : vector<64xf32>
    %54 = vector.multi_reduction <maximumf>, %53, %cst_30 [1] : vector<64x8xf32> to vector<64xf32>
    %55 = vector.shape_cast %54 : vector<64xf32> to vector<64x1xf32>
    %56 = vector.broadcast %55 : vector<64x1xf32> to vector<64x8xf32>
    %57 = arith.subf %53, %56 : vector<64x8xf32>
    %58 = math.exp %57 : vector<64x8xf32>
    %cst_31 = arith.constant dense<0.000000e+00> : vector<64xf32>
    %59 = vector.multi_reduction <add>, %58, %cst_31 [1] : vector<64x8xf32> to vector<64xf32>
    %60 = vector.shape_cast %59 : vector<64xf32> to vector<64x1xf32>
    %61 = tpu.reciprocal %60 {approx = true} : vector<64x1xf32> -> vector<64x1xf32>
    %62 = vector.broadcast %61 : vector<64x1xf32> to vector<64x8xf32>
    %63 = arith.mulf %58, %62 : vector<64x8xf32>
    %64 = vector.extract_strided_slice %38 {offsets = [0, 8], sizes = [8, 8], strides = [1, 1]} : vector<8x32xbf16> to vector<8x8xbf16>
    %65 = arith.truncf %63 : vector<64x8xf32> to vector<64x8xbf16>
    %cst_32 = arith.constant dense<0.000000e+00> : vector<64x8xf32>
    %66 = tpu.matmul %65, %64, %cst_32 {dimension_numbers = #tpu.dot_dimension_numbers<[1], [0], [0], [1], [0, 0, 1, 1], [], []>} : vector<64x8xbf16>, vector<8x8xbf16>, vector<64x8xf32> -> vector<64x8xf32>
    %67 = vector.extract_strided_slice %36 {offsets = [0, 16], sizes = [64, 8], strides = [1, 1]} : vector<64x32xf32> to vector<64x8xf32>
    %cst_33 = arith.constant dense<0xFF800000> : vector<64xf32>
    %68 = vector.multi_reduction <maximumf>, %67, %cst_33 [1] : vector<64x8xf32> to vector<64xf32>
    %69 = vector.shape_cast %68 : vector<64xf32> to vector<64x1xf32>
    %70 = vector.broadcast %69 : vector<64x1xf32> to vector<64x8xf32>
    %71 = arith.subf %67, %70 : vector<64x8xf32>
    %72 = math.exp %71 : vector<64x8xf32>
    %cst_34 = arith.constant dense<0.000000e+00> : vector<64xf32>
    %73 = vector.multi_reduction <add>, %72, %cst_34 [1] : vector<64x8xf32> to vector<64xf32>
    %74 = vector.shape_cast %73 : vector<64xf32> to vector<64x1xf32>
    %75 = tpu.reciprocal %74 {approx = true} : vector<64x1xf32> -> vector<64x1xf32>
    %76 = vector.broadcast %75 : vector<64x1xf32> to vector<64x8xf32>
    %77 = arith.mulf %72, %76 : vector<64x8xf32>
    %78 = vector.extract_strided_slice %38 {offsets = [0, 16], sizes = [8, 8], strides = [1, 1]} : vector<8x32xbf16> to vector<8x8xbf16>
    %79 = arith.truncf %77 : vector<64x8xf32> to vector<64x8xbf16>
    %cst_35 = arith.constant dense<0.000000e+00> : vector<64x8xf32>
    %80 = tpu.matmul %79, %78, %cst_35 {dimension_numbers = #tpu.dot_dimension_numbers<[1], [0], [0], [1], [0, 0, 1, 1], [], []>} : vector<64x8xbf16>, vector<8x8xbf16>, vector<64x8xf32> -> vector<64x8xf32>
    %81 = vector.extract_strided_slice %36 {offsets = [0, 24], sizes = [64, 8], strides = [1, 1]} : vector<64x32xf32> to vector<64x8xf32>
    %cst_36 = arith.constant dense<0xFF800000> : vector<64xf32>
    %82 = vector.multi_reduction <maximumf>, %81, %cst_36 [1] : vector<64x8xf32> to vector<64xf32>
    %83 = vector.shape_cast %82 : vector<64xf32> to vector<64x1xf32>
    %84 = vector.broadcast %83 : vector<64x1xf32> to vector<64x8xf32>
    %85 = arith.subf %81, %84 : vector<64x8xf32>
    %86 = math.exp %85 : vector<64x8xf32>
    %cst_37 = arith.constant dense<0.000000e+00> : vector<64xf32>
    %87 = vector.multi_reduction <add>, %86, %cst_37 [1] : vector<64x8xf32> to vector<64xf32>
    %88 = vector.shape_cast %87 : vector<64xf32> to vector<64x1xf32>
    %89 = tpu.reciprocal %88 {approx = true} : vector<64x1xf32> -> vector<64x1xf32>
    %90 = vector.broadcast %89 : vector<64x1xf32> to vector<64x8xf32>
    %91 = arith.mulf %86, %90 : vector<64x8xf32>
    %92 = vector.extract_strided_slice %38 {offsets = [0, 24], sizes = [8, 8], strides = [1, 1]} : vector<8x32xbf16> to vector<8x8xbf16>
    %93 = arith.truncf %91 : vector<64x8xf32> to vector<64x8xbf16>
    %cst_38 = arith.constant dense<0.000000e+00> : vector<64x8xf32>
    %94 = tpu.matmul %93, %92, %cst_38 {dimension_numbers = #tpu.dot_dimension_numbers<[1], [0], [0], [1], [0, 0, 1, 1], [], []>} : vector<64x8xbf16>, vector<8x8xbf16>, vector<64x8xf32> -> vector<64x8xf32>
    %95 = tpu.concatenate %52, %66, %80, %94 in 1 : vector<64x8xf32>, vector<64x8xf32>, vector<64x8xf32>, vector<64x8xf32> -> vector<64x32xf32>
    %96 = arith.truncf %95 : vector<64x32xf32> to vector<64x32xbf16>
    %c0_39 = arith.constant 0 : index
    %c0_40 = arith.constant 0 : index
    %97 = vector.load %arg11[%c0_39, %c0_40] : memref<32x32xbf16, #tpu.memory_space<vmem>>, vector<32x32xbf16>
    %cst_41 = arith.constant dense<0.000000e+00> : vector<64x32xf32>
    %98 = tpu.matmul %96, %97, %cst_41 {dimension_numbers = #tpu.dot_dimension_numbers<[1], [0], [0], [1], [0, 0, 1, 1], [], []>} : vector<64x32xbf16>, vector<32x32xbf16>, vector<64x32xf32> -> vector<64x32xf32>
    %c0_42 = arith.constant 0 : index
    %c0_43 = arith.constant 0 : index
    %99 = vector.load %arg12[%c0_42, %c0_43] : memref<1x32xf32, #tpu.memory_space<vmem>>, vector<1x32xf32>
    %100 = vector.broadcast %99 : vector<1x32xf32> to vector<64x32xf32>
    %101 = arith.addf %98, %100 : vector<64x32xf32>
    %c0_44 = arith.constant 0 : index
    %c0_45 = arith.constant 0 : index
    %c0_46 = arith.constant 0 : index
    %102 = vector.load %arg5[%c0_44, %c0_45, %c0_46] : memref<1x64x32xf32, #tpu.memory_space<vmem>>, vector<1x64x32xf32>
    %103 = vector.shape_cast %102 : vector<1x64x32xf32> to vector<64x32xf32>
    %104 = arith.addf %101, %103 : vector<64x32xf32>
    %c0_47 = arith.constant 0 : index
    %c0_48 = arith.constant 0 : index
    %c0_49 = arith.constant 0 : index
    %105 = vector.load %arg13[%c0_47, %c0_48, %c0_49] : memref<1x64x32xf32, #tpu.memory_space<vmem>>, vector<1x64x32xf32>
    %106 = vector.shape_cast %105 : vector<1x64x32xf32> to vector<64x32xf32>
    %107 = vector.shape_cast %104 : vector<64x32xf32> to vector<1x64x32xf32>
    tpu.vector_store %arg13[%c0_47, %c0_48, %c0_49], %107 {strides = array<i32>} : memref<1x64x32xf32, #tpu.memory_space<vmem>>, vector<1x64x32xf32>,
    return
  }
  func.func @transform_0(%arg0: i32) -> (i32, i32, i32) {
    %c0_i32 = arith.constant 0 : i32
    %c0_i32_0 = arith.constant 0 : i32
    %c0_i32_1 = arith.constant 0 : i32
    return %arg0, %c0_i32, %c0_i32_0 : i32, i32, i32
  }
  func.func @transform_1(%arg0: i32) -> (i32, i32, i32) {
    %c0_i32 = arith.constant 0 : i32
    %c0_i32_0 = arith.constant 0 : i32
    %c0_i32_1 = arith.constant 0 : i32
    return %arg0, %c0_i32, %c0_i32_0 : i32, i32, i32
  }
  func.func @transform_2(%arg0: i32) -> (i32, i32, i32) {
    %c0_i32 = arith.constant 0 : i32
    %c0_i32_0 = arith.constant 0 : i32
    %c0_i32_1 = arith.constant 0 : i32
    return %arg0, %c0_i32, %c0_i32_0 : i32, i32, i32
  }
  func.func @transform_3(%arg0: i32) -> (i32, i32, i32) {
    %c0_i32 = arith.constant 0 : i32
    %c0_i32_0 = arith.constant 0 : i32
    %c0_i32_1 = arith.constant 0 : i32
    return %arg0, %c0_i32, %c0_i32_0 : i32, i32, i32
  }
  func.func @transform_4(%arg0: i32) -> (i32, i32, i32) {
    %c0_i32 = arith.constant 0 : i32
    %c0_i32_0 = arith.constant 0 : i32
    %c0_i32_1 = arith.constant 0 : i32
    return %arg0, %c0_i32, %c0_i32_0 : i32, i32, i32
  }
  func.func @transform_5(%arg0: i32) -> (i32, i32) {
    %c0_i32 = arith.constant 0 : i32
    %c0_i32_0 = arith.constant 0 : i32
    %c0_i32_1 = arith.constant 0 : i32
    return %c0_i32, %c0_i32_0 : i32, i32
  }
  func.func @transform_6(%arg0: i32) -> (i32, i32) {
    %c0_i32 = arith.constant 0 : i32
    %c0_i32_0 = arith.constant 0 : i32
    %c0_i32_1 = arith.constant 0 : i32
    return %c0_i32, %c0_i32_0 : i32, i32
  }
  func.func @transform_7(%arg0: i32) -> (i32, i32) {
    %c0_i32 = arith.constant 0 : i32
    %c0_i32_0 = arith.constant 0 : i32
    %c0_i32_1 = arith.constant 0 : i32
    return %c0_i32, %c0_i32_0 : i32, i32
  }
  func.func @transform_8(%arg0: i32) -> (i32, i32) {
    %c0_i32 = arith.constant 0 : i32
    %c0_i32_0 = arith.constant 0 : i32
    %c0_i32_1 = arith.constant 0 : i32
    return %c0_i32, %c0_i32_0 : i32, i32
  }
  func.func @transform_9(%arg0: i32) -> (i32, i32) {
    %c0_i32 = arith.constant 0 : i32
    %c0_i32_0 = arith.constant 0 : i32
    %c0_i32_1 = arith.constant 0 : i32
    return %c0_i32, %c0_i32_0 : i32, i32
  }
  func.func @transform_10(%arg0: i32) -> (i32, i32) {
    %c0_i32 = arith.constant 0 : i32
    %c0_i32_0 = arith.constant 0 : i32
    %c0_i32_1 = arith.constant 0 : i32
    return %c0_i32, %c0_i32_0 : i32, i32
  }
  func.func @transform_11(%arg0: i32) -> (i32, i32) {
    %c0_i32 = arith.constant 0 : i32
    %c0_i32_0 = arith.constant 0 : i32
    %c0_i32_1 = arith.constant 0 : i32
    return %c0_i32, %c0_i32_0 : i32, i32
  }
  func.func @transform_12(%arg0: i32) -> (i32, i32, i32) {
    %c0_i32 = arith.constant 0 : i32
    %c0_i32_0 = arith.constant 0 : i32
    %c0_i32_1 = arith.constant 0 : i32
    return %arg0, %c0_i32, %c0_i32_0 : i32, i32, i32
  }
}

module attributes {stable_mosaic.version = 11 : i64} {
  func.func @_mlp_kernel(%arg0: i32, %arg1: memref<80x32xbf16, #tpu.memory_space<vmem>>, %arg2: memref<32x128xbf16, #tpu.memory_space<vmem>>, %arg3: memref<1x128xf32, #tpu.memory_space<vmem>>, %arg4: memref<128x128xbf16, #tpu.memory_space<vmem>>, %arg5: memref<1x128xf32, #tpu.memory_space<vmem>>, %arg6: memref<80x128xf32, #tpu.memory_space<vmem>>) attributes {dimension_semantics = [#tpu.dimension_semantics<parallel>], iteration_bounds = array<i64: 2>, scalar_prefetch = 0 : i64, scratch_operands = 0 : i64, tpu.core_type = #tpu.core_type<tc>, window_params = [{transform_indices = @transform_0, window_bounds = array<i64: 80, 32>}, {pipeline_mode = #tpu.pipeline_mode<synchronous>, transform_indices = @transform_1, window_bounds = array<i64: 32, 128>}, {pipeline_mode = #tpu.pipeline_mode<synchronous>, transform_indices = @transform_2, window_bounds = array<i64: 1, 128>}, {pipeline_mode = #tpu.pipeline_mode<synchronous>, transform_indices = @transform_3, window_bounds = array<i64: 128, 128>}, {pipeline_mode = #tpu.pipeline_mode<synchronous>, transform_indices = @transform_4, window_bounds = array<i64: 1, 128>}, {transform_indices = @transform_5, window_bounds = array<i64: 80, 128>}]} {
    %c0 = arith.constant 0 : index
    %c0_0 = arith.constant 0 : index
    %0 = vector.load %arg1[%c0, %c0_0] : memref<80x32xbf16, #tpu.memory_space<vmem>>, vector<80x32xbf16>
    %c0_1 = arith.constant 0 : index
    %c0_2 = arith.constant 0 : index
    %1 = vector.load %arg2[%c0_1, %c0_2] : memref<32x128xbf16, #tpu.memory_space<vmem>>, vector<32x128xbf16>
    %cst = arith.constant dense<0.000000e+00> : vector<80x128xf32>
    %2 = tpu.matmul %0, %1, %cst {dimension_numbers = #tpu.dot_dimension_numbers<[1], [0], [0], [1], [0, 0, 1, 1], [], []>} : vector<80x32xbf16>, vector<32x128xbf16>, vector<80x128xf32> -> vector<80x128xf32>
    %c0_3 = arith.constant 0 : index
    %c0_4 = arith.constant 0 : index
    %3 = vector.load %arg3[%c0_3, %c0_4] : memref<1x128xf32, #tpu.memory_space<vmem>>, vector<1x128xf32>
    %4 = vector.broadcast %3 : vector<1x128xf32> to vector<80x128xf32>
    %5 = arith.addf %2, %4 : vector<80x128xf32>
    %cst_5 = arith.constant 5.000000e-01 : f32
    %6 = vector.broadcast %cst_5 : f32 to vector<80x128xf32>
    %7 = arith.mulf %6, %5 : vector<80x128xf32>
    %cst_6 = arith.constant 4.471500e-02 : f32
    %8 = vector.broadcast %cst_6 : f32 to vector<80x128xf32>
    %9 = arith.mulf %8, %5 : vector<80x128xf32>
    %10 = arith.mulf %9, %5 : vector<80x128xf32>
    %11 = arith.mulf %10, %5 : vector<80x128xf32>
    %12 = arith.addf %5, %11 : vector<80x128xf32>
    %cst_7 = arith.constant 0.797884583 : f32
    %13 = vector.broadcast %cst_7 : f32 to vector<80x128xf32>
    %14 = arith.mulf %13, %12 : vector<80x128xf32>
    %15 = math.tanh %14 : vector<80x128xf32>
    %cst_8 = arith.constant 1.000000e+00 : f32
    %16 = vector.broadcast %cst_8 : f32 to vector<80x128xf32>
    %17 = arith.addf %16, %15 : vector<80x128xf32>
    %18 = arith.mulf %7, %17 : vector<80x128xf32>
    %19 = arith.truncf %18 : vector<80x128xf32> to vector<80x128xbf16>
    %c0_9 = arith.constant 0 : index
    %c0_10 = arith.constant 0 : index
    %20 = vector.load %arg4[%c0_9, %c0_10] : memref<128x128xbf16, #tpu.memory_space<vmem>>, vector<128x128xbf16>
    %cst_11 = arith.constant dense<0.000000e+00> : vector<80x128xf32>
    %21 = tpu.matmul %19, %20, %cst_11 {dimension_numbers = #tpu.dot_dimension_numbers<[1], [0], [0], [1], [0, 0, 1, 1], [], []>} : vector<80x128xbf16>, vector<128x128xbf16>, vector<80x128xf32> -> vector<80x128xf32>
    %c0_12 = arith.constant 0 : index
    %c0_13 = arith.constant 0 : index
    %22 = vector.load %arg5[%c0_12, %c0_13] : memref<1x128xf32, #tpu.memory_space<vmem>>, vector<1x128xf32>
    %23 = vector.broadcast %22 : vector<1x128xf32> to vector<80x128xf32>
    %24 = arith.addf %21, %23 : vector<80x128xf32>
    %c0_14 = arith.constant 0 : index
    %c0_15 = arith.constant 0 : index
    %25 = vector.load %arg6[%c0_14, %c0_15] : memref<80x128xf32, #tpu.memory_space<vmem>>, vector<80x128xf32>
    tpu.vector_store %arg6[%c0_14, %c0_15], %24 {strides = array<i32>} : memref<80x128xf32, #tpu.memory_space<vmem>>, vector<80x128xf32>,
    return
  }
  func.func @transform_0(%arg0: i32) -> (i32, i32) {
    %c0_i32 = arith.constant 0 : i32
    %c0_i32_0 = arith.constant 0 : i32
    return %arg0, %c0_i32 : i32, i32
  }
  func.func @transform_1(%arg0: i32) -> (i32, i32) {
    %c0_i32 = arith.constant 0 : i32
    %c0_i32_0 = arith.constant 0 : i32
    %c0_i32_1 = arith.constant 0 : i32
    return %c0_i32, %c0_i32_0 : i32, i32
  }
  func.func @transform_2(%arg0: i32) -> (i32, i32) {
    %c0_i32 = arith.constant 0 : i32
    %c0_i32_0 = arith.constant 0 : i32
    %c0_i32_1 = arith.constant 0 : i32
    return %c0_i32, %c0_i32_0 : i32, i32
  }
  func.func @transform_3(%arg0: i32) -> (i32, i32) {
    %c0_i32 = arith.constant 0 : i32
    %c0_i32_0 = arith.constant 0 : i32
    %c0_i32_1 = arith.constant 0 : i32
    return %c0_i32, %c0_i32_0 : i32, i32
  }
  func.func @transform_4(%arg0: i32) -> (i32, i32) {
    %c0_i32 = arith.constant 0 : i32
    %c0_i32_0 = arith.constant 0 : i32
    %c0_i32_1 = arith.constant 0 : i32
    return %c0_i32, %c0_i32_0 : i32, i32
  }
  func.func @transform_5(%arg0: i32) -> (i32, i32) {
    %c0_i32 = arith.constant 0 : i32
    %c0_i32_0 = arith.constant 0 : i32
    return %arg0, %c0_i32 : i32, i32
  }
}

</mosaic_0001>

<bundles_post_ra>
// kernel: graph_attention_forward.4
= control target key start
LH: loop header
LB: loop body
LE: loop exit
PB: predicated region body
PF: predicated region fallthrough
CT: control target
= control target key end

     0   :  { %s1881_s17 = smov 0   ;;  %s2229_s0 = inlined_call_operand.vmem [shape: f32[2,8,32], index: 0, kind: input, shape index: {}]   ;;  %s2230_s1 = inlined_call_operand.vmem [shape: f32[2,64,32], index: 1, kind: input, shape index: {}]   ;;  %s2231_s2 = inlined_call_operand.vmem [shape: f32[1,32], index: 2, kind: input, shape index: {}]   ;;  %s2232_s3 = inlined_call_operand.vmem [shape: f32[1,32], index: 3, kind: input, shape index: {}]   ;;  %s2233_s4 = inlined_call_operand.vmem [shape: bf16[32,32], index: 4, kind: input, shape index: {}]   ;;  %s2234_s5 = inlined_call_operand.vmem [shape: f32[1,32], index: 5, kind: input, shape index: {}]   ;;  %s2235_s6 = inlined_call_operand.vmem [shape: bf16[32,64], index: 6, kind: input, shape index: {}]   ;;  %s2236_s7 = inlined_call_operand.vmem [shape: f32[1,64], index: 7, kind: input, shape index: {}]   ;;  %s2237_s8 = inlined_call_operand.vmem [shape: bf16[32,32], index: 8, kind: input, shape index: {}]   ;;  %s2238_s9 = inlined_call_operand.vmem [shape: f32[1,32], index: 9, kind: input, shape index: {}]   ;;  %s2239_s10 = inlined_call_operand.vmem [shape: f32[2,8,32], index: 10, kind: output, shape index: {0}]   ;;  %s2240_s11 = inlined_call_operand.vmem [shape: bf16[2,8,64], index: 11, kind: output, shape index: {1}]  }
   0x1 LB: > { %s1523_s18 = sadd.s32 4294967295, %s1807_s17   ;;  %p1527_p0 = scmp.ge.s32.totalorder %s1807_s17, 1  ;;  %s1807_s17 = sphi %s1881_s17, %s22_s17  }
   0x2   : > { %p349_p1 = scmp.lt.s32.totalorder %s1807_s17, 3 }
   0x4   : > { %p350_p2 = pnand %p1527_p0, %p349_p1 }
   0x5   : > { %p396_p3 = scmp.lt.s32.totalorder (!%p350_p2), %s1523_s18, 1  ;;  %s1811_s25 = smov (!%p350_p2), 96  }
   0x6   : > { %353 = sbr.rel (%p350_p2) target bundleno = 3466 (0xd8a), region = 60  ;;  %s1812_s28 = smov (!%p350_p2), 120  }
   0x7   : > { %s1813_s29 = smov (!%p350_p2), 88   ;;  %s1814_s30 = smov (!%p350_p2), 112  }
   0x8   : > { %s1815_s12 = smov (!%p350_p2), 80   ;;  %s1816_s13 = smov (!%p350_p2), 104  }
   0x9   : > { %s1817_s14 = smov (!%p350_p2), 72   ;;  %s1818_s15 = smov (!%p350_p2), 8  }
   0xa   : > { %s1819_s16 = smov (!%p350_p2), 16   ;;  %s1820_s24 = smov (!%p350_p2), 24  }
   0xb   : > { %s2242_s18 = smov (!%p396_p3, %s1523_s18), 1  ;;  %vm423_vm0 = vcmask 261120   ;;  %vm1810_vm1 = vmmov 0   ;;  %vm749_vm2 = vcmask 64512   ;;  %vm806_vm3 = vcmask 523264  }
   0xc   : > { %s1561_s19 = sshll.u32 %s2242_s18, 6  ;;  %s1528_s23 = sshll.u32 %s2242_s18, 3  ;;  %vm1291_vm4 = vcmask 130048   ;;  %vm1293_vm5 = vcmask 195584   ;;  %vm1425_vm6 = vcmask 519168  }
   0xd   : > { %s404_s22 = scalar_lea.vmem %s2230_s1, %s1561_s19  ;;  %s399_s26 = scalar_lea.vmem %s2229_s0, %s1528_s23 }
   0xe   : > { %v1895_v0 = vld [vmem:[%s404_s22] sm:$0xff]  ;;  %v1897_v1 = vld [vmem:[%s404_s22 + $0x10] sm:$0xff]  ;;  %v1899_v2 = vld [vmem:[%s404_s22 + $0x8] sm:$0xff] }
   0xf   : > { %v521_v3 = vsel %vm423_vm0, %v1895_v0, 0.0  ;;  %v527_v4 = vsel %vm423_vm0, %v1897_v1, 0.0  ;;  %v1905_v5 = vld [vmem:[%s404_s22 + $0x18] sm:$0xff]  ;;  %v524_v6 = vsel %vm423_vm0, %v1899_v2, 0.0  ;;  %v1911_v8 = vld [vmem:[%s404_s22 + $0x20] sm:$0xff]  ;;  %v1913_v9 = vld [vmem:[%s404_s22 + $0x28] sm:$0xff] }
  0x10   : > { %522 = vadd.xlane.f32.xlu0 %v521_v3  ;;  %528 = vadd.xlane.f32.xlu1 %v527_v4  ;;  %v530_v7 = vsel %vm423_vm0, %v1905_v5, 0.0  ;;  %v533_v10 = vsel %vm423_vm0, %v1911_v8, 0.0  ;;  %v536_v11 = vsel %vm423_vm0, %v1913_v9, 0.0  ;;  %v1920_v12 = vld [vmem:[%s404_s22 + $0x30] sm:$0xff]  ;;  %v1922_v13 = vld [vmem:[%s404_s22 + $0x38] sm:$0xff]  ;;  %v1933_v16 = vld [vmem:[%s399_s26] sm:$0xff] }
  0x11   : > { %v539_v14 = vsel %vm423_vm0, %v1920_v12, 0.0  ;;  %v542_v15 = vsel %vm423_vm0, %v1922_v13, 0.0  ;;  %v424_v17 = vsel %vm423_vm0, %v1933_v16, 0.0 }
  0x14   : > { %525 = vadd.xlane.f32.xlu0 %v524_v6  ;;  %531 = vadd.xlane.f32.xlu1 %v530_v7 }
  0x18   : > { %534 = vadd.xlane.f32.xlu0 %v533_v10  ;;  %537 = vadd.xlane.f32.xlu1 %v536_v11 }
  0x1c   : > { %540 = vadd.xlane.f32.xlu0 %v539_v14  ;;  %543 = vadd.xlane.f32.xlu1 %v542_v15 }
  0x20   : > { %425 = vadd.xlane.f32.xlu0 %v424_v17 }
  0x99   : > { %v523_v18 = vpop.xlane.xlu0 %522  ;;  %v529_v19 = vpop.xlane.xlu1 %528 }
  0x9a   : > { %v545_v22 = vmul.f32 0.03125, %v523_v18  ;;  %v547_v24 = vmul.f32 0.03125, %v529_v19 }
  0x9d   : > { %v526_v20 = vpop.xlane.xlu0 %525  ;;  %v532_v21 = vpop.xlane.xlu1 %531 }
  0x9e   : > { %v546_v23 = vmul.f32 0.03125, %v526_v20  ;;  %v548_v26 = vmul.f32 0.03125, %v532_v21 }
  0xa0   : > { %v553_v25 = vadd.f32 %v546_v23, %v545_v22  ;;  %v1775_v22 = vld [vmem:[%s2233_s4 + $0x8] sm:$0xff]   ;;  %v1809_v23 = vmov 0.0  }
  0xa1   : > { %v535_v27 = vpop.xlane.xlu0 %534  ;;  %v538_v28 = vpop.xlane.xlu1 %537  ;;  %1619 = vmatprep.subr.bf16.mxu0 %v1809_v23  ;;  %1623 = vmatprep.mubr.msk.bf16.mxu0 %vm1810_vm1, %v1809_v23 }
  0xa2   : > { %v554_v29 = vadd.f32 %v553_v25, %v547_v24  ;;  %v549_v30 = vmul.f32 0.03125, %v535_v27  ;;  %v550_v32 = vmul.f32 0.03125, %v538_v28  ;;  %1620 = vmatpush3.bf16.msra.mxu0 %v1775_v22  ;;  %v1776_v24 = vld [vmem:[%s2233_s4] sm:$0xff]   ;;  %1651 = vmatprep.subr.bf16.mxu1 %v1809_v23  ;;  %v1777_v25 = vld [vmem:[%s2235_s6 + $0x8] sm:$0xff]  }
  0xa3   : > { %1621 = vmatprep.subr.bf16.mxu0 %v1809_v23  ;;  %1659 = vmatprep.mubr.msk.bf16.mxu1 %vm1810_vm1, %v1809_v23 }
  0xa4   : > { %v555_v31 = vadd.f32 %v554_v29, %v548_v26 }
  0xa5   : > { %v541_v33 = vpop.xlane.xlu0 %540  ;;  %v544_v34 = vpop.xlane.xlu1 %543 }
  0xa6   : > { %v556_v35 = vadd.f32 %v555_v31, %v549_v30  ;;  %v551_v36 = vmul.f32 0.03125, %v541_v33  ;;  %v552_v38 = vmul.f32 0.03125, %v544_v34  ;;  %1622 = vmatpush3.bf16.msra.mxu0 %v1776_v24 }
  0xa7   : > { %1627 = vmatprep.subr.bf16.mxu0 %v1777_v25 }
  0xa8   : > { %v557_v37 = vadd.f32 %v556_v35, %v550_v32 }
  0xa9   : > { %v426_v56 = vpop.xlane.xlu0 %425 }
  0xaa   : > { %v558_v39 = vadd.f32 %v557_v37, %v551_v36  ;;  %v428_v61 = vmul.f32 0.03125, %v426_v56 }
  0xac   : > { %v559_v40 = vadd.f32 %v558_v39, %v552_v38  ;;  %v1978_v10 = vsub.f32 %v1933_v16, %v428_v61 }
  0xae   : > { %v560_v41 = vrot.slane %v559_v40, 4  ;;  %v430_v18 = vmul.f32 %v1978_v10, %v1978_v10 }
  0xb0   : > { %v561_v42 = vadd.f32 %v560_v41, %v559_v40  ;;  %v431_v21 = vsel %vm423_vm0, %v430_v18, 0.0 }
  0xb2   : > { %v562_v43 = vrot.slane %v561_v42, 2 }
  0xb4   : > { %v563_v44 = vadd.f32 %v562_v43, %v561_v42 }
  0xb6   : > { %v564_v45 = vrot.slane %v563_v44, 1 }
  0xb8   : > { %v565_v46 = vadd.f32 %v564_v45, %v563_v44 }
  0xba   : > { %v567_v47 = vmul.f32 0.015625, %v565_v46 }
  0xbc   : > { %v1938_v48 = vsub.f32 %v1895_v0, %v567_v47  ;;  %v1941_v49 = vsub.f32 %v1899_v2, %v567_v47  ;;  %v1944_v50 = vsub.f32 %v1897_v1, %v567_v47  ;;  %v1947_v51 = vsub.f32 %v1905_v5, %v567_v47 }
  0xbd   : > { %v1954_v54 = vsub.f32 %v1911_v8, %v567_v47  ;;  %v1957_v55 = vsub.f32 %v1913_v9, %v567_v47  ;;  %v1966_v62 = vsub.f32 %v1920_v12, %v567_v47  ;;  %v1969_v63 = vsub.f32 %v1922_v13, %v567_v47 }
  0xbe   : > { %v576_v52 = vmul.f32 %v1938_v48, %v1938_v48  ;;  %v577_v53 = vmul.f32 %v1941_v49, %v1941_v49  ;;  %v578_v59 = vmul.f32 %v1944_v50, %v1944_v50  ;;  %v579_v60 = vmul.f32 %v1947_v51, %v1947_v51 }
  0xbf   : > { %v580_v6 = vmul.f32 %v1954_v54, %v1954_v54  ;;  %v581_v7 = vmul.f32 %v1957_v55, %v1957_v55  ;;  %v582_v15 = vmul.f32 %v1966_v62, %v1966_v62  ;;  %v583_v17 = vmul.f32 %v1969_v63, %v1969_v63 }
  0xc0   : > { %v584_v57 = vsel %vm423_vm0, %v576_v52, 0.0  ;;  %v587_v58 = vsel %vm423_vm0, %v577_v53, 0.0  ;;  %v590_v3 = vsel %vm423_vm0, %v578_v59, 0.0  ;;  %v593_v4 = vsel %vm423_vm0, %v579_v60, 0.0 }
  0xc1   : > { %585 = vadd.xlane.f32.xlu1 %v584_v57  ;;  %588 = vadd.xlane.f32.xlu0 %v587_v58  ;;  %v596_v11 = vsel %vm423_vm0, %v580_v6, 0.0  ;;  %v599_v14 = vsel %vm423_vm0, %v581_v7, 0.0  ;;  %v602_v19 = vsel %vm423_vm0, %v582_v15, 0.0  ;;  %v605_v20 = vsel %vm423_vm0, %v583_v17, 0.0  ;;  %v1534_v17 = vld [vmem:[%s2232_s3] ss:$0 sm:$0xff] }
  0xc5   : > { %591 = vadd.xlane.f32.xlu1 %v590_v3  ;;  %594 = vadd.xlane.f32.xlu0 %v593_v4 }
  0xc9   : > { %597 = vadd.xlane.f32.xlu1 %v596_v11  ;;  %600 = vadd.xlane.f32.xlu0 %v599_v14  ;;  %v1533_v14 = vld [vmem:[%s2231_s2] ss:$0 sm:$0xff] }
  0xcd   : > { %603 = vadd.xlane.f32.xlu1 %v602_v19  ;;  %606 = vadd.xlane.f32.xlu0 %v605_v20 }
  0xd1   : > { %432 = vadd.xlane.f32.xlu1 %v431_v21  ;;  %v1778_v21 = vld [vmem:[%s2235_s6] sm:$0xff]  }
 0x14a   : > { %v586_v26 = vpop.xlane.xlu1 %585  ;;  %v589_v27 = vpop.xlane.xlu0 %588 }
 0x14b   : > { %v608_v28 = vmul.f32 0.03125, %v586_v26  ;;  %v609_v29 = vmul.f32 0.03125, %v589_v27 }
 0x14d   : > { %v616_v32 = vadd.f32 %v609_v29, %v608_v28 }
 0x14e   : > { %v592_v30 = vpop.xlane.xlu1 %591  ;;  %v595_v31 = vpop.xlane.xlu0 %594 }
 0x14f   : > { %v610_v33 = vmul.f32 0.03125, %v592_v30  ;;  %v611_v35 = vmul.f32 0.03125, %v595_v31 }
 0x151   : > { %v617_v34 = vadd.f32 %v616_v32, %v610_v33 }
 0x152   : > { %v598_v36 = vpop.xlane.xlu1 %597  ;;  %v601_v37 = vpop.xlane.xlu0 %600 }
 0x153   : > { %v618_v38 = vadd.f32 %v617_v34, %v611_v35  ;;  %v612_v39 = vmul.f32 0.03125, %v598_v36  ;;  %v613_v41 = vmul.f32 0.03125, %v601_v37 }
 0x155   : > { %v619_v40 = vadd.f32 %v618_v38, %v612_v39 }
 0x156   : > { %v604_v42 = vpop.xlane.xlu1 %603  ;;  %v607_v43 = vpop.xlane.xlu0 %606 }
 0x157   : > { %v620_v44 = vadd.f32 %v619_v40, %v613_v41  ;;  %v614_v45 = vmul.f32 0.03125, %v604_v42  ;;  %v615_v47 = vmul.f32 0.03125, %v607_v43 }
 0x159   : > { %v621_v46 = vadd.f32 %v620_v44, %v614_v45 }
 0x15a   : > { %v433_v52 = vpop.xlane.xlu1 %432 }
 0x15b   : > { %v622_v53 = vadd.f32 %v621_v46, %v615_v47  ;;  %v434_v56 = vmul.f32 0.03125, %v433_v52 }
 0x15d   : > { %v623_v57 = vrot.slane %v622_v53, 4  ;;  %v435_v58 = vadd.f32 1e-05, %v434_v56 }
 0x15f   : > { %v624_v59 = vadd.f32 %v623_v57, %v622_v53  ;;  %1781 = vrsqrt.f32 %v435_v58 }
 0x161   : > { %v625_v60 = vrot.slane %v624_v59, 2 }
 0x163   : > { %v626_v61 = vadd.f32 %v625_v60, %v624_v59 }
 0x165   : > { %v627_v3 = vrot.slane %v626_v61, 1 }
 0x167   : > { %v628_v4 = vadd.f32 %v627_v3, %v626_v61  ;;  %v1535_v61 = vld [vmem:[%s2234_s5] ss:$0 sm:$0xff] }
 0x169   : > { %v629_v6 = vmul.f32 0.015625, %v628_v4 }
 0x16b   : > { %v630_v7 = vadd.f32 1e-05, %v629_v6 }
 0x16c   : > { %v1782_v11 = vpop.eup %1781 }
 0x16d   : > { %1783 = vrsqrt.f32 %v630_v7  ;;  %v437_v15 = vmul.f32 %v1782_v11, %v1978_v10 }
 0x16f   : > { %v445_v18 = vmul.f32 %v1533_v14, %v437_v15 }
 0x171   : > { %v453_v19 = vadd.f32 %v1534_v17, %v445_v18 }
 0x173   : > { %v454_v20 = vpack.c.bf16 %v453_v19, %v453_v19 }
 0x175   : > { %1624 = vmatmul.mubr.msk.bf16.vlgmr.msra.gmra.mxu0 %vm423_vm0, %v454_v20 }
 0x176   : > { %1628 = vmatpush3.bf16.msra.mxu0 %v1777_v25 }
 0x177   : > { %1629 = vmatprep.subr.bf16.mxu0 %v1778_v21 }
 0x17a   : > { %v1784_v22 = vpop.eup %1783  ;;  %1630 = vmatpush3.bf16.msra.mxu0 %v1778_v21 }
 0x17b   : > { %v632_v24 = vmul.f32 %v1784_v22, %v1938_v48  ;;  %v633_v10 = vmul.f32 %v1784_v22, %v1941_v49  ;;  %v634_v26 = vmul.f32 %v1784_v22, %v1944_v50  ;;  %v635_v27 = vmul.f32 %v1784_v22, %v1947_v51  ;;  %1639 = vmatprep.subr.bf16.mxu0 %v1809_v23 }
 0x17c   : > { %v636_v28 = vmul.f32 %v1784_v22, %v1954_v54  ;;  %v637_v29 = vmul.f32 %v1784_v22, %v1957_v55  ;;  %v638_v48 = vmul.f32 %v1784_v22, %v1966_v62  ;;  %v639_v49 = vmul.f32 %v1784_v22, %v1969_v63  ;;  %v1539_v62 = vld [vmem:[%s2236_s7] ss:$0 sm:$0xff] }
 0x17d   : > { %v640_v30 = vpack.c.bf16 %v633_v10, %v632_v24  ;;  %v641_v31 = vpack.c.bf16 %v635_v27, %v634_v26 }
 0x17e   : > { %v642_v25 = vpack.c.bf16 %v637_v29, %v636_v28  ;;  %v643_v50 = vpack.c.bf16 %v639_v49, %v638_v48 }
 0x17f   : > { %1631 = vmatprep.mubr.msk.bf16.mxu0 %vm423_vm0, %v640_v30 }
 0x180   : > { %1632 = vmatmul.mubr.msk.bf16.vlgmr.msra.gmra.mxu0 %vm423_vm0, %v641_v31 }
 0x181   : > { %1635 = vmatprep.mubr.msk.bf16.mxu0 %vm423_vm0, %v642_v25 }
 0x188   : > { %1636 = vmatmul.mubr.msk.bf16.gmra.mxu0 %vm423_vm0, %v643_v50 }
 0x189   : > { %1647 = vmatprep.mubr.msk.bf16.mxu0 %vm1810_vm1, %v1809_v23 }
 0x235   : > { %v515_v51 = vpop.f32.mrf.mxu0 }
 0x236   : > { %v516_v4 = vadd.f32 %v1535_v61, %v515_v51 }
 0x237   : > { %v1625_v54 = vpop.f32.mrf.mxu0 }
 0x238   : > { %v2063_v6 = vpack.c.bf16 %v516_v4, %v516_v4 }
 0x239   : > { %v518_v55 = vpop.f32.mrf.mxu0 }
 0x23b   : > { %v1626_v32 = vpop.f32.mrf.mxu0 }
 0x240   : > { %v1633_v33 = vpop.f32.mrf.mxu0 }
 0x241   : > { %v722_v52 = vadd.f32 %v1633_v33, %v1539_v62 }
 0x242   : > { %v713_v34 = vpop.f32.mrf.mxu0 }
 0x243   : > { %v714_v59 = vadd.f32 %v1539_v62, %v713_v34 }
 0x244   : > { %v1634_v35 = vpop.f32.mrf.mxu0 }
 0x245   : > { %v725_v45 = vadd.f32 %v1634_v35, %v1539_v62 }
 0x246   : > { %v716_v36 = vpop.f32.mrf.mxu0 }
 0x247   : > { %v2045_v53 = vpack.c.bf16 %v725_v45, %v722_v52  ;;  %v717_v57 = vadd.f32 %v1539_v62, %v716_v36 }
 0x248   : > { %v1637_v37 = vpop.f32.mrf.mxu0 }
 0x249   : > { %v738_v39 = vadd.f32 %v1637_v37, %v1539_v62  ;;  %v757_v58 = vsel %vm749_vm2, %v2045_v53, 0  ;;  %v2055_v60 = vpack.c.bf16 %v717_v57, %v714_v59 }
 0x24a   : > { %v729_v38 = vpop.f32.mrf.mxu0 }
 0x24b   : > { %v730_v42 = vadd.f32 %v1539_v62, %v729_v38  ;;  %v754_v3 = vsel %vm749_vm2, %v2055_v60, 0 }
 0x24c   : > { %v1638_v63 = vpop.f32.mrf.mxu0 }
 0x24d   : > { %v741_v40 = vadd.f32 %v1638_v63, %v1539_v62 }
 0x24e   : > { %v732_v41 = vpop.f32.mrf.mxu0 }
 0x24f   : > { %v2036_v43 = vpack.c.bf16 %v741_v40, %v738_v39  ;;  %v733_v44 = vadd.f32 %v1539_v62, %v732_v41 }
 0x251   : > { %v2038_v46 = vpack.c.bf16 %v733_v44, %v730_v42  ;;  %v763_v47 = vsel %vm749_vm2, %v2036_v43, 0 }
 0x252   : > { %1640 = vmatpush3.bf16.xpose.msra.mxu0 %v763_v47 }
 0x253   : > { %827 = vrot.lane.b32.xlu1 %v2038_v46, %s1811_s25  ;;  %1641 = vmatprep.subr.bf16.mxu0 %v1809_v23  ;;  %v760_v56 = vsel %vm749_vm2, %v2038_v46, 0 }
 0x257   : > { %825 = vrot.lane.b32.xlu1 %v2045_v53, %s1811_s25 }
 0x25a   : > { %1642 = vmatpush3.bf16.xpose.msra.mxu0 %v760_v56 }
 0x25b   : > { %1643 = vmatprep.subr.bf16.mxu0 %v1809_v23 }
 0x262   : > { %1644 = vmatpush3.bf16.xpose.msra.mxu0 %v757_v58 }
 0x263   : > { %1645 = vmatprep.subr.bf16.mxu0 %v1809_v23 }
 0x26a   : > { %1646 = vmatpush3.bf16.xpose.msra.mxu0 %v754_v3 }
 0x26b   : > { %1675 = vmatprep.subr.bf16.mxu0 %v1809_v23 }
 0x271   : > { %1648 = vmatmul.mubr.msk.bf16.vlgmr.msra.gmra.mxu0 %vm749_vm2, %v2063_v6 }
 0x272   : > { %1683 = vmatprep.mubr.msk.bf16.mxu0 %vm1810_vm1, %v1809_v23 }
 0x2c5   : > { %v828_v24 = vpop.permute.xlu1 %827 }
 0x2c9   : > { %v826_v26 = vpop.permute.xlu1 %825 }
 0x331   : > { %v799_v7 = vpop.f32.mrf.mxu0 }
 0x332   : > { %v805_v11 = vmul.f32 0.35355338, %v799_v7 }
 0x333   : > { %v1649_v14 = vpop.f32.mrf.mxu0 }
 0x334   : > { %v807_v15 = vsel %vm806_vm3, %v805_v11, -inf }
 0x335   : > { %808 = vmax.xlane.f32.xlu0 %v807_v15  ;;  %v802_v17 = vpop.f32.mrf.mxu0 }
 0x337   : > { %v1650_v18 = vpop.f32.mrf.mxu0 }
 0x34b   : > { %829 = vrot.lane.b32.xlu0 %v2036_v43, %s1811_s25 }
 0x34f   : > { %887 = vrot.lane.b32.xlu0 %v2036_v43, %s1812_s28 }
 0x353   : > { %883 = vrot.lane.b32.xlu0 %v2045_v53, %s1812_s28 }
 0x357   : > { %879 = vrot.lane.b32.xlu0 %v2063_v6, %s1812_s28 }
 0x35b   : > { %963 = vrot.lane.b32.xlu0 %v2036_v43, %s1813_s29 }
 0x3be   : > { %v809_v19 = vpop.xlane.xlu0 %808 }
 0x3bf   : > { %v810_v20 = vsub.f32 %v805_v11, %v809_v19 }
 0x3c1   : > { %v811_v21 = vmul.f32 1.442695, %v810_v20 }
 0x3c2   : > { %v830_v22 = vpop.permute.xlu0 %829 }
 0x3c3   : > { %1785 = vpow2.f32 %v811_v21  ;;  %1652 = vmatpush3.bf16.msra.mxu1 %v830_v22 }
 0x3c4   : > { %1653 = vmatprep.subr.bf16.mxu1 %v1809_v23 }
 0x3c6   : > { %v888_v10 = vpop.permute.xlu0 %887 }
 0x3c7   : > { %1654 = vmatpush3.bf16.msra.mxu1 %v828_v24  ;;  %v902_v54 = vsel %vm749_vm2, %v888_v10, 0 }
 0x3c8   : > { %1655 = vmatprep.subr.bf16.mxu1 %v1809_v23 }
 0x3ca   : > { %v884_v27 = vpop.permute.xlu0 %883 }
 0x3cb   : > { %1656 = vmatpush3.bf16.msra.mxu1 %v826_v26  ;;  %v896_v33 = vsel %vm749_vm2, %v884_v27, 0 }
 0x3cc   : > { %1657 = vmatprep.subr.bf16.mxu1 %v1809_v23 }
 0x3ce   : > { %v880_v28 = vpop.permute.xlu0 %879 }
 0x3d0   : > { %v1786_v29 = vpop.eup %1785 }
 0x3d1   : > { %v813_v30 = vsel %vm806_vm3, %v1786_v29, 0.0 }
 0x3d2   : > { %814 = vadd.xlane.f32.xlu1 %v813_v30  ;;  %v964_v31 = vpop.permute.xlu0 %963 }
 0x3d3   : > { %1676 = vmatpush3.bf16.msra.mxu0 %v964_v31 }
 0x3d4   : > { %1677 = vmatprep.subr.bf16.mxu0 %v1809_v23 }
 0x3e3   : > { %823 = vrot.lane.b32.xlu1 %v2055_v60, %s1811_s25 }
 0x3e7   : > { %885 = vrot.lane.b32.xlu1 %v2038_v46, %s1812_s28 }
 0x3eb   : > { %881 = vrot.lane.b32.xlu1 %v2055_v60, %s1812_s28 }
 0x45b   : > { %v815_v25 = vpop.xlane.xlu1 %814 }
 0x45c   : > { %1787 = vrcp.f32 %v815_v25 }
 0x45f   : > { %v824_v48 = vpop.permute.xlu1 %823 }
 0x460   : > { %1658 = vmatpush3.bf16.msra.mxu1 %v824_v48 }
 0x461   : > { %1663 = vmatprep.subr.bf16.mxu1 %v1809_v23 }
 0x463   : > { %v886_v55 = vpop.permute.xlu1 %885 }
 0x464   : > { %v899_v32 = vsel %vm749_vm2, %v886_v55, 0 }
 0x467   : > { %v882_v34 = vpop.permute.xlu1 %881 }
 0x468   : > { %v893_v35 = vsel %vm749_vm2, %v882_v34, 0 }
 0x469   : > { %v1788_v49 = vpop.eup %1787 }
 0x46a   : > { %v817_v50 = vmul.f32 %v1788_v49, %v1786_v29 }
 0x46c   : > { %v818_v51 = vpack.c.bf16 %v817_v50, %v817_v50 }
 0x46e   : > { %1660 = vmatmul.mubr.msk.bf16.vlgmr.msra.gmra.mxu1 %vm806_vm3, %v818_v51 }
 0x46f   : > { %1664 = vmatpush3.bf16.xpose.msra.mxu1 %v902_v54  ;;  %1671 = vmatprep.mubr.msk.bf16.mxu1 %vm1810_vm1, %v1809_v23 }
 0x470   : > { %1665 = vmatprep.subr.bf16.mxu1 %v1809_v23 }
 0x477   : > { %1666 = vmatpush3.bf16.xpose.msra.mxu1 %v899_v32 }
 0x478   : > { %1667 = vmatprep.subr.bf16.mxu1 %v1809_v23 }
 0x47f   : > { %1668 = vmatpush3.bf16.xpose.msra.mxu1 %v896_v33 }
 0x480   : > { %1669 = vmatprep.subr.bf16.mxu1 %v1809_v23 }
 0x487   : > { %1670 = vmatpush3.bf16.xpose.msra.mxu1 %v893_v35 }
 0x488   : > { %1699 = vmatprep.subr.bf16.mxu1 %v1809_v23 }
 0x48e   : > { %1672 = vmatmul.mubr.msk.bf16.vlgmr.msra.gmra.mxu1 %vm749_vm2, %v880_v28 }
 0x48f   : > { %1707 = vmatprep.mubr.msk.bf16.mxu1 %vm1810_vm1, %v1809_v23 }
 0x52e   : > { %v2101_v36 = vpop.f32.mrf.mxu1 }
 0x530   : > { %v1661_v37 = vpop.f32.mrf.mxu1 }
 0x532   : > { %v875_v38 = vpop.f32.mrf.mxu1 }
 0x534   : > { %v1662_v62 = vpop.f32.mrf.mxu1 }
 0x54e   : > { %v938_v63 = vpop.f32.mrf.mxu1 }
 0x54f   : > { %v944_v39 = vmul.f32 0.35355338, %v938_v63 }
 0x550   : > { %v1673_v40 = vpop.f32.mrf.mxu1 }
 0x551   : > { %v945_v41 = vsel %vm806_vm3, %v944_v39, -inf }
 0x552   : > { %946 = vmax.xlane.f32.xlu1 %v945_v41  ;;  %v941_v42 = vpop.f32.mrf.mxu1 }
 0x554   : > { %v1674_v44 = vpop.f32.mrf.mxu1 }
 0x563   : > { %961 = vrot.lane.b32.xlu1 %v2038_v46, %s1813_s29 }
 0x567   : > { %959 = vrot.lane.b32.xlu1 %v2045_v53, %s1813_s29 }
 0x56b   : > { %1020 = vrot.lane.b32.xlu1 %v2036_v43, %s1814_s30 }
 0x56f   : > { %1016 = vrot.lane.b32.xlu1 %v2045_v53, %s1814_s30 }
 0x573   : > { %1012 = vrot.lane.b32.xlu1 %v2063_v6, %s1814_s30 }
 0x577   : > { %1094 = vrot.lane.b32.xlu1 %v2038_v46, %s1815_s12 }
 0x5db   : > { %v947_v45 = vpop.xlane.xlu1 %946 }
 0x5dc   : > { %v948_v47 = vsub.f32 %v944_v39, %v947_v45 }
 0x5de   : > { %v949_v52 = vmul.f32 1.442695, %v948_v47 }
 0x5df   : > { %v962_v56 = vpop.permute.xlu1 %961 }
 0x5e0   : > { %1789 = vpow2.f32 %v949_v52  ;;  %1678 = vmatpush3.bf16.msra.mxu0 %v962_v56 }
 0x5e1   : > { %1679 = vmatprep.subr.bf16.mxu0 %v1809_v23 }
 0x5e3   : > { %v960_v57 = vpop.permute.xlu1 %959 }
 0x5e4   : > { %1680 = vmatpush3.bf16.msra.mxu0 %v960_v57 }
 0x5e5   : > { %1681 = vmatprep.subr.bf16.mxu0 %v1809_v23 }
 0x5e7   : > { %v1021_v11 = vpop.permute.xlu1 %1020 }
 0x5e8   : > { %v1035_v15 = vsel %vm749_vm2, %v1021_v11, 0 }
 0x5eb   : > { %v1017_v19 = vpop.permute.xlu1 %1016 }
 0x5ec   : > { %v1029_v20 = vsel %vm749_vm2, %v1017_v19, 0 }
 0x5ed   : > { %v1790_v58 = vpop.eup %1789 }
 0x5ee   : > { %v951_v59 = vsel %vm806_vm3, %v1790_v58, 0.0 }
 0x5ef   : > { %952 = vadd.xlane.f32.xlu0 %v951_v59  ;;  %v1013_v24 = vpop.permute.xlu1 %1012 }
 0x5f3   : > { %v1095_v32 = vpop.permute.xlu1 %1094 }
 0x605   : > { %957 = vrot.lane.b32.xlu0 %v2055_v60, %s1813_s29  ;;  %s408_s29 = scalar_lea.vmem %s2239_s10, %s1528_s23 }
 0x609   : > { %1018 = vrot.lane.b32.xlu0 %v2038_v46, %s1814_s30 }
 0x60d   : > { %1014 = vrot.lane.b32.xlu0 %v2055_v60, %s1814_s30  ;;  %s1532_s30 = sshll.u32 %s2242_s18, 2 }
 0x678   : > { %v953_v61 = vpop.xlane.xlu0 %952 }
 0x679   : > { %1791 = vrcp.f32 %v953_v61 }
 0x67c   : > { %v958_v3 = vpop.permute.xlu0 %957 }
 0x67d   : > { %1682 = vmatpush3.bf16.msra.mxu0 %v958_v3 }
 0x67e   : > { %1687 = vmatprep.subr.bf16.mxu0 %v1809_v23 }
 0x680   : > { %v1019_v17 = vpop.permute.xlu0 %1018 }
 0x681   : > { %v1032_v18 = vsel %vm749_vm2, %v1019_v17, 0 }
 0x684   : > { %v1015_v21 = vpop.permute.xlu0 %1014 }
 0x685   : > { %v1026_v22 = vsel %vm749_vm2, %v1015_v21, 0 }
 0x686   : > { %v1792_v4 = vpop.eup %1791 }
 0x687   : > { %v955_v7 = vmul.f32 %v1792_v4, %v1790_v58 }
 0x689   : > { %v956_v14 = vpack.c.bf16 %v955_v7, %v955_v7 }
 0x68b   : > { %1684 = vmatmul.mubr.msk.bf16.vlgmr.msra.gmra.mxu0 %vm806_vm3, %v956_v14 }
 0x68c   : > { %1688 = vmatpush3.bf16.xpose.msra.mxu0 %v1035_v15  ;;  %1695 = vmatprep.mubr.msk.bf16.mxu0 %vm1810_vm1, %v1809_v23 }
 0x68d   : > { %1689 = vmatprep.subr.bf16.mxu0 %v1809_v23 }
 0x694   : > { %1690 = vmatpush3.bf16.xpose.msra.mxu0 %v1032_v18 }
 0x695   : > { %1691 = vmatprep.subr.bf16.mxu0 %v1809_v23 }
 0x69c   : > { %1692 = vmatpush3.bf16.xpose.msra.mxu0 %v1029_v20 }
 0x69d   : > { %1693 = vmatprep.subr.bf16.mxu0 %v1809_v23 }
 0x6a4   : > { %1694 = vmatpush3.bf16.xpose.msra.mxu0 %v1026_v22 }
 0x6a5   : > { %1723 = vmatprep.subr.bf16.mxu0 %v1809_v23 }
 0x6ab   : > { %1696 = vmatmul.mubr.msk.bf16.vlgmr.msra.gmra.mxu0 %vm749_vm2, %v1013_v24 }
 0x6ac   : > { %1731 = vmatprep.mubr.msk.bf16.mxu0 %vm1810_vm1, %v1809_v23 }
 0x74b   : > { %v2135_v10 = vpop.f32.mrf.mxu0 }
 0x74d   : > { %v1685_v26 = vpop.f32.mrf.mxu0 }
 0x74f   : > { %v1009_v27 = vpop.f32.mrf.mxu0 }
 0x751   : > { %v1686_v28 = vpop.f32.mrf.mxu0 }
 0x752   : > { %v1780_v28 = vld [vmem:[%s2237_s8] sm:$0xff]  }
 0x76b   : > { %v1071_v29 = vpop.f32.mrf.mxu0 }
 0x76c   : > { %v1077_v30 = vmul.f32 0.35355338, %v1071_v29  ;;  %v1368_v29 = vpack.c.bf16 %v1922_v13, %v1920_v12 }
 0x76d   : > { %v1697_v31 = vpop.f32.mrf.mxu0 }
 0x76e   : > { %v1078_v25 = vsel %vm806_vm3, %v1077_v30, -inf  ;;  %v1367_v31 = vpack.c.bf16 %v1913_v9, %v1911_v8 }
 0x76f   : > { %1079 = vmax.xlane.f32.xlu0 %v1078_v25  ;;  %v1074_v48 = vpop.f32.mrf.mxu0 }
 0x770   : > { %v1379_v25 = vsel %vm423_vm0, %v1367_v31, 0 }
 0x771   : > { %v1698_v49 = vpop.f32.mrf.mxu0 }
 0x772   : > { %v1366_v49 = vpack.c.bf16 %v1905_v5, %v1897_v1 }
 0x785   : > { %1096 = vrot.lane.b32.xlu0 %v2036_v43, %s1815_s12 }
 0x789   : > { %1092 = vrot.lane.b32.xlu0 %v2045_v53, %s1815_s12 }
 0x78d   : > { %1153 = vrot.lane.b32.xlu0 %v2036_v43, %s1816_s13 }
 0x791   : > { %1149 = vrot.lane.b32.xlu0 %v2045_v53, %s1816_s13 }
 0x795   : > { %1145 = vrot.lane.b32.xlu0 %v2063_v6, %s1816_s13 }
 0x799   : > { %1229 = vrot.lane.b32.xlu0 %v2036_v43, %s1817_s14 }
 0x7f8   : > { %v1080_v50 = vpop.xlane.xlu0 %1079 }
 0x7f9   : > { %v1081_v51 = vsub.f32 %v1077_v30, %v1080_v50  ;;  %v1382_v30 = vsel %vm423_vm0, %v1368_v29, 0  ;;  %v1376_v50 = vsel %vm423_vm0, %v1366_v49, 0 }
 0x7fb   : > { %v1082_v54 = vmul.f32 1.442695, %v1081_v51 }
 0x7fc   : > { %v1097_v55 = vpop.permute.xlu0 %1096 }
 0x7fd   : > { %1793 = vpow2.f32 %v1082_v54  ;;  %1700 = vmatpush3.bf16.msra.mxu1 %v1097_v55 }
 0x7fe   : > { %1701 = vmatprep.subr.bf16.mxu1 %v1809_v23 }
 0x800   : > { %v1093_v33 = vpop.permute.xlu0 %1092 }
 0x801   : > { %1702 = vmatpush3.bf16.msra.mxu1 %v1095_v32 }
 0x802   : > { %1703 = vmatprep.subr.bf16.mxu1 %v1809_v23 }
 0x804   : > { %v1154_v34 = vpop.permute.xlu0 %1153 }
 0x805   : > { %1704 = vmatpush3.bf16.msra.mxu1 %v1093_v33  ;;  %v1168_v42 = vsel %vm749_vm2, %v1154_v34, 0  ;;  %v1365_v33 = vpack.c.bf16 %v1899_v2, %v1895_v0  ;;  %v1554_v34 = vld [vmem:[%s2238_s9] ss:$0 sm:$0xff] }
 0x806   : > { %1705 = vmatprep.subr.bf16.mxu1 %v1809_v23 }
 0x808   : > { %v1150_v6 = vpop.permute.xlu0 %1149 }
 0x809   : > { %v1162_v47 = vsel %vm749_vm2, %v1150_v6, 0 }
 0x80a   : > { %v1794_v35 = vpop.eup %1793 }
 0x80b   : > { %v1084_v43 = vsel %vm806_vm3, %v1794_v35, 0.0 }
 0x80c   : > { %1085 = vadd.xlane.f32.xlu1 %v1084_v43  ;;  %v1146_v37 = vpop.permute.xlu0 %1145 }
 0x810   : > { %v1230_v38 = vpop.permute.xlu0 %1229 }
 0x811   : > { %1724 = vmatpush3.bf16.msra.mxu0 %v1230_v38 }
 0x812   : > { %1725 = vmatprep.subr.bf16.mxu0 %v1809_v23 }
 0x81d   : > { %1090 = vrot.lane.b32.xlu1 %v2055_v60, %s1815_s12 }
 0x821   : > { %1151 = vrot.lane.b32.xlu1 %v2038_v46, %s1816_s13 }
 0x825   : > { %1147 = vrot.lane.b32.xlu1 %v2055_v60, %s1816_s13 }
 0x895   : > { %v1086_v62 = vpop.xlane.xlu1 %1085 }
 0x896   : > { %1795 = vrcp.f32 %v1086_v62 }
 0x899   : > { %v1091_v63 = vpop.permute.xlu1 %1090 }
 0x89a   : > { %1706 = vmatpush3.bf16.msra.mxu1 %v1091_v63 }
 0x89b   : > { %1711 = vmatprep.subr.bf16.mxu1 %v1809_v23 }
 0x89d   : > { %v1152_v44 = vpop.permute.xlu1 %1151 }
 0x89e   : > { %v1165_v45 = vsel %vm749_vm2, %v1152_v44, 0 }
 0x8a1   : > { %v1148_v52 = vpop.permute.xlu1 %1147 }
 0x8a2   : > { %v1159_v56 = vsel %vm749_vm2, %v1148_v52, 0 }
 0x8a3   : > { %v1796_v39 = vpop.eup %1795 }
 0x8a4   : > { %v1088_v40 = vmul.f32 %v1796_v39, %v1794_v35 }
 0x8a6   : > { %v1089_v41 = vpack.c.bf16 %v1088_v40, %v1088_v40 }
 0x8a8   : > { %1708 = vmatmul.mubr.msk.bf16.vlgmr.msra.gmra.mxu1 %vm806_vm3, %v1089_v41 }
 0x8a9   : > { %1712 = vmatpush3.bf16.xpose.msra.mxu1 %v1168_v42  ;;  %1719 = vmatprep.mubr.msk.bf16.mxu1 %vm1810_vm1, %v1809_v23 }
 0x8aa   : > { %1713 = vmatprep.subr.bf16.mxu1 %v1809_v23 }
 0x8b1   : > { %1714 = vmatpush3.bf16.xpose.msra.mxu1 %v1165_v45 }
 0x8b2   : > { %1715 = vmatprep.subr.bf16.mxu1 %v1809_v23 }
 0x8b9   : > { %1716 = vmatpush3.bf16.xpose.msra.mxu1 %v1162_v47 }
 0x8ba   : > { %1717 = vmatprep.subr.bf16.mxu1 %v1809_v23 }
 0x8c1   : > { %1718 = vmatpush3.bf16.xpose.msra.mxu1 %v1159_v56 }
 0x8c2   : > { %1743 = vmatprep.subr.bf16.mxu1 %v1809_v23 }
 0x8c8   : > { %1720 = vmatmul.mubr.msk.bf16.vlgmr.msra.gmra.mxu1 %vm749_vm2, %v1146_v37 }
 0x8c9   : > { %1751 = vmatprep.mubr.msk.bf16.mxu1 %vm1810_vm1, %v1809_v23  ;;  %1744 = vmatpush3.bf16.xpose.msra.mxu1 %v1382_v30 }
 0x8ca   : > { %1745 = vmatprep.subr.bf16.mxu1 %v1809_v23 }
 0x8d1   : > { %1746 = vmatpush3.bf16.xpose.msra.mxu1 %v1379_v25 }
 0x8d2   : > { %1747 = vmatprep.subr.bf16.mxu1 %v1809_v23 }
 0x8d9   : > { %1748 = vmatpush3.bf16.xpose.msra.mxu1 %v1376_v50 }
 0x8da   : > { %1749 = vmatprep.subr.bf16.mxu1 %v1809_v23 }
 0x968   : > { %v1139_v57 = vpop.f32.mrf.mxu1 }
 0x96a   : > { %v1709_v58 = vpop.f32.mrf.mxu1 }
 0x96c   : > { %v1142_v59 = vpop.f32.mrf.mxu1 }
 0x96e   : > { %v1710_v61 = vpop.f32.mrf.mxu1 }
 0x988   : > { %v1204_v3 = vpop.f32.mrf.mxu1 }
 0x989   : > { %v1210_v4 = vmul.f32 0.35355338, %v1204_v3 }
 0x98a   : > { %v1721_v7 = vpop.f32.mrf.mxu1 }
 0x98b   : > { %v1211_v11 = vsel %vm806_vm3, %v1210_v4, -inf }
 0x98c   : > { %1212 = vmax.xlane.f32.xlu1 %v1211_v11  ;;  %v1207_v14 = vpop.f32.mrf.mxu1 }
 0x98e   : > { %v1722_v15 = vpop.f32.mrf.mxu1 }
 0x99d   : > { %1227 = vrot.lane.b32.xlu1 %v2038_v46, %s1817_s14 }
 0x9a1   : > { %1225 = vrot.lane.b32.xlu1 %v2045_v53, %s1817_s14 }
 0x9a5   : > { %1279 = vrot.lane.b32.xlu1 %v2135_v10, %s1818_s15 }
 0xa15   : > { %v1213_v17 = vpop.xlane.xlu1 %1212 }
 0xa16   : > { %v1214_v18 = vsub.f32 %v1210_v4, %v1213_v17 }
 0xa18   : > { %v1215_v19 = vmul.f32 1.442695, %v1214_v18 }
 0xa19   : > { %v1228_v20 = vpop.permute.xlu1 %1227 }
 0xa1a   : > { %1797 = vpow2.f32 %v1215_v19  ;;  %1726 = vmatpush3.bf16.msra.mxu0 %v1228_v20 }
 0xa1b   : > { %1727 = vmatprep.subr.bf16.mxu0 %v1809_v23 }
 0xa1d   : > { %v1226_v21 = vpop.permute.xlu1 %1225 }
 0xa1e   : > { %1728 = vmatpush3.bf16.msra.mxu0 %v1226_v21 }
 0xa1f   : > { %1729 = vmatprep.subr.bf16.mxu0 %v1809_v23 }
 0xa21   : > { %v1280_v8 = vpop.permute.xlu1 %1279 }
 0xa22   : > { %v1290_v1 = vsel %vm749_vm2, %v2101_v36, %v1280_v8 }
 0xa27   : > { %v1798_v22 = vpop.eup %1797 }
 0xa28   : > { %v1217_v46 = vsel %vm806_vm3, %v1798_v22, 0.0 }
 0xa29   : > { %1218 = vadd.xlane.f32.xlu0 %v1217_v46 }
 0xa3f   : > { %1223 = vrot.lane.b32.xlu0 %v2055_v60, %s1817_s14  ;;  %v1779_v60 = vld [vmem:[%s2237_s8 + $0x8] sm:$0xff]   ;;  %s412_s14 = scalar_lea.vmem %s2240_s11, %s1532_s30 }
 0xa43   : > { %1283 = vrot.lane.b32.xlu0 %v1139_v57, %s1819_s16 }
 0xab2   : > { %v1219_v53 = vpop.xlane.xlu0 %1218 }
 0xab3   : > { %1799 = vrcp.f32 %v1219_v53 }
 0xab6   : > { %v1224_v24 = vpop.permute.xlu0 %1223 }
 0xab7   : > { %1730 = vmatpush3.bf16.msra.mxu0 %v1224_v24 }
 0xab8   : > { %1735 = vmatprep.subr.bf16.mxu0 %v1809_v23 }
 0xaba   : > { %v1284_v9 = vpop.permute.xlu0 %1283 }
 0xabb   : > { %v1292_v5 = vsel %vm1291_vm4, %v1290_v1, %v1284_v9 }
 0xac0   : > { %v1800_v10 = vpop.eup %1799 }
 0xac1   : > { %v1221_v26 = vmul.f32 %v1800_v10, %v1798_v22 }
 0xac3   : > { %v1222_v27 = vpack.c.bf16 %v1221_v26, %v1221_v26 }
 0xac5   : > { %1732 = vmatmul.mubr.msk.bf16.vlgmr.msra.gmra.mxu0 %vm806_vm3, %v1222_v27 }
 0xac6   : > { %1739 = vmatprep.mubr.msk.bf16.mxu0 %vm1810_vm1, %v1809_v23  ;;  %1736 = vmatpush3.bf16.msra.mxu0 %v1779_v60 }
 0xac7   : > { %1737 = vmatprep.subr.bf16.mxu0 %v1809_v23  ;;  %v1373_v23 = vsel %vm423_vm0, %v1365_v33, 0 }
 0xac8   : > { %1750 = vmatpush3.bf16.xpose.msra.mxu1 %v1373_v23 }
 0xaca   : > { %1738 = vmatpush3.bf16.msra.mxu0 %v1780_v28 }
 0xb85   : > { %v1272_v48 = vpop.f32.mrf.mxu0 }
 0xb86   : > { %1287 = vrot.lane.b32.xlu1 %v1272_v48, %s1820_s24 }
 0xb87   : > { %v1733_v12 = vpop.f32.mrf.mxu0 }
 0xb89   : > { %v1275_v13 = vpop.f32.mrf.mxu0 }
 0xb8b   : > { %v1734_v51 = vpop.f32.mrf.mxu0 }
 0xbf8   : > { %v1288_v54 = vpop.permute.xlu1 %1287 }
 0xbf9   : > { %v1294_v55 = vsel %vm1293_vm5, %v1292_v5, %v1288_v54 }
 0xbfa   : > { %v1295_v32 = vpack.c.bf16 %v1294_v55, %v1294_v55 }
 0xbfc   : > { %1740 = vmatmul.mubr.msk.bf16.vlgmr.msra.gmra.mxu0 %vm423_vm0, %v1295_v32 }
 0xcbc   : > { %v1356_v6 = vpop.f32.mrf.mxu0 }
 0xcbd   : > { %v1357_v35 = vadd.f32 %v1554_v34, %v1356_v6 }
 0xcbe   : > { %v1741_v36 = vpop.f32.mrf.mxu0 }
 0xcbf   : > { %v1362_v43 = vadd.f32 %v1357_v35, %v1933_v16 }
 0xcc0   : > { %v1359_v37 = vpop.f32.mrf.mxu0 }
 0xcc1   : > { %1363 = vst.msk [vmem:[%s408_s29] sm:$0xff] %vm423_vm0, %v1362_v43  ;;  %v1364_v0 = vpack.c.bf16 %v1362_v43, %v1362_v43 }
 0xcc2   : > { %v1742_v2 = vpop.f32.mrf.mxu0 }
 0xcc3   : > { %1752 = vmatmul.mubr.msk.bf16.vlgmr.msra.gmra.mxu1 %vm423_vm0, %v1364_v0 }
 0xd83   : > { %v1418_v38 = vpop.f32.mrf.mxu1 }
 0xd84   : > { %v1424_v62 = vpack.c.bf16 %v1418_v38, %v1418_v38 }
 0xd85   : > { %v1753_v63 = vpop.f32.mrf.mxu1 }
 0xd86   : > { %1426 = vst.msk [vmem:[%s412_s14] sm:$0xf] %vm1425_vm6, %v1424_v62 }
 0xd87   : > { %v1421_v39 = vpop.f32.mrf.mxu1 }
 0xd89   : > { %v1754_v40 = vpop.f32.mrf.mxu1 }
 0xd8a PF: > { %s22_s17 = sadd.s32 1, %s1807_s17  }
 0xd8b   : > { %p19_p4 = scmp.ge.s32.totalorder %s22_s17, 4  }
 0xd8d   :  { %21 = sbr.rel (!%p19_p4) target bundleno = 1 (0x1), region = 105 }

// kernel: graph_attention_forward.5
= control target key start
LH: loop header
LB: loop body
LE: loop exit
PB: predicated region body
PF: predicated region fallthrough
CT: control target
= control target key end

     0   :  { %s2547_s21 = smov 0   ;;  %s3016_s0 = inlined_call_operand.vmem [shape: bf16[2,64,72], index: 0, kind: input, shape index: {}]   ;;  %s3017_s1 = inlined_call_operand.vmem [shape: f32[2,8,32], index: 1, kind: input, shape index: {}]   ;;  %s3018_s2 = inlined_call_operand.vmem [shape: bf16[72,32], index: 2, kind: input, shape index: {}]   ;;  %s3019_s3 = inlined_call_operand.vmem [shape: f32[1,32], index: 3, kind: input, shape index: {}]   ;;  %s3020_s4 = inlined_call_operand.vmem [shape: bf16[32,32], index: 4, kind: input, shape index: {}]   ;;  %s3021_s5 = inlined_call_operand.vmem [shape: f32[1,32], index: 5, kind: input, shape index: {}]   ;;  %s3022_s6 = inlined_call_operand.vmem [shape: f32[1,32], index: 6, kind: input, shape index: {}]   ;;  %s3023_s7 = inlined_call_operand.vmem [shape: f32[1,32], index: 7, kind: input, shape index: {}]   ;;  %s3024_s8 = inlined_call_operand.vmem [shape: bf16[32,64], index: 8, kind: input, shape index: {}]   ;;  %s3025_s9 = inlined_call_operand.vmem [shape: f32[1,64], index: 9, kind: input, shape index: {}]   ;;  %s3026_s10 = inlined_call_operand.vmem [shape: bf16[32,32], index: 10, kind: input, shape index: {}]   ;;  %s3027_s11 = inlined_call_operand.vmem [shape: f32[1,32], index: 11, kind: input, shape index: {}]   ;;  %s3028_s12 = inlined_call_operand.vmem [shape: f32[2,64,32], index: 12, kind: output, shape index: {0}]   ;;  %s3029_s13 = inlined_call_operand.vmem [shape: bf16[2,8,32], index: 13, kind: output, shape index: {1}]   ;;  %s3030_s14 = inlined_call_operand.vmem [shape: f32[2,64,32], index: 14, kind: output, shape index: {2}]   ;;  %s3031_s15 = inlined_call_operand.vmem [shape: f32[2,64,32], index: 15, kind: output, shape index: {3}]   ;;  %s3032_s16 = inlined_call_operand.vmem [shape: f32[2,64,64], index: 16, kind: output, shape index: {4}]  }
   0x1   :  { %3033 = sst [smem:[#allocation2_spill]] %s3016_s0 }
   0x2 LB: > { %s2127_s22 = sadd.s32 4294967295, %s2451_s21   ;;  %p2131_p0 = scmp.ge.s32.totalorder %s2451_s21, 1  ;;  %s2451_s21 = sphi %s2547_s21, %s27_s21  }
   0x3   : > { %p480_p1 = scmp.lt.s32.totalorder %s2451_s21, 3 }
   0x5   : > { %p481_p2 = pnand %p2131_p0, %p480_p1 }
   0x6   : > { %p553_p3 = scmp.lt.s32.totalorder (!%p481_p2), %s2127_s22, 1  ;;  %s3034_s19 = sld [smem:[#allocation2_spill]] (!%p481_p2) }
   0x7   : > { %484 = sbr.rel (%p481_p2) target bundleno = 1927 (0x787), region = 68  ;;  %s2455_s26 = smov (!%p481_p2), 120  }
   0x8   : > { %s2456_s28 = smov (!%p481_p2), 112   ;;  %s2457_s29 = smov (!%p481_p2), 104  }
   0x9   : > { %s2459_s18 = smov (!%p481_p2), 16   ;;  %s2460_s23 = smov (!%p481_p2), 24  }
   0xc   : > { %v2394_v0 = vld [vmem:[%s3018_s2 + $0x20] ss:$0 sps:$4 sm:$0xff]   ;;  %vm671_vm0 = vcmask 1043456   ;;  %v2395_v1 = vld [vmem:[%s3018_s2 + $0x18] sm:$0xff]   ;;  %v2396_v3 = vld [vmem:[%s3018_s2 + $0x10] sm:$0xff]   ;;  %s3036_s22 = smov (!%p553_p3, %s2127_s22), 1 }
   0xd   : > { %2367 = vmatprep.subr.msk.bf16.mxu0 %vm671_vm0, %v2394_v0  ;;  %v673_v2 = vsel %vm671_vm0, %v2394_v0, 0  ;;  %v2397_v4 = vld [vmem:[%s3018_s2 + $0x8] sm:$0xff]   ;;  %s2201_s0 = sshll.u32 %s3036_s22, 5  ;;  %vm658_vm1 = vcmask 588800   ;;  %v2398_v6 = vld [vmem:[%s3018_s2] sm:$0xff]   ;;  %s2632_s27 = sshll.u32 %s3036_s22, 6 }
   0xe   : > { %2260 = vmatpush3.bf16.msra.mxu0 %v673_v2  ;;  %s557_s20 = scalar_lea.vmem %s3034_s19, %s2201_s0  ;;  %v2144_v10 = vld [vmem:[%s3019_s3] ss:$0 sm:$0xff]  ;;  %s2639_s30 = scalar_lea.vmem %s3028_s12, %s2632_s27  ;;  %vm812_vm2 = vcmask 261120   ;;  %vm2454_vm3 = vmmov 0   ;;  %vm1155_vm4 = vcmask 64512   ;;  %vm1646_vm5 = vcmask 130048  }
   0xf   : > { %2261 = vmatprep.subr.bf16.mxu0 %v2395_v1  ;;  %v2399_v5 = vld [vmem:[%s557_s20] sm:$0xff]   ;;  %v2400_v7 = vld [vmem:[%s557_s20 + $0x8] sm:$0xff]   ;;  %v2401_v8 = vld [vmem:[%s557_s20 + $0x10] sm:$0xff]   ;;  %s2134_s0 = sshll.u32 %s3036_s22, 3  ;;  %vm1655_vm6 = vcmask 195584   ;;  %s580_s17 = scalar_lea.vmem %s3031_s15, %s2632_s27  ;;  %vm1149_vm7 = vcmask 257024  }
  0x10   : > { %2269 = vmatprep.mubr.msk.bf16.mxu0 %vm658_vm1, %v2399_v5  ;;  %v2402_v9 = vld [vmem:[%s557_s20 + $0x18] sm:$0xff]   ;;  %s561_s19 = scalar_lea.vmem %s3017_s1, %s2134_s0  ;;  %vm1921_vm8 = vcmask 523264  }
  0x12   : > { %2262 = vmatpush3.bf16.msra.mxu0 %v2395_v1 }
  0x13   : > { %2263 = vmatprep.subr.bf16.mxu0 %v2396_v3 }
  0x16   : > { %2264 = vmatpush3.bf16.msra.mxu0 %v2396_v3 }
  0x17   : > { %2265 = vmatprep.subr.bf16.mxu0 %v2397_v4 }
  0x1a   : > { %2266 = vmatpush3.bf16.msra.mxu0 %v2397_v4 }
  0x1b   : > { %2267 = vmatprep.subr.bf16.mxu0 %v2398_v6 }
  0x1e   : > { %2268 = vmatpush3.bf16.msra.mxu0 %v2398_v6 }
  0x21   : > { %2270 = vmatmul.mubr.msk.bf16.vlgmr.msra.gmra.mxu0 %vm658_vm1, %v2400_v7 }
  0x22   : > { %2273 = vmatprep.mubr.msk.bf16.mxu0 %vm658_vm1, %v2401_v8 }
  0x29   : > { %2274 = vmatmul.mubr.msk.bf16.gmra.mxu0 %vm658_vm1, %v2402_v9 }
  0xe1   : > { %v2271_v11 = vpop.f32.mrf.mxu0 }
  0xe2   : > { %v2583_v12 = vadd.f32 %v2271_v11, %v2144_v10 }
  0xe3   : > { %v709_v13 = vpop.f32.mrf.mxu0 }
  0xe4   : > { %v750_v14 = vmul.f32 0.044715, %v2583_v12  ;;  %v2586_v15 = vadd.f32 %v2144_v10, %v709_v13  ;;  %v742_v4 = vmul.f32 0.5, %v2583_v12 }
  0xe5   : > { %v2272_v16 = vpop.f32.mrf.mxu0 }
  0xe6   : > { %v758_v17 = vmul.f32 %v750_v14, %v2583_v12  ;;  %v748_v18 = vmul.f32 0.044715, %v2586_v15  ;;  %v2590_v19 = vadd.f32 %v2272_v16, %v2144_v10  ;;  %v740_v8 = vmul.f32 0.5, %v2586_v15 }
  0xe7   : > { %v712_v20 = vpop.f32.mrf.mxu0 }
  0xe8   : > { %v756_v21 = vmul.f32 %v748_v18, %v2586_v15  ;;  %v751_v22 = vmul.f32 0.044715, %v2590_v19  ;;  %v2594_v23 = vadd.f32 %v2144_v10, %v712_v20  ;;  %v766_v24 = vmul.f32 %v758_v17, %v2583_v12 }
  0xe9   : > { %v2275_v25 = vpop.f32.mrf.mxu0  ;;  %v743_v13 = vmul.f32 0.5, %v2590_v19 }
  0xea   : > { %v759_v26 = vmul.f32 %v751_v22, %v2590_v19  ;;  %v749_v27 = vmul.f32 0.044715, %v2594_v23  ;;  %v2599_v28 = vadd.f32 %v2275_v25, %v2144_v10  ;;  %v774_v29 = vadd.f32 %v766_v24, %v2583_v12 }
  0xeb   : > { %v725_v30 = vpop.f32.mrf.mxu0  ;;  %v764_v31 = vmul.f32 %v756_v21, %v2586_v15  ;;  %v741_v18 = vmul.f32 0.5, %v2594_v23 }
  0xec   : > { %v767_v32 = vmul.f32 %v759_v26, %v2590_v19  ;;  %v757_v33 = vmul.f32 %v749_v27, %v2594_v23  ;;  %v754_v34 = vmul.f32 0.044715, %v2599_v28  ;;  %v2606_v35 = vadd.f32 %v2144_v10, %v725_v30 }
  0xed   : > { %v2276_v36 = vpop.f32.mrf.mxu0  ;;  %v782_v37 = vmul.f32 0.7978846, %v774_v29  ;;  %v772_v38 = vadd.f32 %v764_v31, %v2586_v15  ;;  %v746_v25 = vmul.f32 0.5, %v2599_v28 }
  0xee   : > { %v765_v39 = vmul.f32 %v757_v33, %v2594_v23  ;;  %v762_v40 = vmul.f32 %v754_v34, %v2599_v28  ;;  %v752_v41 = vmul.f32 0.044715, %v2606_v35  ;;  %v2612_v42 = vadd.f32 %v2276_v36, %v2144_v10 }
  0xef   : > { %v728_v43 = vpop.f32.mrf.mxu0  ;;  %2409 = vtanh.f32 %v782_v37  ;;  %v780_v44 = vmul.f32 0.7978846, %v772_v38  ;;  %v775_v45 = vadd.f32 %v767_v32, %v2590_v19 }
  0xf0   : > { %v770_v46 = vmul.f32 %v762_v40, %v2599_v28  ;;  %v760_v47 = vmul.f32 %v752_v41, %v2606_v35  ;;  %v755_v48 = vmul.f32 0.044715, %v2612_v42  ;;  %v2618_v49 = vadd.f32 %v2144_v10, %v728_v43  ;;  %v1045_v41 = vld [vmem:[%s561_s19] sm:$0xff]  ;;  %s2137_s19 = sshll.u32 %s3036_s22, 2 }
  0xf1   : > { %2411 = vtanh.f32 %v780_v44  ;;  %v783_v50 = vmul.f32 0.7978846, %v775_v45  ;;  %v773_v51 = vadd.f32 %v765_v39, %v2594_v23  ;;  %v744_v23 = vmul.f32 0.5, %v2606_v35  ;;  %s570_s24 = scalar_lea.vmem %s3029_s13, %s2137_s19 }
  0xf2   : > { %v768_v52 = vmul.f32 %v760_v47, %v2606_v35  ;;  %v763_v53 = vmul.f32 %v755_v48, %v2612_v42  ;;  %v753_v54 = vmul.f32 0.044715, %v2618_v49  ;;  %v778_v56 = vadd.f32 %v770_v46, %v2599_v28 }
  0xf3   : > { %2413 = vtanh.f32 %v783_v50  ;;  %v781_v55 = vmul.f32 0.7978846, %v773_v51  ;;  %v747_v28 = vmul.f32 0.5, %v2612_v42  ;;  %v745_v36 = vmul.f32 0.5, %v2618_v49 }
  0xf4   : > { %v771_v57 = vmul.f32 %v763_v53, %v2612_v42  ;;  %v761_v58 = vmul.f32 %v753_v54, %v2618_v49  ;;  %v776_v59 = vadd.f32 %v768_v52, %v2606_v35  ;;  %v786_v60 = vmul.f32 0.7978846, %v778_v56 }
  0xf5   : > { %2415 = vtanh.f32 %v781_v55  ;;  %v1046_v43 = vsel %vm812_vm2, %v1045_v41, 0.0 }
  0xf6   : > { %v769_v61 = vmul.f32 %v761_v58, %v2618_v49  ;;  %v784_v62 = vmul.f32 0.7978846, %v776_v59  ;;  %v779_v63 = vadd.f32 %v771_v57, %v2612_v42  ;;  %2417 = vtanh.f32 %v786_v60 }
  0xf8   : > { %2419 = vtanh.f32 %v784_v62  ;;  %v777_v0 = vadd.f32 %v769_v61, %v2618_v49  ;;  %v787_v1 = vmul.f32 0.7978846, %v779_v63 }
  0xfa   : > { %v785_v2 = vmul.f32 0.7978846, %v777_v0  ;;  %2421 = vtanh.f32 %v787_v1 }
  0xfc   : > { %v2410_v3 = vpop.eup %2409  ;;  %2423 = vtanh.f32 %v785_v2 }
  0xfd   : > { %v798_v5 = vadd.f32 1.0, %v2410_v3 }
  0xfe   : > { %v2412_v6 = vpop.eup %2411 }
  0xff   : > { %v2641_v7 = vmul.f32 %v798_v5, %v742_v4  ;;  %v796_v9 = vadd.f32 1.0, %v2412_v6 }
 0x100   : > { %v2414_v10 = vpop.eup %2413 }
 0x101   : > { %v827_v11 = vsel %vm812_vm2, %v2641_v7, 0.0  ;;  %815 = vst.msk [vmem:[%s2639_s30 + $0x10] sm:$0xff] %vm812_vm2, %v2641_v7  ;;  %v2649_v12 = vmul.f32 %v796_v9, %v740_v8  ;;  %v799_v14 = vadd.f32 1.0, %v2414_v10 }
 0x102   : > { %v2416_v16 = vpop.eup %2415  ;;  %828 = vadd.xlane.f32.xlu1 %v827_v11 }
 0x103   : > { %v821_v17 = vsel %vm812_vm2, %v2649_v12, 0.0  ;;  %813 = vst.msk [vmem:[%s2639_s30] sm:$0xff] %vm812_vm2, %v2649_v12  ;;  %v2657_v15 = vmul.f32 %v799_v14, %v743_v13  ;;  %v797_v20 = vadd.f32 1.0, %v2416_v16  ;;  %v2418_v21 = vpop.eup %2417 }
 0x104   : > { %822 = vadd.xlane.f32.xlu0 %v821_v17  ;;  %v802_v26 = vadd.f32 1.0, %v2418_v21 }
 0x105   : > { %v2420_v22 = vpop.eup %2419  ;;  %v830_v19 = vsel %vm812_vm2, %v2657_v15, 0.0  ;;  %816 = vst.msk [vmem:[%s2639_s30 + $0x18] sm:$0xff] %vm812_vm2, %v2657_v15  ;;  %v2665_v24 = vmul.f32 %v797_v20, %v741_v18 }
 0x106   : > { %831 = vadd.xlane.f32.xlu1 %v830_v19  ;;  %v800_v27 = vadd.f32 1.0, %v2420_v22  ;;  %v2674_v31 = vmul.f32 %v802_v26, %v746_v25 }
 0x107   : > { %v2422_v29 = vpop.eup %2421  ;;  %814 = vst.msk [vmem:[%s2639_s30 + $0x8] sm:$0xff] %vm812_vm2, %v2665_v24  ;;  %v824_v30 = vsel %vm812_vm2, %v2665_v24, 0.0 }
 0x108   : > { %825 = vadd.xlane.f32.xlu0 %v824_v30  ;;  %v808_v32 = vmul.f32 %v800_v27, %v744_v23  ;;  %v803_v33 = vadd.f32 1.0, %v2422_v29  ;;  %819 = vst.msk [vmem:[%s2639_s30 + $0x30] sm:$0xff] %vm812_vm2, %v2674_v31  ;;  %v839_v42 = vsel %vm812_vm2, %v2674_v31, 0.0 }
 0x109   : > { %v2424_v34 = vpop.eup %2423 }
 0x10a   : > { %817 = vst.msk [vmem:[%s2639_s30 + $0x20] sm:$0xff] %vm812_vm2, %v808_v32  ;;  %v833_v35 = vsel %vm812_vm2, %v808_v32, 0.0  ;;  %v801_v37 = vadd.f32 1.0, %v2424_v34  ;;  %v811_v38 = vmul.f32 %v803_v33, %v747_v28 }
 0x10c   : > { %834 = vadd.xlane.f32.xlu0 %v833_v35  ;;  %v809_v39 = vmul.f32 %v801_v37, %v745_v36  ;;  %820 = vst.msk [vmem:[%s2639_s30 + $0x38] sm:$0xff] %vm812_vm2, %v811_v38  ;;  %v842_v44 = vsel %vm812_vm2, %v811_v38, 0.0 }
 0x10e   : > { %v836_v40 = vsel %vm812_vm2, %v809_v39, 0.0  ;;  %818 = vst.msk [vmem:[%s2639_s30 + $0x28] sm:$0xff] %vm812_vm2, %v809_v39  ;;  %s2458_s30 = smov 8  }
 0x10f   : > { %837 = vadd.xlane.f32.xlu1 %v836_v40  ;;  %v2403_v40 = vld [vmem:[%s3020_s4 + $0x8] sm:$0xff]  }
 0x110   : > { %840 = vadd.xlane.f32.xlu0 %v839_v42  ;;  %2277 = vmatprep.subr.bf16.mxu1 %v2403_v40  ;;  %v2453_v42 = vmov 0.0  }
 0x111   : > { %2278 = vmatpush3.bf16.msra.mxu1 %v2403_v40 }
 0x113   : > { %843 = vadd.xlane.f32.xlu1 %v842_v44 }
 0x114   : > { %1047 = vadd.xlane.f32.xlu0 %v1046_v43 }
 0x18b   : > { %v829_v45 = vpop.xlane.xlu1 %828 }
 0x18c   : > { %v848_v51 = vmul.f32 0.03125, %v829_v45 }
 0x18d   : > { %v823_v46 = vpop.xlane.xlu0 %822 }
 0x18e   : > { %v846_v48 = vmul.f32 0.03125, %v823_v46 }
 0x18f   : > { %v832_v50 = vpop.xlane.xlu1 %831 }
 0x190   : > { %v849_v54 = vmul.f32 0.03125, %v832_v50 }
 0x191   : > { %v826_v47 = vpop.xlane.xlu0 %825 }
 0x192   : > { %v847_v49 = vmul.f32 0.03125, %v826_v47 }
 0x194   : > { %v854_v52 = vadd.f32 %v847_v49, %v846_v48 }
 0x195   : > { %v835_v53 = vpop.xlane.xlu0 %834 }
 0x196   : > { %v855_v55 = vadd.f32 %v854_v52, %v848_v51  ;;  %v850_v57 = vmul.f32 0.03125, %v835_v53 }
 0x198   : > { %v856_v56 = vadd.f32 %v855_v55, %v849_v54  ;;  %v838_v58 = vpop.xlane.xlu1 %837 }
 0x199   : > { %v851_v59 = vmul.f32 0.03125, %v838_v58  ;;  %v841_v60 = vpop.xlane.xlu0 %840 }
 0x19a   : > { %v857_v61 = vadd.f32 %v856_v56, %v850_v57  ;;  %v852_v63 = vmul.f32 0.03125, %v841_v60 }
 0x19c   : > { %v858_v62 = vadd.f32 %v857_v61, %v851_v59  ;;  %v844_v0 = vpop.xlane.xlu1 %843 }
 0x19d   : > { %v853_v1 = vmul.f32 0.03125, %v844_v0  ;;  %v1048_v19 = vpop.xlane.xlu0 %1047 }
 0x19e   : > { %v859_v2 = vadd.f32 %v858_v62, %v852_v63  ;;  %v1049_v25 = vmul.f32 0.03125, %v1048_v19 }
 0x1a0   : > { %v860_v3 = vadd.f32 %v859_v2, %v853_v1  ;;  %v2734_v28 = vsub.f32 %v1045_v41, %v1049_v25  ;;  %v2404_v41 = vld [vmem:[%s3020_s4] sm:$0xff]  }
 0x1a1   : > { %2279 = vmatprep.subr.bf16.mxu1 %v2404_v41 }
 0x1a2   : > { %v861_v4 = vrot.slane %v860_v3, 4  ;;  %v1051_v36 = vmul.f32 %v2734_v28, %v2734_v28  ;;  %2280 = vmatpush3.bf16.msra.mxu1 %v2404_v41 }
 0x1a3   : > { %2289 = vmatprep.subr.bf16.mxu1 %v2453_v42 }
 0x1a4   : > { %v862_v5 = vadd.f32 %v861_v4, %v860_v3 }
 0x1a6   : > { %v863_v6 = vrot.slane %v862_v5, 2 }
 0x1a8   : > { %v864_v8 = vadd.f32 %v863_v6, %v862_v5 }
 0x1aa   : > { %v865_v9 = vrot.slane %v864_v8, 1 }
 0x1ac   : > { %v866_v10 = vadd.f32 %v865_v9, %v864_v8 }
 0x1ae   : > { %v868_v11 = vmul.f32 0.015625, %v866_v10 }
 0x1b0   : > { %v2698_v13 = vsub.f32 %v2665_v24, %v868_v11  ;;  %v2701_v14 = vsub.f32 %v2649_v12, %v868_v11  ;;  %v2704_v16 = vsub.f32 %v2657_v15, %v868_v11  ;;  %v2707_v17 = vsub.f32 %v2641_v7, %v868_v11 }
 0x1b1   : > { %v2713_v21 = vsub.f32 %v809_v39, %v868_v11  ;;  %v2715_v22 = vsub.f32 %v808_v32, %v868_v11  ;;  %v2723_v26 = vsub.f32 %v811_v38, %v868_v11  ;;  %v2726_v23 = vsub.f32 %v2674_v31, %v868_v11 }
 0x1b2   : > { %v878_v18 = vmul.f32 %v2698_v13, %v2698_v13  ;;  %v877_v20 = vmul.f32 %v2701_v14, %v2701_v14  ;;  %v880_v15 = vmul.f32 %v2704_v16, %v2704_v16  ;;  %v879_v7 = vmul.f32 %v2707_v17, %v2707_v17 }
 0x1b3   : > { %v882_v30 = vmul.f32 %v2713_v21, %v2713_v21  ;;  %v881_v32 = vmul.f32 %v2715_v22, %v2715_v22  ;;  %v884_v31 = vmul.f32 %v2723_v26, %v2723_v26  ;;  %v883_v35 = vmul.f32 %v2726_v23, %v2726_v23 }
 0x1b4   : > { %v888_v12 = vsel %vm812_vm2, %v878_v18, 0.0  ;;  %v885_v24 = vsel %vm812_vm2, %v877_v20, 0.0  ;;  %v894_v27 = vsel %vm812_vm2, %v880_v15, 0.0  ;;  %v891_v29 = vsel %vm812_vm2, %v879_v7, 0.0 }
 0x1b5   : > { %889 = vadd.xlane.f32.xlu0 %v888_v12  ;;  %886 = vadd.xlane.f32.xlu1 %v885_v24  ;;  %v900_v33 = vsel %vm812_vm2, %v882_v30, 0.0  ;;  %v897_v34 = vsel %vm812_vm2, %v881_v32, 0.0  ;;  %v906_v37 = vsel %vm812_vm2, %v884_v31, 0.0  ;;  %v903_v38 = vsel %vm812_vm2, %v883_v35, 0.0  ;;  %v2405_v32 = vld [vmem:[%s3024_s8 + $0x8] sm:$0xff]  }
 0x1b6   : > { %v1052_v39 = vsel %vm812_vm2, %v1051_v36, 0.0  ;;  %v2166_v35 = vld [vmem:[%s3023_s7] ss:$0 sm:$0xff] }
 0x1b9   : > { %895 = vadd.xlane.f32.xlu0 %v894_v27  ;;  %892 = vadd.xlane.f32.xlu1 %v891_v29 }
 0x1bd   : > { %901 = vadd.xlane.f32.xlu0 %v900_v33  ;;  %898 = vadd.xlane.f32.xlu1 %v897_v34 }
 0x1c1   : > { %907 = vadd.xlane.f32.xlu0 %v906_v37  ;;  %904 = vadd.xlane.f32.xlu1 %v903_v38  ;;  %v2158_v38 = vld [vmem:[%s3021_s5] ss:$0 sm:$0xff] }
 0x1c5   : > { %1053 = vadd.xlane.f32.xlu1 %v1052_v39 }
 0x23e   : > { %v887_v43 = vpop.xlane.xlu1 %886  ;;  %v890_v44 = vpop.xlane.xlu0 %889 }
 0x23f   : > { %v909_v45 = vmul.f32 0.03125, %v887_v43  ;;  %v910_v46 = vmul.f32 0.03125, %v890_v44 }
 0x241   : > { %v917_v49 = vadd.f32 %v910_v46, %v909_v45 }
 0x242   : > { %v893_v47 = vpop.xlane.xlu1 %892  ;;  %v896_v48 = vpop.xlane.xlu0 %895 }
 0x243   : > { %v911_v50 = vmul.f32 0.03125, %v893_v47  ;;  %v912_v52 = vmul.f32 0.03125, %v896_v48  ;;  %v2167_v47 = vld [vmem:[%s3025_s9] ss:$0 sm:$0xff] }
 0x245   : > { %v918_v51 = vadd.f32 %v917_v49, %v911_v50 }
 0x246   : > { %v899_v53 = vpop.xlane.xlu1 %898  ;;  %v902_v54 = vpop.xlane.xlu0 %901 }
 0x247   : > { %v919_v55 = vadd.f32 %v918_v51, %v912_v52  ;;  %v913_v56 = vmul.f32 0.03125, %v899_v53  ;;  %v914_v58 = vmul.f32 0.03125, %v902_v54 }
 0x249   : > { %v920_v57 = vadd.f32 %v919_v55, %v913_v56 }
 0x24a   : > { %v905_v59 = vpop.xlane.xlu1 %904  ;;  %v908_v60 = vpop.xlane.xlu0 %907 }
 0x24b   : > { %v921_v61 = vadd.f32 %v920_v57, %v914_v58  ;;  %v915_v62 = vmul.f32 0.03125, %v905_v59  ;;  %v916_v0 = vmul.f32 0.03125, %v908_v60 }
 0x24d   : > { %v922_v63 = vadd.f32 %v921_v61, %v915_v62 }
 0x24e   : > { %v1054_v9 = vpop.xlane.xlu1 %1053 }
 0x24f   : > { %v923_v1 = vadd.f32 %v922_v63, %v916_v0  ;;  %v1055_v11 = vmul.f32 0.03125, %v1054_v9 }
 0x251   : > { %v924_v2 = vrot.slane %v923_v1, 4  ;;  %v1056_v20 = vadd.f32 1e-05, %v1055_v11 }
 0x253   : > { %v925_v3 = vadd.f32 %v924_v2, %v923_v1 }
 0x255   : > { %v926_v4 = vrot.slane %v925_v3, 2 }
 0x257   : > { %v927_v5 = vadd.f32 %v926_v4, %v925_v3 }
 0x259   : > { %v928_v6 = vrot.slane %v927_v5, 1 }
 0x25b   : > { %v929_v8 = vadd.f32 %v928_v6, %v927_v5 }
 0x25d   : > { %v930_v10 = vmul.f32 0.015625, %v929_v8 }
 0x25f   : > { %v931_v18 = vadd.f32 1e-05, %v930_v10 }
 0x261   : > { %2425 = vrsqrt.f32 %v931_v18 }
 0x262   : > { %2427 = vrsqrt.f32 %v1056_v20 }
 0x26e   : > { %v2426_v19 = vpop.eup %2425 }
 0x26f   : > { %v933_v12 = vmul.f32 %v2426_v19, %v2701_v14  ;;  %v934_v24 = vmul.f32 %v2426_v19, %v2698_v13  ;;  %v935_v15 = vmul.f32 %v2426_v19, %v2707_v17  ;;  %v936_v7 = vmul.f32 %v2426_v19, %v2704_v16  ;;  %v2428_v33 = vpop.eup %2427  ;;  %v2406_v13 = vld [vmem:[%s3024_s8] sm:$0xff]  }
 0x270   : > { %v937_v25 = vmul.f32 %v2426_v19, %v2715_v22  ;;  %v938_v27 = vmul.f32 %v2426_v19, %v2713_v21  ;;  %v1058_v16 = vmul.f32 %v2428_v33, %v2734_v28  ;;  %v939_v17 = vmul.f32 %v2426_v19, %v2726_v23  ;;  %v2165_v22 = vld [vmem:[%s3022_s6] ss:$0 sm:$0xff] }
 0x271   : > { %v941_v29 = vpack.c.bf16 %v934_v24, %v933_v12  ;;  %v942_v30 = vpack.c.bf16 %v936_v7, %v935_v15  ;;  %v940_v21 = vmul.f32 %v2426_v19, %v2723_v26 }
 0x272   : > { %v943_v14 = vpack.c.bf16 %v938_v27, %v937_v25  ;;  %v1066_v34 = vmul.f32 %v2165_v22, %v1058_v16 }
 0x273   : > { %2281 = vmatprep.mubr.msk.bf16.mxu1 %vm812_vm2, %v941_v29  ;;  %v944_v31 = vpack.c.bf16 %v940_v21, %v939_v17 }
 0x274   : > { %2282 = vmatmul.mubr.msk.bf16.vlgmr.msra.gmra.mxu1 %vm812_vm2, %v942_v30  ;;  %v1074_v23 = vadd.f32 %v2166_v35, %v1066_v34 }
 0x275   : > { %2285 = vmatprep.mubr.msk.bf16.mxu1 %vm812_vm2, %v943_v14  ;;  %2290 = vmatpush3.bf16.msra.mxu1 %v2405_v32 }
 0x276   : > { %2291 = vmatprep.subr.bf16.mxu1 %v2453_v42  ;;  %v1075_v26 = vpack.c.bf16 %v1074_v23, %v1074_v23 }
 0x279   : > { %2292 = vmatpush3.bf16.msra.mxu1 %v2406_v13 }
 0x27c   : > { %2286 = vmatmul.mubr.msk.bf16.gmra.mxu1 %vm812_vm2, %v944_v31 }
 0x27d   : > { %2293 = vmatprep.mubr.msk.bf16.mxu1 %vm2454_vm3, %v2453_v42 }
 0x284   : > { %2294 = vmatmul.mubr.msk.bf16.vlgmr.msra.gmra.mxu1 %vm812_vm2, %v1075_v26 }
 0x334   : > { %v2283_v28 = vpop.f32.mrf.mxu1 }
 0x335   : > { %v1023_v61 = vadd.f32 %v2283_v28, %v2158_v38 }
 0x336   : > { %v1014_v36 = vpop.f32.mrf.mxu1 }
 0x337   : > { %v1015_v40 = vadd.f32 %v2158_v38, %v1014_v36 }
 0x338   : > { %v2284_v37 = vpop.f32.mrf.mxu1 }
 0x339   : > { %v1026_v59 = vadd.f32 %v2284_v37, %v2158_v38 }
 0x33a   : > { %v1017_v39 = vpop.f32.mrf.mxu1 }
 0x33b   : > { %v1018_v41 = vadd.f32 %v2158_v38, %v1017_v39  ;;  %v1152_v63 = vpack.c.bf16 %v1026_v59, %v1023_v61 }
 0x33c   : > { %v2287_v43 = vpop.f32.mrf.mxu1 }
 0x33d   : > { %v1151_v44 = vpack.c.bf16 %v1018_v41, %v1015_v40  ;;  %v1039_v60 = vadd.f32 %v2287_v43, %v2158_v38 }
 0x33e   : > { %v1030_v45 = vpop.f32.mrf.mxu1 }
 0x33f   : > { %2299 = vmatprep.mubr.msk.bf16.mxu1 %vm1155_vm4, %v1151_v44  ;;  %v1031_v48 = vadd.f32 %v2158_v38, %v1030_v45 }
 0x340   : > { %v2288_v42 = vpop.f32.mrf.mxu1 }
 0x341   : > { %v1042_v56 = vadd.f32 %v2288_v42, %v2158_v38 }
 0x342   : > { %v1033_v46 = vpop.f32.mrf.mxu1 }
 0x343   : > { %v1034_v49 = vadd.f32 %v2158_v38, %v1033_v46  ;;  %v1154_v62 = vpack.c.bf16 %v1042_v56, %v1039_v60  ;;  %v2407_v46 = vld [vmem:[%s3026_s10 + $0x8] sm:$0xff]  }
 0x344   : > { %v1136_v50 = vpop.f32.mrf.mxu1 }
 0x345   : > { %v1153_v51 = vpack.c.bf16 %v1034_v49, %v1031_v48  ;;  %v1137_v52 = vadd.f32 %v2167_v47, %v1136_v50 }
 0x346   : > { %v2295_v53 = vpop.f32.mrf.mxu1 }
 0x347   : > { %v2789_v54 = vpack.c.bf16 %v1137_v52, %v1137_v52  ;;  %1252 = vrot.lane.b32.xlu1 %v1153_v51, %s2455_s26 }
 0x348   : > { %v1139_v55 = vpop.f32.mrf.mxu1 }
 0x349   : > { %1256 = vrot.lane.b32.xlu0 %v2789_v54, %s2455_s26  ;;  %2368 = vmatprep.subr.msk.bf16.mxu1 %vm1155_vm4, %v2789_v54  ;;  %v1169_v57 = vsel %vm1155_vm4, %v2789_v54, 0 }
 0x34a   : > { %v2296_v58 = vpop.f32.mrf.mxu1  ;;  %2298 = vmatpush3.bf16.xpose.msra.mxu1 %v1169_v57 }
 0x34b   : > { %1248 = vrot.lane.b32.xlu1 %v1151_v44, %s2455_s26 }
 0x34d   : > { %1354 = vrot.lane.b32.xlu0 %v2789_v54, %s2456_s28 }
 0x34f   : > { %1254 = vrot.lane.b32.xlu1 %v1154_v62, %s2455_s26 }
 0x351   : > { %1452 = vrot.lane.b32.xlu0 %v2789_v54, %s2457_s29  ;;  %2300 = vmatmul.mubr.msk.bf16.vlgmr.msra.gmra.mxu1 %vm1155_vm4, %v1152_v63 }
 0x352   : > { %2303 = vmatprep.mubr.msk.bf16.mxu1 %vm1155_vm4, %v1153_v51 }
 0x353   : > { %1250 = vrot.lane.b32.xlu1 %v1152_v63, %s2455_s26  ;;  %s2866_s26 = scalar_lea.vmem %s3030_s14, %s2632_s27 }
 0x355   : > { %1348 = vrot.lane.b32.xlu0 %v1152_v63, %s2456_s28 }
 0x357   : > { %1346 = vrot.lane.b32.xlu1 %v1151_v44, %s2456_s28 }
 0x359   : > { %1446 = vrot.lane.b32.xlu0 %v1152_v63, %s2457_s29  ;;  %2304 = vmatmul.mubr.msk.bf16.gmra.mxu1 %vm1155_vm4, %v1154_v62 }
 0x35b   : > { %1444 = vrot.lane.b32.xlu1 %v1151_v44, %s2457_s29 }
 0x35d   : > { %1352 = vrot.lane.b32.xlu0 %v1154_v62, %s2456_s28 }
 0x35f   : > { %1350 = vrot.lane.b32.xlu1 %v1153_v51, %s2456_s28 }
 0x361   : > { %1450 = vrot.lane.b32.xlu0 %v1154_v62, %s2457_s29 }
 0x363   : > { %1448 = vrot.lane.b32.xlu1 %v1153_v51, %s2457_s29  ;;  %v2408_v51 = vld [vmem:[%s3026_s10] sm:$0xff]  }
 0x3b9   : > { %v1253_v0 = vpop.permute.xlu1 %1252 }
 0x3ba   : > { %2313 = vmatprep.mubr.msk.bf16.mxu1 %vm1155_vm4, %v1253_v0 }
 0x3bb   : > { %v1257_v1 = vpop.permute.xlu0 %1256 }
 0x3bc   : > { %2369 = vmatprep.subr.msk.bf16.mxu0 %vm1155_vm4, %v1257_v1  ;;  %2370 = vmatprep.subr.msk.bf16.mxu1 %vm1155_vm4, %v1257_v1  ;;  %v1271_v2 = vsel %vm1155_vm4, %v1257_v1, 0 }
 0x3bd   : > { %2308 = vmatpush3.bf16.xpose.msra.mxu0 %v1271_v2  ;;  %v1249_v3 = vpop.permute.xlu1 %1248  ;;  %2366 = vmatpush3.bf16.xpose.msra.mxu1 %v1271_v2 }
 0x3be   : > { %2309 = vmatprep.mubr.msk.bf16.mxu0 %vm1155_vm4, %v1249_v3 }
 0x3bf   : > { %v1355_v4 = vpop.permute.xlu0 %1354 }
 0x3c0   : > { %2371 = vmatprep.subr.msk.bf16.mxu1 %vm1155_vm4, %v1355_v4  ;;  %v1369_v8 = vsel %vm1155_vm4, %v1355_v4, 0 }
 0x3c1   : > { %v1255_v5 = vpop.permute.xlu1 %1254 }
 0x3c3   : > { %v1453_v6 = vpop.permute.xlu0 %1452 }
 0x3c4   : > { %v1467_v9 = vsel %vm1155_vm4, %v1453_v6, 0  ;;  %2314 = vmatmul.mubr.msk.bf16.vlgmr.msra.gmra.mxu1 %vm1155_vm4, %v1255_v5  ;;  %2372 = vmatprep.subr.msk.bf16.mxu0 %vm1155_vm4, %v1453_v6 }
 0x3c5   : > { %v1251_v10 = vpop.permute.xlu1 %1250  ;;  %2318 = vmatpush3.bf16.xpose.msra.mxu1 %v1369_v8 }
 0x3c6   : > { %2310 = vmatmul.mubr.msk.bf16.vlgmr.msra.gmra.mxu0 %vm1155_vm4, %v1251_v10  ;;  %2337 = vmatprep.subr.bf16.mxu1 %v2407_v46 }
 0x3c7   : > { %2328 = vmatpush3.bf16.xpose.msra.mxu0 %v1467_v9  ;;  %v1349_v11 = vpop.permute.xlu0 %1348 }
 0x3c9   : > { %v1347_v18 = vpop.permute.xlu1 %1346 }
 0x3ca   : > { %2319 = vmatprep.mubr.msk.bf16.mxu1 %vm1155_vm4, %v1347_v18 }
 0x3cb   : > { %v1447_v20 = vpop.permute.xlu0 %1446 }
 0x3cc   : > { %2320 = vmatmul.mubr.msk.bf16.vlgmr.msra.gmra.mxu1 %vm1155_vm4, %v1349_v11 }
 0x3cd   : > { %v1445_v19 = vpop.permute.xlu1 %1444  ;;  %2338 = vmatpush3.bf16.msra.mxu1 %v2407_v46 }
 0x3ce   : > { %2329 = vmatprep.mubr.msk.bf16.mxu0 %vm1155_vm4, %v1445_v19  ;;  %2339 = vmatprep.subr.bf16.mxu1 %v2408_v51 }
 0x3cf   : > { %2330 = vmatmul.mubr.msk.bf16.vlgmr.msra.gmra.mxu0 %vm1155_vm4, %v1447_v20  ;;  %v1353_v12 = vpop.permute.xlu0 %1352 }
 0x3d1   : > { %v1351_v24 = vpop.permute.xlu1 %1350  ;;  %2340 = vmatpush3.bf16.msra.mxu1 %v2408_v51 }
 0x3d2   : > { %2323 = vmatprep.mubr.msk.bf16.mxu1 %vm1155_vm4, %v1351_v24 }
 0x3d3   : > { %v1451_v7 = vpop.permute.xlu0 %1450 }
 0x3d4   : > { %2324 = vmatmul.mubr.msk.bf16.gmra.mxu1 %vm1155_vm4, %v1353_v12 }
 0x3d5   : > { %v1449_v15 = vpop.permute.xlu1 %1448 }
 0x3d6   : > { %2333 = vmatprep.mubr.msk.bf16.mxu0 %vm1155_vm4, %v1449_v15 }
 0x3d7   : > { %2334 = vmatmul.mubr.msk.bf16.gmra.mxu0 %vm1155_vm4, %v1451_v7 }
 0x411   : > { %v2820_v25 = vpop.f32.mrf.mxu1 }
 0x413   : > { %v2822_v27 = vpop.f32.mrf.mxu1 }
 0x415   : > { %v2824_v29 = vpop.f32.mrf.mxu1 }
 0x417   : > { %v2826_v30 = vpop.f32.mrf.mxu1 }
 0x418   : > { %v1237_v46 = vmul.f32 0.35355338, %v2826_v30 }
 0x419   : > { %v2828_v32 = vpop.f32.mrf.mxu1 }
 0x41b   : > { %v2830_v33 = vpop.f32.mrf.mxu1 }
 0x41d   : > { %v2832_v14 = vpop.f32.mrf.mxu1 }
 0x41f   : > { %v2834_v13 = vpop.f32.mrf.mxu1 }
 0x484   : > { %v2315_v16 = vpop.f32.mrf.mxu1 }
 0x485   : > { %v1344_v23 = vmul.f32 0.35355338, %v2315_v16 }
 0x486   : > { %v2311_v17 = vpop.f32.mrf.mxu0  ;;  %v1323_v21 = vpop.f32.mrf.mxu1 }
 0x487   : > { %v1340_v22 = vmul.f32 0.35355338, %v2311_v17  ;;  %v1342_v40 = vmul.f32 0.35355338, %v1323_v21 }
 0x488   : > { %v1307_v34 = vpop.f32.mrf.mxu0  ;;  %v2316_v31 = vpop.f32.mrf.mxu1 }
 0x489   : > { %1554 = vrot.lane.b32.xlu1 %v1340_v22, %s2458_s30  ;;  %v1338_v36 = vmul.f32 0.35355338, %v1307_v34  ;;  %v1345_v37 = vmul.f32 0.35355338, %v2316_v31  ;;  %v1238_v34 = vmul.f32 0.35355338, %v2820_v25 }
 0x48a   : > { %v2312_v35 = vpop.f32.mrf.mxu0  ;;  %v1326_v28 = vpop.f32.mrf.mxu1 }
 0x48b   : > { %v1341_v26 = vmul.f32 0.35355338, %v2312_v35  ;;  %v1343_v45 = vmul.f32 0.35355338, %v1326_v28  ;;  %v1239_v28 = vmul.f32 0.35355338, %v2824_v29 }
 0x48c   : > { %v1310_v38 = vpop.f32.mrf.mxu0  ;;  %v2321_v39 = vpop.f32.mrf.mxu1 }
 0x48d   : > { %1556 = vrot.lane.b32.xlu0 %v1341_v26, %s2458_s30  ;;  %1562 = vrot.lane.b32.xlu1 %v1344_v23, %s2458_s30  ;;  %v1339_v41 = vmul.f32 0.35355338, %v1310_v38  ;;  %v1438_v42 = vmul.f32 0.35355338, %v2321_v39 }
 0x48e   : > { %v1405_v43 = vpop.f32.mrf.mxu1 }
 0x48f   : > { %v2331_v44 = vpop.f32.mrf.mxu0  ;;  %v1436_v55 = vmul.f32 0.35355338, %v1405_v43 }
 0x490   : > { %v2322_v47 = vpop.f32.mrf.mxu1  ;;  %v1536_v49 = vmul.f32 0.35355338, %v2331_v44 }
 0x491   : > { %1550 = vrot.lane.b32.xlu1 %v1338_v36, %s2458_s30  ;;  %1564 = vrot.lane.b32.xlu0 %v1345_v37, %s2458_s30  ;;  %v1503_v48 = vpop.f32.mrf.mxu0  ;;  %v1439_v50 = vmul.f32 0.35355338, %v2322_v47 }
 0x492   : > { %v1408_v52 = vpop.f32.mrf.mxu1  ;;  %v1534_v59 = vmul.f32 0.35355338, %v1503_v48 }
 0x493   : > { %v2332_v53 = vpop.f32.mrf.mxu0  ;;  %v1437_v60 = vmul.f32 0.35355338, %v1408_v52 }
 0x494   : > { %v1537_v56 = vmul.f32 0.35355338, %v2332_v53  ;;  %v2325_v57 = vpop.f32.mrf.mxu1 }
 0x495   : > { %1558 = vrot.lane.b32.xlu1 %v1342_v40, %s2458_s30  ;;  %1552 = vrot.lane.b32.xlu0 %v1339_v41, %s2458_s30  ;;  %v1506_v58 = vpop.f32.mrf.mxu0  ;;  %v1442_v63 = vmul.f32 0.35355338, %v2325_v57  ;;  %v1236_v40 = vmul.f32 0.35355338, %v2822_v27 }
 0x496   : > { %v1421_v61 = vpop.f32.mrf.mxu1  ;;  %v1535_v0 = vmul.f32 0.35355338, %v1506_v58 }
 0x497   : > { %v2335_v62 = vpop.f32.mrf.mxu0  ;;  %v1440_v3 = vmul.f32 0.35355338, %v1421_v61  ;;  %v1241_v61 = vmul.f32 0.35355338, %v2834_v13 }
 0x498   : > { %v2326_v1 = vpop.f32.mrf.mxu1  ;;  %v1540_v11 = vmul.f32 0.35355338, %v2335_v62 }
 0x499   : > { %1586 = vrot.lane.b32.xlu1 %v1438_v42, %s2459_s18  ;;  %1560 = vrot.lane.b32.xlu0 %v1343_v45, %s2458_s30  ;;  %v1519_v2 = vpop.f32.mrf.mxu0  ;;  %v1443_v4 = vmul.f32 0.35355338, %v2326_v1 }
 0x49a   : > { %v1424_v5 = vpop.f32.mrf.mxu1  ;;  %v1538_v8 = vmul.f32 0.35355338, %v1519_v2 }
 0x49b   : > { %v2336_v6 = vpop.f32.mrf.mxu0  ;;  %v1441_v9 = vmul.f32 0.35355338, %v1424_v5 }
 0x49c   : > { %v1541_v20 = vmul.f32 0.35355338, %v2336_v6 }
 0x49d   : > { %1618 = vrot.lane.b32.xlu1 %v1536_v49, %s2460_s23  ;;  %1588 = vrot.lane.b32.xlu0 %v1439_v50, %s2459_s18  ;;  %v1522_v10 = vpop.f32.mrf.mxu0 }
 0x49e   : > { %v1539_v18 = vmul.f32 0.35355338, %v1522_v10 }
 0x4a1   : > { %1582 = vrot.lane.b32.xlu1 %v1436_v55, %s2459_s18  ;;  %1620 = vrot.lane.b32.xlu0 %v1537_v56, %s2460_s23  ;;  %v1240_v55 = vmul.f32 0.35355338, %v2830_v33 }
 0x4a5   : > { %1614 = vrot.lane.b32.xlu1 %v1534_v59, %s2460_s23  ;;  %1584 = vrot.lane.b32.xlu0 %v1437_v60, %s2459_s18  ;;  %v1242_v60 = vmul.f32 0.35355338, %v2828_v32  ;;  %v1243_v32 = vmul.f32 0.35355338, %v2832_v14 }
 0x4a9   : > { %1594 = vrot.lane.b32.xlu1 %v1442_v63, %s2459_s18  ;;  %1616 = vrot.lane.b32.xlu0 %v1535_v0, %s2460_s23 }
 0x4ad   : > { %1590 = vrot.lane.b32.xlu1 %v1440_v3, %s2459_s18  ;;  %1596 = vrot.lane.b32.xlu0 %v1443_v4, %s2459_s18 }
 0x4b1   : > { %1622 = vrot.lane.b32.xlu1 %v1538_v8, %s2460_s23  ;;  %1592 = vrot.lane.b32.xlu0 %v1441_v9, %s2459_s18  ;;  %s2461_s18 = smov 96  }
 0x4b5   : > { %1626 = vrot.lane.b32.xlu1 %v1540_v11, %s2460_s23  ;;  %1624 = vrot.lane.b32.xlu0 %v1539_v18, %s2460_s23  ;;  %v2188_v11 = vld [vmem:[%s3027_s11] ss:$0 sm:$0xff] }
 0x4b9   : > { %1628 = vrot.lane.b32.xlu0 %v1541_v20, %s2460_s23 }
 0x4fb   : > { %v1555_v19 = vpop.permute.xlu1 %1554 }
 0x4fc   : > { %v1640_v31 = vsel %vm1155_vm4, %v1238_v34, %v1555_v19 }
 0x4ff   : > { %v1557_v12 = vpop.permute.xlu0 %1556  ;;  %v1563_v24 = vpop.permute.xlu1 %1562 }
 0x500   : > { %v1641_v25 = vsel %vm1155_vm4, %v1239_v28, %v1557_v12  ;;  %v1644_v33 = vsel %vm1155_vm4, %v1242_v60, %v1563_v24 }
 0x503   : > { %v1551_v15 = vpop.permute.xlu1 %1550  ;;  %v2858_v7 = vpop.permute.xlu0 %1564 }
 0x504   : > { %v1638_v29 = vsel %vm1155_vm4, %v1236_v40, %v1551_v15  ;;  %v1645_v6 = vsel %vm1155_vm4, %v1243_v32, %v2858_v7 }
 0x507   : > { %v1559_v16 = vpop.permute.xlu1 %1558  ;;  %v1553_v17 = vpop.permute.xlu0 %1552 }
 0x508   : > { %v1639_v27 = vsel %vm1155_vm4, %v1237_v46, %v1553_v17  ;;  %v1642_v56 = vsel %vm1155_vm4, %v1240_v55, %v1559_v16 }
 0x50b   : > { %v1587_v21 = vpop.permute.xlu1 %1586  ;;  %v1561_v22 = vpop.permute.xlu0 %1560 }
 0x50c   : > { %v1649_v35 = vsel %vm1646_vm5, %v1640_v31, %v1587_v21  ;;  %v1643_v63 = vsel %vm1155_vm4, %v1241_v61, %v1561_v22 }
 0x50f   : > { %v1619_v23 = vpop.permute.xlu1 %1618  ;;  %v1589_v26 = vpop.permute.xlu0 %1588 }
 0x510   : > { %v1658_v36 = vsel %vm1655_vm6, %v1649_v35, %v1619_v23  ;;  %v1650_v37 = vsel %vm1646_vm5, %v1641_v25, %v1589_v26 }
 0x511   : > { %1666 = vst.msk [vmem:[%s2866_s26 + $0x10] sm:$0xff] %vm812_vm2, %v1658_v36 }
 0x513   : > { %v1583_v38 = vpop.permute.xlu1 %1582  ;;  %v1621_v39 = vpop.permute.xlu0 %1620 }
 0x514   : > { %v1659_v41 = vsel %vm1655_vm6, %v1650_v37, %v1621_v39  ;;  %v1647_v44 = vsel %vm1646_vm5, %v1638_v29, %v1583_v38 }
 0x515   : > { %1667 = vst.msk [vmem:[%s2866_s26 + $0x18] sm:$0xff] %vm812_vm2, %v1659_v41  ;;  %v1673_v43 = vpack.c.bf16 %v1659_v41, %v1658_v36 }
 0x517   : > { %v1615_v45 = vpop.permute.xlu1 %1614  ;;  %v1585_v42 = vpop.permute.xlu0 %1584 }
 0x518   : > { %v1656_v47 = vsel %vm1655_vm6, %v1647_v44, %v1615_v45  ;;  %v1648_v48 = vsel %vm1646_vm5, %v1639_v27, %v1585_v42 }
 0x519   : > { %1664 = vst.msk [vmem:[%s2866_s26] sm:$0xff] %vm812_vm2, %v1656_v47 }
 0x51b   : > { %v1595_v49 = vpop.permute.xlu1 %1594  ;;  %v1617_v50 = vpop.permute.xlu0 %1616 }
 0x51c   : > { %v1657_v51 = vsel %vm1655_vm6, %v1648_v48, %v1617_v50  ;;  %v1653_v0 = vsel %vm1646_vm5, %v1644_v33, %v1595_v49 }
 0x51d   : > { %1665 = vst.msk [vmem:[%s2866_s26 + $0x8] sm:$0xff] %vm812_vm2, %v1657_v51  ;;  %v1672_v52 = vpack.c.bf16 %v1657_v51, %v1656_v47 }
 0x51f   : > { %v1591_v53 = vpop.permute.xlu1 %1590  ;;  %2341 = vmatprep.mubr.msk.bf16.mxu1 %vm812_vm2, %v1672_v52  ;;  %v1597_v30 = vpop.permute.xlu0 %1596 }
 0x520   : > { %2342 = vmatmul.mubr.msk.bf16.vlgmr.msra.gmra.mxu1 %vm812_vm2, %v1673_v43  ;;  %v1651_v57 = vsel %vm1646_vm5, %v1642_v56, %v1591_v53  ;;  %v1654_v8 = vsel %vm1646_vm5, %v1645_v6, %v1597_v30 }
 0x523   : > { %v1623_v58 = vpop.permute.xlu1 %1622  ;;  %v1593_v59 = vpop.permute.xlu0 %1592 }
 0x524   : > { %v1660_v62 = vsel %vm1655_vm6, %v1651_v57, %v1623_v58  ;;  %v1652_v1 = vsel %vm1646_vm5, %v1643_v63, %v1593_v59 }
 0x525   : > { %1668 = vst.msk [vmem:[%s2866_s26 + $0x20] sm:$0xff] %vm812_vm2, %v1660_v62 }
 0x527   : > { %v1627_v2 = vpop.permute.xlu1 %1626  ;;  %v1625_v3 = vpop.permute.xlu0 %1624 }
 0x528   : > { %v1662_v13 = vsel %vm1655_vm6, %v1653_v0, %v1627_v2  ;;  %v1661_v4 = vsel %vm1655_vm6, %v1652_v1, %v1625_v3 }
 0x529   : > { %1670 = vst.msk [vmem:[%s2866_s26 + $0x30] sm:$0xff] %vm812_vm2, %v1662_v13  ;;  %1669 = vst.msk [vmem:[%s2866_s26 + $0x28] sm:$0xff] %vm812_vm2, %v1661_v4  ;;  %v1674_v5 = vpack.c.bf16 %v1661_v4, %v1660_v62 }
 0x52b   : > { %v1629_v9 = vpop.permute.xlu0 %1628  ;;  %2345 = vmatprep.mubr.msk.bf16.mxu1 %vm812_vm2, %v1674_v5 }
 0x52c   : > { %v1663_v10 = vsel %vm1655_vm6, %v1654_v8, %v1629_v9 }
 0x52d   : > { %1671 = vst.msk [vmem:[%s2866_s26 + $0x38] sm:$0xff] %vm812_vm2, %v1663_v10  ;;  %v1675_v14 = vpack.c.bf16 %v1663_v10, %v1662_v13  ;;  %s585_s26 = scalar_lea.vmem %s3032_s16, %s2632_s27 }
 0x52f   : > { %2346 = vmatmul.mubr.msk.bf16.gmra.mxu1 %vm812_vm2, %v1675_v14 }
 0x5e0   : > { %v2343_v18 = vpop.f32.mrf.mxu1 }
 0x5e1   : > { %v2926_v20 = vadd.f32 %v2343_v18, %v2188_v11 }
 0x5e2   : > { %v1745_v19 = vpop.f32.mrf.mxu1 }
 0x5e3   : > { %1778 = vst.msk [vmem:[%s580_s17 + $0x10] sm:$0xff] %vm812_vm2, %v2926_v20  ;;  %v2930_v12 = vadd.f32 %v2188_v11, %v1745_v19  ;;  %v1786_v28 = vmul.f32 %v2926_v20, %v2926_v20 }
 0x5e4   : > { %v2344_v24 = vpop.f32.mrf.mxu1 }
 0x5e5   : > { %1776 = vst.msk [vmem:[%s580_s17] sm:$0xff] %vm812_vm2, %v2930_v12  ;;  %v2934_v15 = vadd.f32 %v2344_v24, %v2188_v11  ;;  %v1798_v38 = vsel %vm812_vm2, %v1786_v28, 0.0  ;;  %v1784_v40 = vmul.f32 %v2930_v12, %v2930_v12 }
 0x5e6   : > { %v1748_v7 = vpop.f32.mrf.mxu1 }
 0x5e7   : > { %1779 = vst.msk [vmem:[%s580_s17 + $0x18] sm:$0xff] %vm812_vm2, %v2934_v15  ;;  %v2938_v16 = vadd.f32 %v2188_v11, %v1748_v7  ;;  %v1792_v43 = vsel %vm812_vm2, %v1784_v40, 0.0  ;;  %v1787_v42 = vmul.f32 %v2934_v15, %v2934_v15 }
 0x5e9   : > { %1777 = vst.msk [vmem:[%s580_s17 + $0x8] sm:$0xff] %vm812_vm2, %v2938_v16  ;;  %v1801_v46 = vsel %vm812_vm2, %v1787_v42, 0.0  ;;  %v1785_v47 = vmul.f32 %v2938_v16, %v2938_v16 }
 0x5eb   : > { %v1795_v27 = vsel %vm812_vm2, %v1785_v47, 0.0 }
 0x5ef   : > { %v2347_v17 = vpop.f32.mrf.mxu1 }
 0x5f0   : > { %v2942_v21 = vadd.f32 %v2347_v17, %v2188_v11 }
 0x5f1   : > { %v1761_v22 = vpop.f32.mrf.mxu1 }
 0x5f2   : > { %1782 = vst.msk [vmem:[%s580_s17 + $0x30] sm:$0xff] %vm812_vm2, %v2942_v21  ;;  %v2946_v34 = vadd.f32 %v2188_v11, %v1761_v22  ;;  %v1790_v31 = vmul.f32 %v2942_v21, %v2942_v21 }
 0x5f3   : > { %v2348_v35 = vpop.f32.mrf.mxu1 }
 0x5f4   : > { %1780 = vst.msk [vmem:[%s580_s17 + $0x20] sm:$0xff] %vm812_vm2, %v2946_v34  ;;  %v1773_v23 = vadd.f32 %v2348_v35, %v2188_v11  ;;  %v1810_v26 = vsel %vm812_vm2, %v1790_v31, 0.0  ;;  %v1788_v41 = vmul.f32 %v2946_v34, %v2946_v34 }
 0x5f5   : > { %1811 = vadd.xlane.f32.xlu1 %v1810_v26  ;;  %v1764_v36 = vpop.f32.mrf.mxu1 }
 0x5f6   : > { %1783 = vst.msk [vmem:[%s580_s17 + $0x38] sm:$0xff] %vm812_vm2, %v1773_v23  ;;  %v2956_v25 = vadd.f32 %v2188_v11, %v1764_v36  ;;  %v1791_v37 = vmul.f32 %v1773_v23, %v1773_v23  ;;  %v1804_v29 = vsel %vm812_vm2, %v1788_v41, 0.0 }
 0x5f8   : > { %1781 = vst.msk [vmem:[%s580_s17 + $0x28] sm:$0xff] %vm812_vm2, %v2956_v25  ;;  %v1813_v39 = vsel %vm812_vm2, %v1791_v37, 0.0  ;;  %v1789_v44 = vmul.f32 %v2956_v25, %v2956_v25 }
 0x5f9   : > { %1799 = vadd.xlane.f32.xlu1 %v1798_v38  ;;  %1814 = vadd.xlane.f32.xlu0 %v1813_v39 }
 0x5fa   : > { %v1807_v45 = vsel %vm812_vm2, %v1789_v44, 0.0 }
 0x5fd   : > { %1793 = vadd.xlane.f32.xlu1 %v1792_v43  ;;  %1805 = vadd.xlane.f32.xlu0 %v1804_v29 }
 0x601   : > { %1808 = vadd.xlane.f32.xlu0 %v1807_v45 }
 0x605   : > { %1802 = vadd.xlane.f32.xlu0 %v1801_v46 }
 0x609   : > { %1796 = vadd.xlane.f32.xlu0 %v1795_v27 }
 0x60e   : > { %1146 = vrot.lane.b32.xlu1 %v2789_v54, %s2461_s18 }
 0x67e   : > { %v1812_v48 = vpop.xlane.xlu1 %1811 }
 0x67f   : > { %v1822_v49 = vmax.f32 %v1812_v48, 1e-24 }
 0x681   : > { %2429 = vrsqrt.f32 %v1822_v49 }
 0x682   : > { %v1800_v50 = vpop.xlane.xlu1 %1799  ;;  %v1815_v51 = vpop.xlane.xlu0 %1814 }
 0x683   : > { %v1823_v52 = vmax.f32 %v1815_v51, 1e-24  ;;  %v1818_v58 = vmax.f32 %v1800_v50, 1e-24 }
 0x685   : > { %2431 = vrsqrt.f32 %v1823_v52 }
 0x686   : > { %v1794_v53 = vpop.xlane.xlu1 %1793  ;;  %v1806_v30 = vpop.xlane.xlu0 %1805 }
 0x687   : > { %v1820_v55 = vmax.f32 %v1806_v30, 1e-24  ;;  %v1816_v60 = vmax.f32 %v1794_v53, 1e-24 }
 0x689   : > { %2433 = vrsqrt.f32 %v1820_v55 }
 0x68a   : > { %v1147_v56 = vpop.permute.xlu1 %1146  ;;  %v1809_v57 = vpop.xlane.xlu0 %1808 }
 0x68b   : > { %1150 = vst.msk [vmem:[%s570_s24] sm:$0xf] %vm1149_vm7, %v1147_v56  ;;  %v1821_v54 = vmax.f32 %v1809_v57, 1e-24 }
 0x68d   : > { %2435 = vrsqrt.f32 %v1821_v54 }
 0x68e   : > { %v1803_v59 = vpop.xlane.xlu0 %1802  ;;  %2437 = vrsqrt.f32 %v1818_v58  ;;  %v2430_v62 = vpop.eup %2429 }
 0x68f   : > { %v1819_v61 = vmax.f32 %v1803_v59, 1e-24  ;;  %v1838_v1 = vmul.f32 %v2430_v62, %v2942_v21 }
 0x691   : > { %2439 = vrsqrt.f32 %v1819_v61 }
 0x692   : > { %v1797_v33 = vpop.xlane.xlu0 %1796  ;;  %v2432_v63 = vpop.eup %2431  ;;  %2441 = vrsqrt.f32 %v1816_v60 }
 0x693   : > { %v1817_v0 = vmax.f32 %v1797_v33, 1e-24  ;;  %v1839_v2 = vmul.f32 %v2432_v63, %v1773_v23 }
 0x695   : > { %2443 = vrsqrt.f32 %v1817_v0  ;;  %v1843_v3 = vpack.c.bf16 %v1839_v2, %v1838_v1 }
 0x696   : > { %v2434_v32 = vpop.eup %2433 }
 0x697   : > { %2373 = vmatprep.subr.msk.bf16.mxu0 %vm812_vm2, %v1843_v3  ;;  %v1854_v13 = vsel %vm812_vm2, %v1843_v3, 0  ;;  %v1836_v5 = vmul.f32 %v2434_v32, %v2946_v34 }
 0x698   : > { %2350 = vmatpush3.bf16.xpose.msra.mxu0 %v1854_v13 }
 0x69a   : > { %v2436_v4 = vpop.eup %2435 }
 0x69b   : > { %v1837_v6 = vmul.f32 %v2436_v4, %v2956_v25  ;;  %v2438_v8 = vpop.eup %2437 }
 0x69c   : > { %v1834_v11 = vmul.f32 %v2438_v8, %v2926_v20 }
 0x69d   : > { %v1842_v9 = vpack.c.bf16 %v1837_v6, %v1836_v5 }
 0x69e   : > { %v2440_v10 = vpop.eup %2439 }
 0x69f   : > { %2374 = vmatprep.subr.msk.bf16.mxu0 %vm812_vm2, %v1842_v9  ;;  %v1851_v14 = vsel %vm812_vm2, %v1842_v9, 0  ;;  %v1835_v18 = vmul.f32 %v2440_v10, %v2934_v15  ;;  %v2442_v19 = vpop.eup %2441 }
 0x6a0   : > { %2352 = vmatpush3.bf16.xpose.msra.mxu0 %v1851_v14  ;;  %v1832_v17 = vmul.f32 %v2442_v19, %v2930_v12 }
 0x6a1   : > { %v1841_v24 = vpack.c.bf16 %v1835_v18, %v1834_v11 }
 0x6a2   : > { %v2444_v7 = vpop.eup %2443 }
 0x6a3   : > { %2375 = vmatprep.subr.msk.bf16.mxu0 %vm812_vm2, %v1841_v24  ;;  %v1833_v21 = vmul.f32 %v2444_v7, %v2938_v16  ;;  %v1848_v34 = vsel %vm812_vm2, %v1841_v24, 0 }
 0x6a5   : > { %v1840_v22 = vpack.c.bf16 %v1833_v21, %v1832_v17 }
 0x6a7   : > { %2357 = vmatprep.mubr.msk.bf16.mxu0 %vm812_vm2, %v1840_v22  ;;  %v1845_v20 = vsel %vm812_vm2, %v1840_v22, 0 }
 0x6a8   : > { %2354 = vmatpush3.bf16.xpose.msra.mxu0 %v1848_v34 }
 0x6a9   : > { %2376 = vmatprep.subr.msk.bf16.mxu0 %vm812_vm2, %v1840_v22 }
 0x6b0   : > { %2356 = vmatpush3.bf16.xpose.msra.mxu0 %v1845_v20 }
 0x6b7   : > { %2358 = vmatmul.mubr.msk.bf16.vlgmr.msra.gmra.mxu0 %vm812_vm2, %v1841_v24 }
 0x6b8   : > { %2361 = vmatprep.mubr.msk.bf16.mxu0 %vm812_vm2, %v1842_v9 }
 0x6bf   : > { %2362 = vmatmul.mubr.msk.bf16.gmra.mxu0 %vm812_vm2, %v1843_v3 }
 0x777   : > { %v2359_v12 = vpop.f32.mrf.mxu0 }
 0x778   : > { %1924 = vst.msk [vmem:[%s585_s26 + $0x10] sm:$0xff] %vm1921_vm8, %v2359_v12 }
 0x779   : > { %v1890_v15 = vpop.f32.mrf.mxu0 }
 0x77a   : > { %1922 = vst.msk [vmem:[%s585_s26] sm:$0xff] %vm1921_vm8, %v1890_v15 }
 0x77b   : > { %v2360_v16 = vpop.f32.mrf.mxu0 }
 0x77c   : > { %1925 = vst.msk [vmem:[%s585_s26 + $0x18] sm:$0xff] %vm1921_vm8, %v2360_v16 }
 0x77d   : > { %v1893_v31 = vpop.f32.mrf.mxu0 }
 0x77e   : > { %1923 = vst.msk [vmem:[%s585_s26 + $0x8] sm:$0xff] %vm1921_vm8, %v1893_v31 }
 0x77f   : > { %v2363_v35 = vpop.f32.mrf.mxu0 }
 0x780   : > { %1928 = vst.msk [vmem:[%s585_s26 + $0x30] sm:$0xff] %vm1921_vm8, %v2363_v35 }
 0x781   : > { %v1906_v23 = vpop.f32.mrf.mxu0 }
 0x782   : > { %1926 = vst.msk [vmem:[%s585_s26 + $0x20] sm:$0xff] %vm1921_vm8, %v1906_v23 }
 0x783   : > { %v2364_v26 = vpop.f32.mrf.mxu0 }
 0x784   : > { %1929 = vst.msk [vmem:[%s585_s26 + $0x38] sm:$0xff] %vm1921_vm8, %v2364_v26 }
 0x785   : > { %v1909_v28 = vpop.f32.mrf.mxu0 }
 0x786   : > { %1927 = vst.msk [vmem:[%s585_s26 + $0x28] sm:$0xff] %vm1921_vm8, %v1909_v28 }
 0x787 PF: > { %s27_s21 = sadd.s32 1, %s2451_s21  }
 0x788   : > { %p24_p4 = scmp.ge.s32.totalorder %s27_s21, 4  }
 0x78a   :  { %26 = sbr.rel (!%p24_p4) target bundleno = 2 (0x2), region = 149 }

// kernel: graph_attention_forward.6
= control target key start
LH: loop header
LB: loop body
LE: loop exit
PB: predicated region body
PF: predicated region fallthrough
CT: control target
= control target key end

     0   :  { %s2642_s21 = smov 0   ;;  %s3235_s0 = inlined_call_operand.vmem [shape: f32[2,64,32], index: 0, kind: input, shape index: {}]   ;;  %s3236_s1 = inlined_call_operand.vmem [shape: f32[2,64,32], index: 1, kind: input, shape index: {}]   ;;  %s3237_s2 = inlined_call_operand.vmem [shape: f32[2,64,32], index: 2, kind: input, shape index: {}]   ;;  %s3238_s3 = inlined_call_operand.vmem [shape: bf16[2,8,32], index: 3, kind: input, shape index: {}]   ;;  %s3239_s4 = inlined_call_operand.vmem [shape: f32[2,64,32], index: 4, kind: input, shape index: {}]   ;;  %s3240_s5 = inlined_call_operand.vmem [shape: bf16[32,64], index: 5, kind: input, shape index: {}]   ;;  %s3241_s6 = inlined_call_operand.vmem [shape: bf16[32,64], index: 6, kind: input, shape index: {}]   ;;  %s3242_s7 = inlined_call_operand.vmem [shape: f32[1,64], index: 7, kind: input, shape index: {}]   ;;  %s3243_s8 = inlined_call_operand.vmem [shape: bf16[64,32], index: 8, kind: input, shape index: {}]   ;;  %s3244_s9 = inlined_call_operand.vmem [shape: f32[1,32], index: 9, kind: input, shape index: {}]   ;;  %s3245_s10 = inlined_call_operand.vmem [shape: bf16[32,32], index: 10, kind: input, shape index: {}]   ;;  %s3246_s11 = inlined_call_operand.vmem [shape: f32[1,32], index: 11, kind: input, shape index: {}]   ;;  %s3247_s12 = inlined_call_operand.vmem [shape: f32[2,64,32], index: 12, kind: output, shape index: {}]  }
   0x1 LB: > { %s2123_s22 = sadd.s32 4294967295, %s2569_s21   ;;  %p2127_p0 = scmp.ge.s32.totalorder %s2569_s21, 1  ;;  %s2569_s21 = sphi %s2642_s21, %s22_s21  }
   0x2   : > { %p401_p1 = scmp.lt.s32.totalorder %s2569_s21, 3 }
   0x4   : > { %p402_p2 = pnand %p2127_p0, %p401_p1 }
   0x5   : > { %p462_p3 = scmp.lt.s32.totalorder (!%p402_p2), %s2123_s22, 1  ;;  %s2571_s20 = smov (!%p402_p2), 112  }
   0x6   : > { %405 = sbr.rel (%p402_p2) target bundleno = 1650 (0x672), region = 68  ;;  %s2572_s23 = smov (!%p402_p2), 120  }
   0x7   : > { %s2573_s24 = smov (!%p402_p2), 104  }
   0xb   : > { %v2408_v0 = vld [vmem:[%s3240_s5 + $0x8] sm:$0xff]   ;;  %v2410_v2 = vld [vmem:[%s3240_s5] sm:$0xff]   ;;  %s3249_s22 = smov (!%p462_p3, %s2123_s22), 1  ;;  %vm544_vm0 = vcmask 261120   ;;  %v2412_v36 = vld [vmem:[%s3243_s8 + $0x18] sm:$0xff]   ;;  %vm841_vm1 = vcmask 523264  }
   0xc   : > { %v2409_v1 = vld [vmem:[%s3241_s6 + $0x8] sm:$0xff]   ;;  %2250 = vmatprep.subr.bf16.mxu1 %v2408_v0  ;;  %v2411_v3 = vld [vmem:[%s3241_s6] sm:$0xff]   ;;  %s2665_s13 = sshll.u32 %s3249_s22, 6  ;;  %v2413_v37 = vld [vmem:[%s3243_s8 + $0x10] sm:$0xff]   ;;  %vm1332_vm2 = vcmask 195712   ;;  %vm1110_vm3 = vcmask 130112  }
   0xd   : > { %2238 = vmatprep.subr.bf16.mxu0 %v2409_v1  ;;  %2251 = vmatpush3.bf16.msra.mxu1 %v2408_v0  ;;  %s466_s16 = scalar_lea.vmem %s3235_s0, %s2665_s13  ;;  %s2675_s19 = scalar_lea.vmem %s3236_s1, %s2665_s13  ;;  %v2414_v38 = vld [vmem:[%s3243_s8 + $0x8] sm:$0xff]   ;;  %v2415_v39 = vld [vmem:[%s3243_s8] sm:$0xff]   ;;  %vm1551_vm4 = vcmask 261312   ;;  %vm936_vm5 = vcmask 64512   ;;  %vm1041_vm6 = vcmask 1043456   ;;  %vm1874_vm7 = vcmask 130048  }
   0xe   : > { %2239 = vmatpush3.bf16.msra.mxu0 %v2409_v1  ;;  %2252 = vmatprep.subr.bf16.mxu1 %v2410_v2  ;;  %v492_v4 = vld [vmem:[%s466_s16] sm:$0xff]  ;;  %v493_v5 = vld [vmem:[%s466_s16 + $0x8] sm:$0xff]  ;;  %v494_v10 = vld [vmem:[%s466_s16 + $0x10] sm:$0xff]  ;;  %s2751_s17 = scalar_lea.vmem %s3237_s2, %s2665_s13  ;;  %s2134_s25 = sshll.u32 %s3249_s22, 2  ;;  %vm1883_vm8 = vcmask 195584  }
   0xf   : > { %2240 = vmatprep.subr.bf16.mxu0 %v2411_v3  ;;  %v500_v6 = vld [vmem:[%s2675_s19] sm:$0xff]  ;;  %v516_v7 = vpack.c.bf16 %v493_v5, %v492_v4  ;;  %v501_v8 = vld [vmem:[%s2675_s19 + $0x8] sm:$0xff]  ;;  %v495_v11 = vld [vmem:[%s466_s16 + $0x18] sm:$0xff]  ;;  %s480_s28 = scalar_lea.vmem %s3238_s3, %s2134_s25  ;;  %s2574_s22 = smov 8  }
  0x10   : > { %v508_v9 = vsub.f32 %v500_v6, %v492_v4  ;;  %v509_v12 = vsub.f32 %v501_v8, %v493_v5  ;;  %v517_v13 = vpack.c.bf16 %v495_v11, %v494_v10  ;;  %v502_v14 = vld [vmem:[%s2675_s19 + $0x10] sm:$0xff]  ;;  %v503_v15 = vld [vmem:[%s2675_s19 + $0x18] sm:$0xff]  ;;  %v496_v16 = vld [vmem:[%s466_s16 + $0x20] sm:$0xff]  ;;  %s3207_s27 = scalar_lea.vmem %s3247_s12, %s2665_s13 }
  0x11   : > { %2253 = vmatpush3.bf16.msra.mxu1 %v2410_v2  ;;  %2254 = vmatprep.mubr.msk.bf16.mxu1 %vm544_vm0, %v516_v7  ;;  %v510_v17 = vsub.f32 %v502_v14, %v494_v10  ;;  %v511_v18 = vsub.f32 %v503_v15, %v495_v11  ;;  %v497_v19 = vld [vmem:[%s466_s16 + $0x28] sm:$0xff]  ;;  %v504_v20 = vld [vmem:[%s2675_s19 + $0x20] sm:$0xff]  ;;  %v498_v26 = vld [vmem:[%s466_s16 + $0x30] sm:$0xff] }
  0x12   : > { %2241 = vmatpush3.bf16.msra.mxu0 %v2411_v3  ;;  %v505_v21 = vld [vmem:[%s2675_s19 + $0x28] sm:$0xff]  ;;  %v524_v22 = vpack.c.bf16 %v509_v12, %v508_v9  ;;  %v512_v23 = vsub.f32 %v504_v20, %v496_v16  ;;  %v518_v25 = vpack.c.bf16 %v497_v19, %v496_v16  ;;  %v499_v27 = vld [vmem:[%s466_s16 + $0x38] sm:$0xff]  ;;  %v506_v28 = vld [vmem:[%s2675_s19 + $0x30] sm:$0xff]  ;;  %s2575_s16 = smov 16  }
  0x13   : > { %v513_v24 = vsub.f32 %v505_v21, %v497_v19  ;;  %v525_v29 = vpack.c.bf16 %v511_v18, %v510_v17  ;;  %v507_v30 = vld [vmem:[%s2675_s19 + $0x38] sm:$0xff]  ;;  %v514_v32 = vsub.f32 %v506_v28, %v498_v26  ;;  %v519_v34 = vpack.c.bf16 %v499_v27, %v498_v26  ;;  %2262 = vmatprep.subr.bf16.mxu0 %v2412_v36  ;;  %v2151_v43 = vld [vmem:[%s3242_s7] ss:$0 sm:$0xff] }
  0x14   : > { %2255 = vmatmul.mubr.msk.bf16.vlgmr.msra.gmra.mxu1 %vm544_vm0, %v517_v13  ;;  %2242 = vmatprep.mubr.msk.bf16.mxu0 %vm544_vm0, %v524_v22  ;;  %v515_v33 = vsub.f32 %v507_v30, %v499_v27 }
  0x15   : > { %v526_v31 = vpack.c.bf16 %v513_v24, %v512_v23  ;;  %2258 = vmatprep.mubr.msk.bf16.mxu1 %vm544_vm0, %v518_v25  ;;  %2243 = vmatmul.mubr.msk.bf16.vlgmr.msra.gmra.mxu0 %vm544_vm0, %v525_v29 }
  0x16   : > { %v527_v35 = vpack.c.bf16 %v515_v33, %v514_v32  ;;  %2263 = vmatpush3.bf16.msra.mxu0 %v2412_v36 }
  0x17   : > { %2246 = vmatprep.mubr.msk.bf16.mxu0 %vm544_vm0, %v526_v31  ;;  %2264 = vmatprep.subr.bf16.mxu0 %v2413_v37 }
  0x1a   : > { %2265 = vmatpush3.bf16.msra.mxu0 %v2413_v37 }
  0x1b   : > { %2266 = vmatprep.subr.bf16.mxu0 %v2414_v38 }
  0x1c   : > { %2259 = vmatmul.mubr.msk.bf16.gmra.mxu1 %vm544_vm0, %v519_v34 }
  0x1d   : > { %2247 = vmatmul.mubr.msk.bf16.gmra.mxu0 %vm544_vm0, %v527_v35 }
  0x1e   : > { %2267 = vmatpush3.bf16.msra.mxu0 %v2414_v38 }
  0x1f   : > { %2268 = vmatprep.subr.bf16.mxu0 %v2415_v39 }
  0x22   : > { %2269 = vmatpush3.bf16.msra.mxu0 %v2415_v39 }
  0xd4   : > { %v2256_v40 = vpop.f32.mrf.mxu1 }
  0xd5   : > { %v2244_v42 = vpop.f32.mrf.mxu0 }
  0xd6   : > { %v680_v41 = vpop.f32.mrf.mxu1  ;;  %v689_v44 = vadd.f32 %v2256_v40, %v2244_v42 }
  0xd7   : > { %v591_v46 = vpop.f32.mrf.mxu0 }
  0xd8   : > { %v2257_v45 = vpop.f32.mrf.mxu1  ;;  %v2708_v47 = vadd.f32 %v2151_v43, %v689_v44  ;;  %v681_v48 = vadd.f32 %v680_v41, %v591_v46 }
  0xd9   : > { %v2245_v50 = vpop.f32.mrf.mxu0 }
  0xda   : > { %v683_v49 = vpop.f32.mrf.mxu1  ;;  %v736_v51 = vmul.f32 0.044715, %v2708_v47  ;;  %v2711_v52 = vadd.f32 %v2151_v43, %v681_v48  ;;  %v692_v53 = vadd.f32 %v2257_v45, %v2245_v50 }
  0xdb   : > { %v594_v55 = vpop.f32.mrf.mxu0 }
  0xdc   : > { %v2260_v54 = vpop.f32.mrf.mxu1  ;;  %v744_v56 = vmul.f32 %v736_v51, %v2708_v47  ;;  %v734_v57 = vmul.f32 0.044715, %v2711_v52  ;;  %v2715_v58 = vadd.f32 %v2151_v43, %v692_v53  ;;  %v684_v59 = vadd.f32 %v683_v49, %v594_v55 }
  0xdd   : > { %v2248_v61 = vpop.f32.mrf.mxu0 }
  0xde   : > { %v696_v60 = vpop.f32.mrf.mxu1  ;;  %v752_v62 = vmul.f32 %v744_v56, %v2708_v47  ;;  %v742_v63 = vmul.f32 %v734_v57, %v2711_v52  ;;  %v737_v0 = vmul.f32 0.044715, %v2715_v58  ;;  %v2720_v2 = vadd.f32 %v2151_v43, %v684_v59 }
  0xdf   : > { %v705_v3 = vadd.f32 %v2260_v54, %v2248_v61  ;;  %v607_v4 = vpop.f32.mrf.mxu0  ;;  %v729_v59 = vmul.f32 0.5, %v2715_v58 }
  0xe0   : > { %v2261_v1 = vpop.f32.mrf.mxu1  ;;  %v760_v5 = vadd.f32 %v752_v62, %v2708_v47  ;;  %v750_v6 = vmul.f32 %v742_v63, %v2711_v52  ;;  %v745_v7 = vmul.f32 %v737_v0, %v2715_v58  ;;  %v697_v8 = vadd.f32 %v696_v60, %v607_v4 }
  0xe1   : > { %v735_v9 = vmul.f32 0.044715, %v2720_v2  ;;  %v2726_v10 = vadd.f32 %v2151_v43, %v705_v3  ;;  %v2249_v11 = vpop.f32.mrf.mxu0  ;;  %v726_v60 = vmul.f32 0.5, %v2711_v52  ;;  %v727_v61 = vmul.f32 0.5, %v2720_v2 }
  0xe2   : > { %v699_v12 = vpop.f32.mrf.mxu1  ;;  %v768_v13 = vmul.f32 0.7978846, %v760_v5  ;;  %v758_v14 = vadd.f32 %v750_v6, %v2711_v52  ;;  %v753_v15 = vmul.f32 %v745_v7, %v2715_v58  ;;  %v722_v16 = vadd.f32 %v2151_v43, %v697_v8 }
  0xe3   : > { %v743_v17 = vmul.f32 %v735_v9, %v2720_v2  ;;  %v740_v18 = vmul.f32 0.044715, %v2726_v10  ;;  %v708_v19 = vadd.f32 %v2261_v1, %v2249_v11  ;;  %v610_v20 = vpop.f32.mrf.mxu0  ;;  %v728_v0 = vmul.f32 0.5, %v2708_v47 }
  0xe4   : > { %v761_v21 = vadd.f32 %v753_v15, %v2715_v58  ;;  %v738_v22 = vmul.f32 0.044715, %v722_v16  ;;  %v700_v23 = vadd.f32 %v699_v12, %v610_v20  ;;  %v766_v27 = vmul.f32 0.7978846, %v758_v14 }
  0xe5   : > { %v751_v24 = vmul.f32 %v743_v17, %v2720_v2  ;;  %v748_v25 = vmul.f32 %v740_v18, %v2726_v10  ;;  %v725_v26 = vadd.f32 %v2151_v43, %v708_v19  ;;  %2419 = vtanh.f32 %v768_v13 }
  0xe6   : > { %v769_v28 = vmul.f32 0.7978846, %v761_v21  ;;  %v746_v29 = vmul.f32 %v738_v22, %v722_v16  ;;  %v723_v30 = vadd.f32 %v2151_v43, %v700_v23  ;;  %2421 = vtanh.f32 %v766_v27  ;;  %v2756_v21 = vld [vmem:[%s3244_s9] ss:$0 sm:$0xff]  ;;  %v921_v23 = vld [vmem:[%s2751_s17 + $0x10] sm:$0xff] }
  0xe7   : > { %v759_v31 = vadd.f32 %v751_v24, %v2720_v2  ;;  %v756_v32 = vmul.f32 %v748_v25, %v2726_v10  ;;  %v741_v33 = vmul.f32 0.044715, %v725_v26  ;;  %v732_v6 = vmul.f32 0.5, %v2726_v10 }
  0xe8   : > { %2423 = vtanh.f32 %v769_v28  ;;  %v754_v34 = vmul.f32 %v746_v29, %v722_v16  ;;  %v739_v35 = vmul.f32 0.044715, %v723_v30  ;;  %v730_v8 = vmul.f32 0.5, %v722_v16  ;;  %v922_v28 = vld [vmem:[%s2751_s17 + $0x18] sm:$0xff] }
  0xe9   : > { %v764_v36 = vadd.f32 %v756_v32, %v2726_v10  ;;  %v749_v37 = vmul.f32 %v741_v33, %v725_v26  ;;  %v767_v38 = vmul.f32 0.7978846, %v759_v31  ;;  %v733_v12 = vmul.f32 0.5, %v725_v26 }
  0xea   : > { %v762_v39 = vadd.f32 %v754_v34, %v722_v16  ;;  %v747_v40 = vmul.f32 %v739_v35, %v723_v30  ;;  %v731_v13 = vmul.f32 0.5, %v723_v30 }
  0xeb   : > { %v757_v41 = vmul.f32 %v749_v37, %v725_v26  ;;  %2425 = vtanh.f32 %v767_v38  ;;  %v772_v42 = vmul.f32 0.7978846, %v764_v36  ;;  %v919_v36 = vld [vmem:[%s2751_s17] sm:$0xff] }
  0xec   : > { %v755_v44 = vmul.f32 %v747_v40, %v723_v30  ;;  %v770_v43 = vmul.f32 0.7978846, %v762_v39 }
  0xed   : > { %v765_v45 = vadd.f32 %v757_v41, %v725_v26  ;;  %2427 = vtanh.f32 %v772_v42  ;;  %v920_v42 = vld [vmem:[%s2751_s17 + $0x8] sm:$0xff] }
  0xee   : > { %v763_v46 = vadd.f32 %v755_v44, %v723_v30  ;;  %2429 = vtanh.f32 %v770_v43 }
  0xef   : > { %v773_v48 = vmul.f32 0.7978846, %v765_v45 }
  0xf0   : > { %v771_v49 = vmul.f32 0.7978846, %v763_v46 }
  0xf1   : > { %2431 = vtanh.f32 %v773_v48 }
  0xf2   : > { %2433 = vtanh.f32 %v771_v49  ;;  %v2420_v50 = vpop.eup %2419 }
  0xf3   : > { %v2422_v51 = vpop.eup %2421  ;;  %v784_v57 = vadd.f32 1.0, %v2420_v50 }
  0xf4   : > { %v782_v55 = vadd.f32 1.0, %v2422_v51 }
  0xf5   : > { %v2424_v53 = vpop.eup %2423  ;;  %v792_v7 = vmul.f32 %v784_v57, %v728_v0  ;;  %v925_v0 = vld [vmem:[%s2751_s17 + $0x30] sm:$0xff] }
  0xf6   : > { %v785_v54 = vadd.f32 1.0, %v2424_v53  ;;  %v790_v4 = vmul.f32 %v782_v55, %v726_v60 }
  0xf8   : > { %v2426_v56 = vpop.eup %2425  ;;  %v793_v1 = vmul.f32 %v785_v54, %v729_v59 }
  0xf9   : > { %v783_v62 = vadd.f32 1.0, %v2426_v56  ;;  %v926_v56 = vld [vmem:[%s2751_s17 + $0x38] sm:$0xff] }
  0xfa   : > { %v2428_v63 = vpop.eup %2427  ;;  %v799_v2 = vpack.c.bf16 %v793_v1, %v792_v7  ;;  %v924_v7 = vld [vmem:[%s2751_s17 + $0x28] sm:$0xff] }
  0xfb   : > { %v2430_v3 = vpop.eup %2429  ;;  %v791_v5 = vmul.f32 %v783_v62, %v727_v61  ;;  %v788_v11 = vadd.f32 1.0, %v2428_v63 }
  0xfc   : > { %v786_v9 = vadd.f32 1.0, %v2430_v3 }
  0xfd   : > { %v798_v58 = vpack.c.bf16 %v791_v5, %v790_v4  ;;  %v796_v18 = vmul.f32 %v788_v11, %v732_v6 }
  0xfe   : > { %v2432_v52 = vpop.eup %2431  ;;  %v794_v17 = vmul.f32 %v786_v9, %v730_v8 }
  0xff   : > { %v2434_v14 = vpop.eup %2433  ;;  %2270 = vmatprep.mubr.msk.bf16.mxu0 %vm841_vm1, %v798_v58  ;;  %v789_v47 = vadd.f32 1.0, %v2432_v52 }
 0x100   : > { %2271 = vmatmul.mubr.msk.bf16.vlgmr.msra.gmra.mxu0 %vm841_vm1, %v799_v2  ;;  %v787_v15 = vadd.f32 1.0, %v2434_v14  ;;  %v923_v2 = vld [vmem:[%s2751_s17 + $0x20] sm:$0xff]  ;;  %s2576_s17 = smov 24  }
 0x101   : > { %v797_v10 = vmul.f32 %v789_v47, %v733_v12 }
 0x102   : > { %v795_v19 = vmul.f32 %v787_v15, %v731_v13 }
 0x103   : > { %v801_v20 = vpack.c.bf16 %v797_v10, %v796_v18 }
 0x104   : > { %v800_v16 = vpack.c.bf16 %v795_v19, %v794_v17 }
 0x106   : > { %2274 = vmatprep.mubr.msk.bf16.mxu0 %vm841_vm1, %v800_v16 }
 0x108   : > { %2275 = vmatmul.mubr.msk.bf16.gmra.mxu0 %vm841_vm1, %v801_v20 }
 0x1c0   : > { %v2272_v22 = vpop.f32.mrf.mxu0 }
 0x1c1   : > { %v897_v24 = vadd.f32 %v2272_v22, %v2756_v21 }
 0x1c2   : > { %v888_v25 = vpop.f32.mrf.mxu0 }
 0x1c3   : > { %v2760_v26 = vadd.f32 %v921_v23, %v897_v24  ;;  %v889_v33 = vadd.f32 %v2756_v21, %v888_v25 }
 0x1c4   : > { %v2273_v27 = vpop.f32.mrf.mxu0 }
 0x1c5   : > { %v900_v29 = vadd.f32 %v2273_v27, %v2756_v21  ;;  %v1339_v30 = vsel %vm1332_vm2, %v2760_v26, -inf  ;;  %v1117_v31 = vsel %vm1110_vm3, %v2760_v26, -inf  ;;  %v1558_v34 = vsel %vm1551_vm4, %v2760_v26, -inf }
 0x1c6   : > { %1340 = vmax.xlane.f32.xlu0 %v1339_v30  ;;  %1118 = vmax.xlane.f32.xlu1 %v1117_v31  ;;  %v891_v37 = vpop.f32.mrf.mxu0  ;;  %v2776_v38 = vadd.f32 %v919_v36, %v889_v33  ;;  %v943_v40 = vsel %vm936_vm5, %v2760_v26, -inf }
 0x1c7   : > { %v2768_v32 = vadd.f32 %v922_v28, %v900_v29  ;;  %v892_v39 = vadd.f32 %v2756_v21, %v891_v37 }
 0x1c8   : > { %v2276_v44 = vpop.f32.mrf.mxu0  ;;  %v1111_v46 = vsel %vm1110_vm3, %v2776_v38, -inf  ;;  %v1333_v50 = vsel %vm1332_vm2, %v2776_v38, -inf  ;;  %v1552_v55 = vsel %vm1551_vm4, %v2776_v38, -inf  ;;  %v937_v60 = vsel %vm936_vm5, %v2776_v38, -inf }
 0x1c9   : > { %v1120_v35 = vsel %vm1110_vm3, %v2768_v32, -inf  ;;  %v1342_v41 = vsel %vm1332_vm2, %v2768_v32, -inf  ;;  %v2784_v43 = vadd.f32 %v920_v42, %v892_v39  ;;  %v1561_v45 = vsel %vm1551_vm4, %v2768_v32, -inf }
 0x1ca   : > { %1559 = vmax.xlane.f32.xlu0 %v1558_v34  ;;  %1121 = vmax.xlane.f32.xlu1 %v1120_v35  ;;  %v904_v48 = vpop.f32.mrf.mxu0  ;;  %v913_v61 = vadd.f32 %v2276_v44, %v2756_v21  ;;  %v946_v62 = vsel %vm936_vm5, %v2768_v32, -inf }
 0x1cb   : > { %v1336_v49 = vsel %vm1332_vm2, %v2784_v43, -inf  ;;  %v1555_v54 = vsel %vm1551_vm4, %v2784_v43, -inf  ;;  %v940_v59 = vsel %vm936_vm5, %v2784_v43, -inf  ;;  %v1114_v5 = vsel %vm1110_vm3, %v2784_v43, -inf }
 0x1cc   : > { %v2277_v51 = vpop.f32.mrf.mxu0  ;;  %v2812_v3 = vadd.f32 %v925_v0, %v913_v61  ;;  %v905_v58 = vadd.f32 %v2756_v21, %v904_v48 }
 0x1cd   : > { %v916_v53 = vadd.f32 %v2277_v51, %v2756_v21 }
 0x1ce   : > { %944 = vmax.xlane.f32.xlu0 %v943_v40  ;;  %1343 = vmax.xlane.f32.xlu1 %v1342_v41  ;;  %v907_v1 = vpop.f32.mrf.mxu0  ;;  %v1129_v9 = vsel %vm1110_vm3, %v2812_v3, -inf  ;;  %v1351_v12 = vsel %vm1332_vm2, %v2812_v3, -inf  ;;  %v2832_v13 = vadd.f32 %v923_v2, %v905_v58  ;;  %v1570_v14 = vsel %vm1551_vm4, %v2812_v3, -inf }
 0x1cf   : > { %v2800_v57 = vadd.f32 %v926_v56, %v916_v53  ;;  %v908_v4 = vadd.f32 %v2756_v21, %v907_v1 }
 0x1d0   : > { %v1123_v17 = vsel %vm1110_vm3, %v2832_v13, -inf  ;;  %v1345_v10 = vsel %vm1332_vm2, %v2832_v13, -inf  ;;  %v1564_v19 = vsel %vm1551_vm4, %v2832_v13, -inf  ;;  %v949_v16 = vsel %vm936_vm5, %v2832_v13, -inf }
 0x1d1   : > { %v1132_v63 = vsel %vm1110_vm3, %v2800_v57, -inf  ;;  %v1354_v6 = vsel %vm1332_vm2, %v2800_v57, -inf  ;;  %v2820_v8 = vadd.f32 %v924_v7, %v908_v4  ;;  %v1573_v11 = vsel %vm1551_vm4, %v2800_v57, -inf }
 0x1d2   : > { %1562 = vmax.xlane.f32.xlu1 %v1561_v45  ;;  %1112 = vmax.xlane.f32.xlu0 %v1111_v46 }
 0x1d3   : > { %v1126_v52 = vsel %vm1110_vm3, %v2820_v8, -inf  ;;  %v1348_v47 = vsel %vm1332_vm2, %v2820_v8, -inf  ;;  %v1567_v15 = vsel %vm1551_vm4, %v2820_v8, -inf  ;;  %v952_v18 = vsel %vm936_vm5, %v2820_v8, -inf }
 0x1d6   : > { %1337 = vmax.xlane.f32.xlu1 %v1336_v49  ;;  %1334 = vmax.xlane.f32.xlu0 %v1333_v50 }
 0x1da   : > { %1556 = vmax.xlane.f32.xlu1 %v1555_v54  ;;  %1553 = vmax.xlane.f32.xlu0 %v1552_v55 }
 0x1de   : > { %941 = vmax.xlane.f32.xlu1 %v940_v59  ;;  %938 = vmax.xlane.f32.xlu0 %v937_v60 }
 0x1e2   : > { %947 = vmax.xlane.f32.xlu0 %v946_v62  ;;  %1133 = vmax.xlane.f32.xlu1 %v1132_v63 }
 0x1e6   : > { %1115 = vmax.xlane.f32.xlu0 %v1114_v5  ;;  %1355 = vmax.xlane.f32.xlu1 %v1354_v6 }
 0x1ea   : > { %1130 = vmax.xlane.f32.xlu0 %v1129_v9  ;;  %1574 = vmax.xlane.f32.xlu1 %v1573_v11 }
 0x1ee   : > { %1352 = vmax.xlane.f32.xlu0 %v1351_v12  ;;  %1127 = vmax.xlane.f32.xlu1 %v1126_v52 }
 0x1f2   : > { %1571 = vmax.xlane.f32.xlu0 %v1570_v14  ;;  %1349 = vmax.xlane.f32.xlu1 %v1348_v47 }
 0x1f6   : > { %1568 = vmax.xlane.f32.xlu1 %v1567_v15  ;;  %1124 = vmax.xlane.f32.xlu0 %v1123_v17 }
 0x1fa   : > { %953 = vmax.xlane.f32.xlu1 %v952_v18  ;;  %1346 = vmax.xlane.f32.xlu0 %v1345_v10 }
 0x1fe   : > { %1565 = vmax.xlane.f32.xlu0 %v1564_v19 }
 0x202   : > { %950 = vmax.xlane.f32.xlu0 %v949_v16 }
 0x24f   : > { %v1341_v20 = vpop.xlane.xlu0 %1340  ;;  %v1119_v21 = vpop.xlane.xlu1 %1118 }
 0x250   : > { %v1359_v22 = vsub.f32 %v2760_v26, %v1341_v20  ;;  %v1137_v23 = vsub.f32 %v2760_v26, %v1119_v21 }
 0x252   : > { %v1369_v24 = vmul.f32 1.442695, %v1359_v22  ;;  %v1147_v25 = vmul.f32 1.442695, %v1137_v23 }
 0x253   : > { %v1560_v27 = vpop.xlane.xlu0 %1559  ;;  %v1122_v28 = vpop.xlane.xlu1 %1121 }
 0x254   : > { %2435 = vpow2.f32 %v1369_v24  ;;  %v1578_v29 = vsub.f32 %v2760_v26, %v1560_v27  ;;  %v1138_v30 = vsub.f32 %v2768_v32, %v1122_v28 }
 0x255   : > { %2437 = vpow2.f32 %v1147_v25 }
 0x256   : > { %v1588_v31 = vmul.f32 1.442695, %v1578_v29  ;;  %v1149_v33 = vmul.f32 1.442695, %v1138_v30 }
 0x257   : > { %v2854_v34 = vpop.xlane.xlu0 %944  ;;  %v1344_v35 = vpop.xlane.xlu1 %1343 }
 0x258   : > { %2439 = vpow2.f32 %v1588_v31  ;;  %v1360_v36 = vsub.f32 %v2768_v32, %v1344_v35 }
 0x259   : > { %2441 = vpow2.f32 %v1149_v33 }
 0x25a   : > { %v1371_v37 = vmul.f32 1.442695, %v1360_v36 }
 0x25b   : > { %v1563_v39 = vpop.xlane.xlu1 %1562  ;;  %v1113_v40 = vpop.xlane.xlu0 %1112 }
 0x25c   : > { %v1579_v41 = vsub.f32 %v2768_v32, %v1563_v39  ;;  %v1135_v42 = vsub.f32 %v2776_v38, %v1113_v40  ;;  %2443 = vpow2.f32 %v1371_v37 }
 0x25e   : > { %v1590_v44 = vmul.f32 1.442695, %v1579_v41  ;;  %v1143_v45 = vmul.f32 1.442695, %v1135_v42 }
 0x25f   : > { %v1338_v46 = vpop.xlane.xlu1 %1337  ;;  %v1335_v48 = vpop.xlane.xlu0 %1334 }
 0x260   : > { %2445 = vpow2.f32 %v1590_v44  ;;  %v1357_v49 = vsub.f32 %v2776_v38, %v1335_v48  ;;  %v1358_v6 = vsub.f32 %v2784_v43, %v1338_v46 }
 0x261   : > { %v2860_v50 = vpop.eup %2435  ;;  %2447 = vpow2.f32 %v1143_v45 }
 0x262   : > { %v2862_v51 = vpop.eup %2437  ;;  %v1365_v53 = vmul.f32 1.442695, %v1357_v49  ;;  %1393 = vrot.lane.b32.xlu0 %v2860_v50, %s2571_s20  ;;  %v1367_v52 = vmul.f32 1.442695, %v1358_v6  ;;  %v955_v6 = vsel %vm936_vm5, %v2812_v3, -inf }
 0x263   : > { %1171 = vrot.lane.b32.xlu1 %v2862_v51, %s2572_s23  ;;  %v1557_v54 = vpop.xlane.xlu1 %1556  ;;  %v1554_v55 = vpop.xlane.xlu0 %1553 }
 0x264   : > { %v1576_v56 = vsub.f32 %v2776_v38, %v1554_v55  ;;  %2449 = vpow2.f32 %v1365_v53  ;;  %v1577_v2 = vsub.f32 %v2784_v43, %v1557_v54 }
 0x265   : > { %v2869_v59 = vpop.eup %2439 }
 0x266   : > { %v2871_v60 = vpop.eup %2441  ;;  %v1584_v61 = vmul.f32 1.442695, %v1576_v56  ;;  %1612 = vrot.lane.b32.xlu0 %v2869_v59, %s2573_s24  ;;  %v1586_v10 = vmul.f32 1.442695, %v1577_v2 }
 0x267   : > { %1173 = vrot.lane.b32.xlu1 %v2871_v60, %s2572_s23  ;;  %v2877_v62 = vpop.xlane.xlu0 %938  ;;  %v2879_v63 = vpop.xlane.xlu1 %941 }
 0x268   : > { %2451 = vpow2.f32 %v1584_v61 }
 0x269   : > { %v2881_v0 = vpop.eup %2443 }
 0x26b   : > { %1395 = vrot.lane.b32.xlu1 %v2881_v0, %s2571_s20  ;;  %v2885_v1 = vpop.xlane.xlu0 %947  ;;  %v1134_v7 = vpop.xlane.xlu1 %1133 }
 0x26c   : > { %v1142_v19 = vsub.f32 %v2800_v57, %v1134_v7 }
 0x26d   : > { %v2887_v4 = vpop.eup %2445 }
 0x26e   : > { %v2889_v5 = vpop.eup %2447  ;;  %v1157_v22 = vmul.f32 1.442695, %v1142_v19 }
 0x26f   : > { %1614 = vrot.lane.b32.xlu1 %v2887_v4, %s2573_s24  ;;  %1167 = vrot.lane.b32.xlu0 %v2889_v5, %s2572_s23  ;;  %v1116_v9 = vpop.xlane.xlu0 %1115  ;;  %v1356_v15 = vpop.xlane.xlu1 %1355 }
 0x270   : > { %v1136_v11 = vsub.f32 %v2784_v43, %v1116_v9  ;;  %v1364_v25 = vsub.f32 %v2800_v57, %v1356_v15 }
 0x271   : > { %v2897_v58 = vpop.eup %2449 }
 0x272   : > { %v1145_v12 = vmul.f32 1.442695, %v1136_v11  ;;  %v1379_v30 = vmul.f32 1.442695, %v1364_v25 }
 0x273   : > { %1389 = vrot.lane.b32.xlu0 %v2897_v58, %s2571_s20  ;;  %v1131_v14 = vpop.xlane.xlu0 %1130  ;;  %v1575_v23 = vpop.xlane.xlu1 %1574 }
 0x274   : > { %2453 = vpow2.f32 %v1145_v12  ;;  %v1141_v47 = vsub.f32 %v2812_v3, %v1131_v14  ;;  %v1583_v31 = vsub.f32 %v2800_v57, %v1575_v23 }
 0x275   : > { %v2903_v17 = vpop.eup %2451  ;;  %2455 = vpow2.f32 %v1367_v52 }
 0x276   : > { %v1155_v18 = vmul.f32 1.442695, %v1141_v47  ;;  %v1598_v40 = vmul.f32 1.442695, %v1583_v31 }
 0x277   : > { %1608 = vrot.lane.b32.xlu0 %v2903_v17, %s2573_s24  ;;  %v1353_v16 = vpop.xlane.xlu0 %1352  ;;  %v1128_v36 = vpop.xlane.xlu1 %1127 }
 0x278   : > { %2457 = vpow2.f32 %v1155_v18  ;;  %v1363_v20 = vsub.f32 %v2812_v3, %v1353_v16  ;;  %v1140_v41 = vsub.f32 %v2820_v8, %v1128_v36 }
 0x279   : > { %2459 = vpow2.f32 %v1586_v10  ;;  %v958_v10 = vsel %vm936_vm5, %v2800_v57, -inf }
 0x27a   : > { %v1377_v21 = vmul.f32 1.442695, %v1363_v20  ;;  %v1153_v45 = vmul.f32 1.442695, %v1140_v41 }
 0x27b   : > { %v1572_v24 = vpop.xlane.xlu0 %1571  ;;  %v1350_v11 = vpop.xlane.xlu1 %1349 }
 0x27c   : > { %2461 = vpow2.f32 %v1377_v21  ;;  %v1582_v27 = vsub.f32 %v2812_v3, %v1572_v24  ;;  %v1362_v2 = vsub.f32 %v2820_v8, %v1350_v11 }
 0x27d   : > { %2463 = vpow2.f32 %v1157_v22 }
 0x27e   : > { %v1596_v28 = vmul.f32 1.442695, %v1582_v27  ;;  %v1375_v15 = vmul.f32 1.442695, %v1362_v2 }
 0x27f   : > { %v1125_v29 = vpop.xlane.xlu0 %1124  ;;  %v1569_v14 = vpop.xlane.xlu1 %1568 }
 0x280   : > { %2465 = vpow2.f32 %v1596_v28  ;;  %v1139_v33 = vsub.f32 %v2832_v13, %v1125_v29  ;;  %v1581_v18 = vsub.f32 %v2820_v8, %v1569_v14 }
 0x281   : > { %v2913_v35 = vpop.eup %2453  ;;  %2467 = vpow2.f32 %v1379_v30 }
 0x282   : > { %v1151_v37 = vmul.f32 1.442695, %v1139_v33  ;;  %1169 = vrot.lane.b32.xlu1 %v2913_v35, %s2572_s23  ;;  %v2917_v39 = vpop.eup %2455  ;;  %v1594_v19 = vmul.f32 1.442695, %v1581_v18 }
 0x283   : > { %v1347_v61 = vpop.xlane.xlu0 %1346  ;;  %v2982_v23 = vpop.xlane.xlu1 %953 }
 0x284   : > { %2469 = vpow2.f32 %v1151_v37  ;;  %v1361_v7 = vsub.f32 %v2832_v13, %v1347_v61 }
 0x285   : > { %v2920_v42 = vpop.eup %2457  ;;  %2471 = vpow2.f32 %v1598_v40 }
 0x286   : > { %1391 = vrot.lane.b32.xlu1 %v2917_v39, %s2571_s20  ;;  %1179 = vrot.lane.b32.xlu0 %v2920_v42, %s2572_s23  ;;  %v2926_v44 = vpop.eup %2459  ;;  %2473 = vpow2.f32 %v1153_v45  ;;  %v1373_v12 = vmul.f32 1.442695, %v1361_v7 }
 0x287   : > { %v1566_v9 = vpop.xlane.xlu0 %1565 }
 0x288   : > { %v1580_v52 = vsub.f32 %v2832_v13, %v1566_v9  ;;  %2475 = vpow2.f32 %v1373_v12 }
 0x289   : > { %v2928_v46 = vpop.eup %2461 }
 0x28a   : > { %1610 = vrot.lane.b32.xlu1 %v2926_v44, %s2573_s24  ;;  %1401 = vrot.lane.b32.xlu0 %v2928_v46, %s2571_s20  ;;  %v2934_v48 = vpop.eup %2463  ;;  %v1592_v47 = vmul.f32 1.442695, %v1580_v52 }
 0x28b   : > { %v2984_v24 = vpop.xlane.xlu0 %950 }
 0x28c   : > { %2477 = vpow2.f32 %v1592_v47 }
 0x28d   : > { %v2936_v49 = vpop.eup %2465  ;;  %2479 = vpow2.f32 %v1375_v15 }
 0x28e   : > { %1181 = vrot.lane.b32.xlu1 %v2934_v48, %s2572_s23  ;;  %1620 = vrot.lane.b32.xlu0 %v2936_v49, %s2573_s24  ;;  %v2942_v53 = vpop.eup %2467  ;;  %2481 = vpow2.f32 %v1594_v19 }
 0x291   : > { %v2944_v54 = vpop.eup %2469 }
 0x292   : > { %1403 = vrot.lane.b32.xlu1 %v2942_v53, %s2571_s20  ;;  %1175 = vrot.lane.b32.xlu0 %v2944_v54, %s2572_s23  ;;  %v2950_v55 = vpop.eup %2471 }
 0x293   : > { %v2954_v56 = vpop.eup %2473 }
 0x295   : > { %v2966_v16 = vpop.eup %2475 }
 0x296   : > { %1622 = vrot.lane.b32.xlu1 %v2950_v55, %s2573_s24 }
 0x299   : > { %v2970_v20 = vpop.eup %2477 }
 0x29a   : > { %1177 = vrot.lane.b32.xlu1 %v2954_v56, %s2572_s23  ;;  %v2974_v21 = vpop.eup %2479 }
 0x29b   : > { %v2978_v22 = vpop.eup %2481 }
 0x2b1   : > { %956 = vmax.xlane.f32.xlu0 %v955_v6 }
 0x2be   : > { %959 = vmax.xlane.f32.xlu1 %v958_v10 }
 0x2c7   : > { %1397 = vrot.lane.b32.xlu0 %v2966_v16, %s2571_s20 }
 0x2cb   : > { %1616 = vrot.lane.b32.xlu0 %v2970_v20, %s2573_s24 }
 0x2cf   : > { %1399 = vrot.lane.b32.xlu1 %v2974_v21, %s2571_s20 }
 0x2d3   : > { %1618 = vrot.lane.b32.xlu1 %v2978_v22, %s2573_s24 }
 0x2d4   : > { %v1394_v27 = vpop.permute.xlu0 %1393 }
 0x2d5   : > { %v1172_v25 = vpop.permute.xlu1 %1171  ;;  %v1419_v37 = vsel %vm936_vm5, %v1394_v27, 0.0 }
 0x2d6   : > { %v1197_v33 = vsel %vm936_vm5, %v1172_v25, 0.0 }
 0x2d8   : > { %v1613_v29 = vpop.permute.xlu0 %1612 }
 0x2d9   : > { %v1174_v28 = vpop.permute.xlu1 %1173 }
 0x2da   : > { %v1200_v7 = vsel %vm936_vm5, %v1174_v28, 0.0 }
 0x2dd   : > { %v1396_v31 = vpop.permute.xlu1 %1395 }
 0x2de   : > { %v1422_v52 = vsel %vm936_vm5, %v1396_v31, 0.0 }
 0x2e1   : > { %v1168_v30 = vpop.permute.xlu0 %1167  ;;  %v1615_v40 = vpop.permute.xlu1 %1614 }
 0x2e2   : > { %v1191_v41 = vsel %vm936_vm5, %v1168_v30, 0.0 }
 0x2e5   : > { %v1390_v36 = vpop.permute.xlu0 %1389 }
 0x2e6   : > { %v1413_v6 = vsel %vm936_vm5, %v1390_v36, 0.0 }
 0x2e9   : > { %v1609_v45 = vpop.permute.xlu0 %1608 }
 0x2ea   : > { %1198 = vadd.xlane.f32.xlu0 %v1197_v33  ;;  %v1632_v12 = vsel %vm936_vm5, %v1609_v45, 0.0  ;;  %v1638_v33 = vsel %vm936_vm5, %v1613_v29, 0.0  ;;  %v1641_v45 = vsel %vm936_vm5, %v1615_v40, 0.0  ;;  %v963_v29 = vsub.f32 %v2760_v26, %v2854_v34 }
 0x2eb   : > { %v965_v40 = vsub.f32 %v2832_v13, %v2984_v24  ;;  %v966_v13 = vsub.f32 %v2820_v8, %v2982_v23 }
 0x2ee   : > { %1420 = vadd.xlane.f32.xlu0 %v1419_v37 }
 0x2f2   : > { %1192 = vadd.xlane.f32.xlu0 %v1191_v41 }
 0x2f4   : > { %v1170_v61 = vpop.permute.xlu1 %1169 }
 0x2f5   : > { %v1194_v15 = vsel %vm936_vm5, %v1170_v61, 0.0 }
 0x2f6   : > { %1414 = vadd.xlane.f32.xlu0 %v1413_v6  ;;  %v961_v6 = vsub.f32 %v2776_v38, %v2877_v62  ;;  %v964_v38 = vsub.f32 %v2768_v32, %v2885_v1  ;;  %v977_v62 = vmul.f32 1.442695, %v965_v40  ;;  %v979_v32 = vmul.f32 1.442695, %v966_v13 }
 0x2f7   : > { %1201 = vadd.xlane.f32.xlu1 %v1200_v7 }
 0x2f8   : > { %v1392_v9 = vpop.permute.xlu1 %1391  ;;  %v1180_v11 = vpop.permute.xlu0 %1179 }
 0x2f9   : > { %v1209_v47 = vsel %vm936_vm5, %v1180_v11, 0.0  ;;  %v1416_v19 = vsel %vm936_vm5, %v1392_v9, 0.0  ;;  %v969_v9 = vmul.f32 1.442695, %v961_v6  ;;  %v962_v11 = vsub.f32 %v2784_v43, %v2879_v63 }
 0x2fa   : > { %1633 = vadd.xlane.f32.xlu0 %v1632_v12  ;;  %v975_v63 = vmul.f32 1.442695, %v964_v38 }
 0x2fb   : > { %1423 = vadd.xlane.f32.xlu1 %v1422_v52  ;;  %v973_v52 = vmul.f32 1.442695, %v963_v29  ;;  %2483 = vpow2.f32 %v969_v9 }
 0x2fc   : > { %v1611_v2 = vpop.permute.xlu1 %1610  ;;  %v1402_v14 = vpop.permute.xlu0 %1401 }
 0x2fd   : > { %v1635_v30 = vsel %vm936_vm5, %v1611_v2, 0.0  ;;  %2485 = vpow2.f32 %v973_v52  ;;  %v1431_v34 = vsel %vm936_vm5, %v1402_v14, 0.0 }
 0x2fe   : > { %1210 = vadd.xlane.f32.xlu0 %v1209_v47  ;;  %v971_v47 = vmul.f32 1.442695, %v962_v11 }
 0x2ff   : > { %1195 = vadd.xlane.f32.xlu1 %v1194_v15 }
 0x300   : > { %v1182_v18 = vpop.permute.xlu1 %1181  ;;  %v1621_v10 = vpop.permute.xlu0 %1620  ;;  %2487 = vpow2.f32 %v971_v47 }
 0x301   : > { %v1212_v36 = vsel %vm936_vm5, %v1182_v18, 0.0  ;;  %2489 = vpow2.f32 %v977_v62  ;;  %v1650_v14 = vsel %vm936_vm5, %v1621_v10, 0.0 }
 0x302   : > { %2491 = vpow2.f32 %v975_v63 }
 0x303   : > { %1417 = vadd.xlane.f32.xlu1 %v1416_v19 }
 0x304   : > { %v1404_v25 = vpop.permute.xlu1 %1403  ;;  %v1176_v27 = vpop.permute.xlu0 %1175 }
 0x305   : > { %v1203_v28 = vsel %vm936_vm5, %v1176_v27, 0.0  ;;  %v1434_v61 = vsel %vm936_vm5, %v1404_v25, 0.0 }
 0x306   : > { %1204 = vadd.xlane.f32.xlu0 %v1203_v28 }
 0x307   : > { %1636 = vadd.xlane.f32.xlu1 %v1635_v30 }
 0x308   : > { %v1623_v31 = vpop.permute.xlu1 %1622  ;;  %v3022_v25 = vpop.eup %2483 }
 0x309   : > { %v985_v27 = vsel %vm936_vm5, %v3022_v25, 0.0 }
 0x30a   : > { %1639 = vadd.xlane.f32.xlu0 %v1638_v33  ;;  %v3027_v30 = vpop.eup %2485  ;;  %v1653_v33 = vsel %vm936_vm5, %v1623_v31, 0.0 }
 0x30b   : > { %1213 = vadd.xlane.f32.xlu1 %v1212_v36  ;;  %v991_v10 = vsel %vm936_vm5, %v3027_v30, 0.0 }
 0x30c   : > { %v1178_v37 = vpop.permute.xlu1 %1177 }
 0x30d   : > { %v1206_v41 = vsel %vm936_vm5, %v1178_v37, 0.0 }
 0x30f   : > { %1207 = vadd.xlane.f32.xlu1 %v1206_v41 }
 0x313   : > { %1642 = vadd.xlane.f32.xlu1 %v1641_v45 }
 0x317   : > { %1435 = vadd.xlane.f32.xlu1 %v1434_v61 }
 0x33a   : > { %v957_v7 = vpop.xlane.xlu0 %956 }
 0x33b   : > { %v967_v26 = vsub.f32 %v2812_v3, %v957_v7 }
 0x33d   : > { %v981_v15 = vmul.f32 1.442695, %v967_v26 }
 0x33e   : > { %v1398_v12 = vpop.permute.xlu0 %1397 }
 0x33f   : > { %v1425_v2 = vsel %vm936_vm5, %v1398_v12, 0.0  ;;  %2493 = vpow2.f32 %v981_v15  ;;  %v935_v12 = vld [vmem:[%s480_s28] sm:$0xf] }
 0x340   : > { %1426 = vadd.xlane.f32.xlu0 %v1425_v2  ;;  %2495 = vpow2.f32 %v979_v32  ;;  %v2165_v52 = vcombine.low %v935_v12, %v935_v12  ;;  %2330 = vmatprep.subr.msk.bf16.mxu1 %vm1041_vm6, %v935_v12  ;;  %v1043_v2 = vsel %vm1041_vm6, %v935_v12, 0 }
 0x341   : > { %2279 = vmatpush3.bf16.msra.mxu1 %v1043_v2 }
 0x342   : > { %v1617_v43 = vpop.permute.xlu0 %1616 }
 0x343   : > { %v1644_v18 = vsel %vm936_vm5, %v1617_v43, 0.0 }
 0x344   : > { %1432 = vadd.xlane.f32.xlu0 %v1431_v34 }
 0x347   : > { %v960_v24 = vpop.xlane.xlu1 %959 }
 0x348   : > { %1645 = vadd.xlane.f32.xlu0 %v1644_v18  ;;  %v968_v3 = vsub.f32 %v2800_v57, %v960_v24  ;;  %v3029_v57 = vpop.eup %2487 }
 0x349   : > { %v3034_v36 = vpop.eup %2489  ;;  %v988_v45 = vsel %vm936_vm5, %v3029_v57, 0.0 }
 0x34a   : > { %v983_v23 = vmul.f32 1.442695, %v968_v3  ;;  %v3036_v37 = vpop.eup %2491  ;;  %v997_v41 = vsel %vm936_vm5, %v3034_v36, 0.0 }
 0x34b   : > { %v1400_v1 = vpop.permute.xlu1 %1399  ;;  %v994_v6 = vsel %vm936_vm5, %v3036_v37, 0.0 }
 0x34c   : > { %v1428_v19 = vsel %vm936_vm5, %v1400_v1, 0.0  ;;  %1651 = vadd.xlane.f32.xlu0 %v1650_v14  ;;  %2497 = vpow2.f32 %v983_v23  ;;  %v3042_v61 = vpop.eup %2493 }
 0x34d   : > { %1429 = vadd.xlane.f32.xlu1 %v1428_v19  ;;  %v1003_v31 = vsel %vm936_vm5, %v3042_v61, 0.0  ;;  %v3048_v7 = vpop.eup %2495 }
 0x34e   : > { %v1000_v29 = vsel %vm936_vm5, %v3048_v7, 0.0 }
 0x34f   : > { %v1619_v8 = vpop.permute.xlu1 %1618 }
 0x350   : > { %v1647_v28 = vsel %vm936_vm5, %v1619_v8, 0.0  ;;  %986 = vadd.xlane.f32.xlu0 %v985_v27 }
 0x351   : > { %1648 = vadd.xlane.f32.xlu1 %v1647_v28 }
 0x354   : > { %992 = vadd.xlane.f32.xlu0 %v991_v10 }
 0x355   : > { %1654 = vadd.xlane.f32.xlu1 %v1653_v33 }
 0x358   : > { %998 = vadd.xlane.f32.xlu0 %v997_v41 }
 0x359   : > { %989 = vadd.xlane.f32.xlu1 %v988_v45  ;;  %v3052_v9 = vpop.eup %2497 }
 0x35a   : > { %v1006_v11 = vsel %vm936_vm5, %v3052_v9, 0.0 }
 0x35c   : > { %1004 = vadd.xlane.f32.xlu0 %v1003_v31 }
 0x35d   : > { %995 = vadd.xlane.f32.xlu1 %v994_v6 }
 0x361   : > { %1001 = vadd.xlane.f32.xlu1 %v1000_v29 }
 0x365   : > { %1007 = vadd.xlane.f32.xlu1 %v1006_v11 }
 0x372   : > { %1250 = vrot.lane.b32.xlu0 %v2165_v52, %s2572_s23 }
 0x373   : > { %v1199_v40 = vpop.xlane.xlu0 %1198 }
 0x374   : > { %2499 = vrcp.f32 %v1199_v40 }
 0x376   : > { %1688 = vrot.lane.b32.xlu0 %v2165_v52, %s2573_s24 }
 0x377   : > { %v1421_v47 = vpop.xlane.xlu0 %1420 }
 0x37b   : > { %v1193_v38 = vpop.xlane.xlu0 %1192 }
 0x37f   : > { %v1415_v26 = vpop.xlane.xlu0 %1414 }
 0x380   : > { %v1202_v62 = vpop.xlane.xlu1 %1201 }
 0x381   : > { %2501 = vrcp.f32 %v1202_v62  ;;  %v2500_v24 = vpop.eup %2499 }
 0x382   : > { %2503 = vrcp.f32 %v1193_v38  ;;  %v1225_v1 = vmul.f32 %v2500_v24, %v2862_v51 }
 0x383   : > { %v1634_v43 = vpop.xlane.xlu0 %1633 }
 0x384   : > { %v1424_v34 = vpop.xlane.xlu1 %1423 }
 0x387   : > { %v1211_v15 = vpop.xlane.xlu0 %1210 }
 0x388   : > { %v1196_v63 = vpop.xlane.xlu1 %1195 }
 0x389   : > { %2505 = vrcp.f32 %v1196_v63 }
 0x38a   : > { %2507 = vrcp.f32 %v1421_v47 }
 0x38b   : > { %2509 = vrcp.f32 %v1211_v15 }
 0x38c   : > { %v1418_v13 = vpop.xlane.xlu1 %1417  ;;  %2511 = vrcp.f32 %v1424_v34 }
 0x38e   : > { %v2502_v18 = vpop.eup %2501 }
 0x38f   : > { %v1226_v3 = vmul.f32 %v2502_v18, %v2871_v60  ;;  %v1205_v14 = vpop.xlane.xlu0 %1204  ;;  %v2504_v23 = vpop.eup %2503 }
 0x390   : > { %v1637_v32 = vpop.xlane.xlu1 %1636  ;;  %v1223_v33 = vmul.f32 %v2504_v23, %v2889_v5 }
 0x391   : > { %v1232_v19 = vpack.c.bf16 %v1226_v3, %v1225_v1 }
 0x393   : > { %1241 = vrot.lane.b32.xlu1 %v1232_v19, %s2572_s23  ;;  %v1640_v28 = vpop.xlane.xlu0 %1639 }
 0x394   : > { %v1214_v8 = vpop.xlane.xlu1 %1213 }
 0x395   : > { %2513 = vrcp.f32 %v1214_v8 }
 0x396   : > { %v2506_v27 = vpop.eup %2505  ;;  %2515 = vrcp.f32 %v1205_v14 }
 0x397   : > { %2517 = vrcp.f32 %v1418_v13  ;;  %v1224_v51 = vmul.f32 %v2506_v27, %v2913_v35  ;;  %v2508_v45 = vpop.eup %2507 }
 0x398   : > { %v1208_v10 = vpop.xlane.xlu1 %1207  ;;  %v2510_v31 = vpop.eup %2509 }
 0x399   : > { %2519 = vrcp.f32 %v1208_v10  ;;  %v1231_v60 = vpack.c.bf16 %v1224_v51, %v1223_v33  ;;  %v2512_v6 = vpop.eup %2511  ;;  %v1229_v5 = vmul.f32 %v2510_v31, %v2920_v42 }
 0x39a   : > { %2521 = vrcp.f32 %v1415_v26  ;;  %v1448_v47 = vmul.f32 %v2512_v6, %v2881_v0 }
 0x39b   : > { %2523 = vrcp.f32 %v1640_v28  ;;  %1239 = vrot.lane.b32.xlu1 %v1231_v60, %s2572_s23 }
 0x39c   : > { %2525 = vrcp.f32 %v1637_v32  ;;  %v1643_v41 = vpop.xlane.xlu1 %1642 }
 0x39d   : > { %2527 = vrcp.f32 %v1643_v41 }
 0x39e   : > { %2529 = vrcp.f32 %v1634_v43 }
 0x39f   : > { %1469 = vrot.lane.b32.xlu1 %v2165_v52, %s2571_s20  ;;  %v1447_v52 = vmul.f32 %v2508_v45, %v2860_v50 }
 0x3a1   : > { %v1454_v13 = vpack.c.bf16 %v1448_v47, %v1447_v52 }
 0x3a2   : > { %v2514_v29 = vpop.eup %2513 }
 0x3a3   : > { %v2516_v11 = vpop.eup %2515  ;;  %v1230_v35 = vmul.f32 %v2514_v29, %v2934_v48 }
 0x3a4   : > { %v2518_v12 = vpop.eup %2517  ;;  %v1227_v62 = vmul.f32 %v2516_v11, %v2944_v54 }
 0x3a5   : > { %v1234_v2 = vpack.c.bf16 %v1230_v35, %v1229_v5  ;;  %v1446_v42 = vmul.f32 %v2518_v12, %v2917_v39 }
 0x3a6   : > { %v2520_v40 = vpop.eup %2519 }
 0x3a7   : > { %v2522_v38 = vpop.eup %2521  ;;  %v1228_v26 = vmul.f32 %v2520_v40, %v2954_v56  ;;  %1245 = vrot.lane.b32.xlu0 %v1234_v2, %s2572_s23 }
 0x3a8   : > { %v2524_v34 = vpop.eup %2523  ;;  %v1445_v0 = vmul.f32 %v2522_v38, %v2897_v58  ;;  %v1436_v58 = vpop.xlane.xlu1 %1435 }
 0x3a9   : > { %v2526_v43 = vpop.eup %2525  ;;  %v1233_v63 = vpack.c.bf16 %v1228_v26, %v1227_v62  ;;  %v1666_v24 = vmul.f32 %v2524_v34, %v2869_v59  ;;  %2531 = vrcp.f32 %v1436_v58 }
 0x3aa   : > { %v2528_v48 = vpop.eup %2527  ;;  %v1453_v15 = vpack.c.bf16 %v1446_v42, %v1445_v0  ;;  %v1665_v50 = vmul.f32 %v2526_v43, %v2926_v44 }
 0x3ab   : > { %1243 = vrot.lane.b32.xlu1 %v1233_v63, %s2572_s23  ;;  %v1667_v54 = vmul.f32 %v2528_v48, %v2887_v4  ;;  %v2530_v56 = vpop.eup %2529  ;;  %1463 = vrot.lane.b32.xlu0 %v1454_v13, %s2571_s20 }
 0x3ac   : > { %v1664_v39 = vmul.f32 %v2530_v56, %v2903_v17 }
 0x3ad   : > { %v1673_v18 = vpack.c.bf16 %v1667_v54, %v1666_v24 }
 0x3ae   : > { %v1672_v32 = vpack.c.bf16 %v1665_v50, %v1664_v39 }
 0x3af   : > { %1461 = vrot.lane.b32.xlu1 %v1453_v15, %s2571_s20  ;;  %1682 = vrot.lane.b32.xlu0 %v1673_v18, %s2573_s24 }
 0x3b3   : > { %1680 = vrot.lane.b32.xlu1 %v1672_v32, %s2573_s24 }
 0x3b6   : > { %v2532_v44 = vpop.eup %2531 }
 0x3b7   : > { %v1452_v27 = vmul.f32 %v2532_v44, %v2942_v53 }
 0x3c9   : > { %v1427_v59 = vpop.xlane.xlu0 %1426 }
 0x3cd   : > { %v1433_v4 = vpop.xlane.xlu0 %1432 }
 0x3ce   : > { %2533 = vrcp.f32 %v1433_v4 }
 0x3cf   : > { %2535 = vrcp.f32 %v1427_v59 }
 0x3d1   : > { %v1646_v1 = vpop.xlane.xlu0 %1645 }
 0x3d5   : > { %v1652_v3 = vpop.xlane.xlu0 %1651 }
 0x3d6   : > { %v1430_v14 = vpop.xlane.xlu1 %1429 }
 0x3d7   : > { %2537 = vrcp.f32 %v1430_v14 }
 0x3d8   : > { %2539 = vrcp.f32 %v1646_v1 }
 0x3d9   : > { %v987_v19 = vpop.xlane.xlu0 %986 }
 0x3da   : > { %v1649_v8 = vpop.xlane.xlu1 %1648 }
 0x3db   : > { %v2534_v17 = vpop.eup %2533  ;;  %2541 = vrcp.f32 %v1649_v8 }
 0x3dc   : > { %v1451_v23 = vmul.f32 %v2534_v17, %v2928_v46  ;;  %2543 = vrcp.f32 %v1652_v3  ;;  %v2536_v41 = vpop.eup %2535 }
 0x3dd   : > { %v993_v28 = vpop.xlane.xlu0 %992  ;;  %v1449_v46 = vmul.f32 %v2536_v41, %v2966_v16 }
 0x3de   : > { %v1655_v10 = vpop.xlane.xlu1 %1654  ;;  %v1456_v33 = vpack.c.bf16 %v1452_v27, %v1451_v23 }
 0x3df   : > { %2545 = vrcp.f32 %v1655_v10 }
 0x3e0   : > { %1467 = vrot.lane.b32.xlu0 %v1456_v33, %s2571_s20  ;;  %2547 = vrcp.f32 %v987_v19 }
 0x3e1   : > { %v999_v51 = vpop.xlane.xlu0 %998 }
 0x3e2   : > { %v990_v60 = vpop.xlane.xlu1 %989 }
 0x3e3   : > { %2549 = vrcp.f32 %v990_v60 }
 0x3e4   : > { %v2538_v45 = vpop.eup %2537  ;;  %2551 = vrcp.f32 %v993_v28 }
 0x3e5   : > { %v1005_v31 = vpop.xlane.xlu0 %1004  ;;  %v1450_v53 = vmul.f32 %v2538_v45, %v2974_v21  ;;  %v2540_v29 = vpop.eup %2539 }
 0x3e6   : > { %v996_v6 = vpop.xlane.xlu1 %995  ;;  %v1668_v12 = vmul.f32 %v2540_v29, %v2970_v20 }
 0x3e7   : > { %2553 = vrcp.f32 %v996_v6  ;;  %v1455_v11 = vpack.c.bf16 %v1450_v53, %v1449_v46 }
 0x3e8   : > { %v2542_v5 = vpop.eup %2541  ;;  %2555 = vrcp.f32 %v999_v51 }
 0x3e9   : > { %1465 = vrot.lane.b32.xlu1 %v1455_v11, %s2571_s20  ;;  %v1669_v40 = vmul.f32 %v2542_v5, %v2978_v22  ;;  %v1251_v2 = vpop.permute.xlu0 %1250  ;;  %v2544_v47 = vpop.eup %2543  ;;  %s3197_s20 = scalar_lea.vmem %s3239_s4, %s2665_s13 }
 0x3ea   : > { %v1002_v35 = vpop.xlane.xlu1 %1001  ;;  %v1265_v38 = vsel %vm1041_vm6, %v1251_v2, 0  ;;  %2331 = vmatprep.subr.msk.bf16.mxu0 %vm1041_vm6, %v1251_v2  ;;  %v1670_v26 = vmul.f32 %v2544_v47, %v2936_v49 }
 0x3eb   : > { %2557 = vrcp.f32 %v1002_v35  ;;  %v1674_v16 = vpack.c.bf16 %v1669_v40, %v1668_v12  ;;  %2289 = vmatpush3.bf16.msra.mxu0 %v1265_v38  ;;  %v2417_v40 = vld [vmem:[%s3245_s10 + $0x8] sm:$0xff]  }
 0x3ec   : > { %v2546_v21 = vpop.eup %2545  ;;  %2559 = vrcp.f32 %v1005_v31 }
 0x3ed   : > { %1684 = vrot.lane.b32.xlu1 %v1674_v16, %s2573_s24  ;;  %v1671_v20 = vmul.f32 %v2546_v21, %v2950_v55  ;;  %v1689_v34 = vpop.permute.xlu0 %1688  ;;  %v2548_v22 = vpop.eup %2547 }
 0x3ee   : > { %v1008_v62 = vpop.xlane.xlu1 %1007  ;;  %2333 = vmatprep.subr.msk.bf16.mxu0 %vm1041_vm6, %v1689_v34  ;;  %v1017_v63 = vmul.f32 %v2548_v22, %v3022_v25 }
 0x3ef   : > { %2561 = vrcp.f32 %v1008_v62  ;;  %v1675_v52 = vpack.c.bf16 %v1671_v20, %v1670_v26  ;;  %v2418_v62 = vld [vmem:[%s3245_s10] sm:$0xff]  }
 0x3f0   : > { %v2550_v43 = vpop.eup %2549 }
 0x3f1   : > { %1686 = vrot.lane.b32.xlu0 %v1675_v52, %s2573_s24  ;;  %v1018_v42 = vmul.f32 %v2550_v43, %v3029_v57  ;;  %v2552_v48 = vpop.eup %2551 }
 0x3f2   : > { %v1019_v49 = vmul.f32 %v2552_v48, %v3027_v30 }
 0x3f3   : > { %v1025_v13 = vpack.c.bf16 %v1018_v42, %v1017_v63 }
 0x3f4   : > { %v2554_v0 = vpop.eup %2553 }
 0x3f5   : > { %v2556_v24 = vpop.eup %2555  ;;  %v1020_v55 = vmul.f32 %v2554_v0, %v3036_v37  ;;  %2280 = vmatprep.mubr.msk.bf16.mxu1 %vm936_vm5, %v1025_v13 }
 0x3f6   : > { %v1021_v15 = vmul.f32 %v2556_v24, %v3034_v36  ;;  %v1703_v36 = vsel %vm1041_vm6, %v1689_v34, 0 }
 0x3f7   : > { %v1026_v56 = vpack.c.bf16 %v1020_v55, %v1019_v49 }
 0x3f8   : > { %v2558_v54 = vpop.eup %2557 }
 0x3f9   : > { %v1022_v18 = vmul.f32 %v2558_v54, %v3048_v7  ;;  %v2560_v50 = vpop.eup %2559  ;;  %2281 = vmatmul.mubr.msk.bf16.vlgmr.msra.gmra.mxu1 %vm936_vm5, %v1026_v56 }
 0x3fa   : > { %v1023_v39 = vmul.f32 %v2560_v50, %v3042_v61 }
 0x3fb   : > { %v1027_v25 = vpack.c.bf16 %v1022_v18, %v1021_v15 }
 0x3fc   : > { %v2562_v57 = vpop.eup %2561 }
 0x3fd   : > { %2284 = vmatprep.mubr.msk.bf16.mxu1 %vm936_vm5, %v1027_v25  ;;  %v1024_v30 = vmul.f32 %v2562_v57, %v3052_v9 }
 0x3ff   : > { %v1028_v37 = vpack.c.bf16 %v1024_v30, %v1023_v39 }
 0x401   : > { %2285 = vmatmul.mubr.msk.bf16.gmra.mxu1 %vm936_vm5, %v1028_v37 }
 0x405   : > { %v1242_v32 = vpop.permute.xlu1 %1241 }
 0x40d   : > { %v1240_v58 = vpop.permute.xlu1 %1239 }
 0x40e   : > { %2290 = vmatprep.mubr.msk.bf16.mxu0 %vm936_vm5, %v1240_v58 }
 0x40f   : > { %2291 = vmatmul.mubr.msk.bf16.vlgmr.msra.gmra.mxu0 %vm936_vm5, %v1242_v32 }
 0x410   : > { %2309 = vmatpush3.bf16.msra.mxu0 %v1703_v36 }
 0x411   : > { %v1470_v7 = vpop.permute.xlu1 %1469 }
 0x412   : > { %v1484_v59 = vsel %vm1041_vm6, %v1470_v7, 0  ;;  %2332 = vmatprep.subr.msk.bf16.mxu1 %vm1041_vm6, %v1470_v7 }
 0x413   : > { %2299 = vmatpush3.bf16.msra.mxu1 %v1484_v59 }
 0x414   : > { %2318 = vmatprep.subr.bf16.mxu1 %v2417_v40 }
 0x419   : > { %v1246_v61 = vpop.permute.xlu0 %1245 }
 0x41d   : > { %v1244_v9 = vpop.permute.xlu1 %1243  ;;  %v1464_v4 = vpop.permute.xlu0 %1463 }
 0x41e   : > { %2294 = vmatprep.mubr.msk.bf16.mxu0 %vm936_vm5, %v1244_v9 }
 0x41f   : > { %2295 = vmatmul.mubr.msk.bf16.gmra.mxu0 %vm936_vm5, %v1246_v61 }
 0x421   : > { %v1462_v1 = vpop.permute.xlu1 %1461  ;;  %v1683_v14 = vpop.permute.xlu0 %1682 }
 0x422   : > { %2300 = vmatprep.mubr.msk.bf16.mxu1 %vm936_vm5, %v1462_v1 }
 0x423   : > { %2301 = vmatmul.mubr.msk.bf16.vlgmr.msra.gmra.mxu1 %vm936_vm5, %v1464_v4 }
 0x424   : > { %2319 = vmatpush3.bf16.msra.mxu1 %v2417_v40 }
 0x425   : > { %v1681_v3 = vpop.permute.xlu1 %1680  ;;  %2320 = vmatprep.subr.bf16.mxu1 %v2418_v62 }
 0x426   : > { %2310 = vmatprep.mubr.msk.bf16.mxu0 %vm936_vm5, %v1681_v3 }
 0x427   : > { %2311 = vmatmul.mubr.msk.bf16.vlgmr.msra.gmra.mxu0 %vm936_vm5, %v1683_v14 }
 0x428   : > { %2321 = vmatpush3.bf16.msra.mxu1 %v2418_v62 }
 0x452   : > { %v1468_v19 = vpop.permute.xlu0 %1467 }
 0x45b   : > { %v1466_v44 = vpop.permute.xlu1 %1465 }
 0x45c   : > { %2304 = vmatprep.mubr.msk.bf16.mxu1 %vm936_vm5, %v1466_v44 }
 0x45d   : > { %2305 = vmatmul.mubr.msk.bf16.gmra.mxu1 %vm936_vm5, %v1468_v19 }
 0x45f   : > { %v1685_v8 = vpop.permute.xlu1 %1684 }
 0x460   : > { %2314 = vmatprep.mubr.msk.bf16.mxu0 %vm936_vm5, %v1685_v8 }
 0x463   : > { %v1687_v17 = vpop.permute.xlu0 %1686 }
 0x464   : > { %2315 = vmatmul.mubr.msk.bf16.gmra.mxu0 %vm936_vm5, %v1687_v17 }
 0x4b9   : > { %v3131_v23 = vpop.f32.mrf.mxu1 }
 0x4bb   : > { %v3133_v27 = vpop.f32.mrf.mxu1 }
 0x4bd   : > { %v3135_v28 = vpop.f32.mrf.mxu1 }
 0x4bf   : > { %v3137_v33 = vpop.f32.mrf.mxu1 }
 0x4c1   : > { %v3139_v41 = vpop.f32.mrf.mxu1 }
 0x4c3   : > { %v3142_v46 = vpop.f32.mrf.mxu1 }
 0x4c5   : > { %v3145_v53 = vpop.f32.mrf.mxu1 }
 0x4c7   : > { %v3147_v11 = vpop.f32.mrf.mxu1 }
 0x4cf   : > { %v2292_v10 = vpop.f32.mrf.mxu0 }
 0x4d1   : > { %v1301_v51 = vpop.f32.mrf.mxu0 }
 0x4d3   : > { %v2293_v60 = vpop.f32.mrf.mxu0 }
 0x4d4   : > { %v2348_v45 = vpack.i.bf16 %v2293_v60, %v2292_v10 }
 0x4d5   : > { %v1304_v31 = vpop.f32.mrf.mxu0 }
 0x4d6   : > { %v2358_v6 = vpack.i.bf16 %v1304_v31, %v1301_v51  ;;  %2349 = vrot.lane.b32.xlu0 %v2348_v45, %s2574_s22 }
 0x4d8   : > { %2359 = vrot.lane.b32.xlu1 %v2358_v6, %s2574_s22 }
 0x4df   : > { %v2296_v29 = vpop.f32.mrf.mxu0 }
 0x4e1   : > { %v1317_v5 = vpop.f32.mrf.mxu0 }
 0x4e3   : > { %v2297_v35 = vpop.f32.mrf.mxu0  ;;  %v2302_v12 = vpop.f32.mrf.mxu1 }
 0x4e4   : > { %v2368_v52 = vpack.i.bf16 %v2297_v35, %v2296_v29 }
 0x4e5   : > { %v1320_v2 = vpop.f32.mrf.mxu0  ;;  %v1520_v47 = vpop.f32.mrf.mxu1 }
 0x4e6   : > { %v2373_v43 = vpack.i.bf16 %v1320_v2, %v1317_v5 }
 0x4e7   : > { %v2303_v38 = vpop.f32.mrf.mxu1  ;;  %v2312_v16 = vpop.f32.mrf.mxu0 }
 0x4e8   : > { %v2353_v21 = vpack.i.bf16 %v2303_v38, %v2302_v12 }
 0x4e9   : > { %v1523_v26 = vpop.f32.mrf.mxu1  ;;  %v1739_v20 = vpop.f32.mrf.mxu0 }
 0x4ea   : > { %v2363_v34 = vpack.i.bf16 %v1523_v26, %v1520_v47  ;;  %2354 = vrot.lane.b32.xlu0 %v2353_v21, %s2575_s16 }
 0x4eb   : > { %v2313_v22 = vpop.f32.mrf.mxu0 }
 0x4ec   : > { %2364 = vrot.lane.b32.xlu1 %v2363_v34, %s2575_s16  ;;  %v2378_v42 = vpack.i.bf16 %v2313_v22, %v2312_v16 }
 0x4ed   : > { %v1742_v63 = vpop.f32.mrf.mxu0 }
 0x4ee   : > { %2369 = vrot.lane.b32.xlu0 %v2368_v52, %s2574_s22  ;;  %v2383_v48 = vpack.i.bf16 %v1742_v63, %v1739_v20 }
 0x4f0   : > { %2374 = vrot.lane.b32.xlu1 %v2373_v43, %s2574_s22 }
 0x4f2   : > { %2379 = vrot.lane.b32.xlu0 %v2378_v42, %s2576_s17 }
 0x4f4   : > { %2384 = vrot.lane.b32.xlu1 %v2383_v48, %s2576_s17 }
 0x51d   : > { %v2306_v13 = vpop.f32.mrf.mxu1 }
 0x51f   : > { %v1536_v0 = vpop.f32.mrf.mxu1 }
 0x521   : > { %v2307_v24 = vpop.f32.mrf.mxu1 }
 0x522   : > { %v2393_v49 = vpack.i.bf16 %v2307_v24, %v2306_v13 }
 0x523   : > { %v1539_v55 = vpop.f32.mrf.mxu1 }
 0x524   : > { %v2388_v54 = vpack.i.bf16 %v1539_v55, %v1536_v0  ;;  %2394 = vrot.lane.b32.xlu0 %v2393_v49, %s2575_s16  ;;  %v2316_v56 = vpop.f32.mrf.mxu0 }
 0x526   : > { %2389 = vrot.lane.b32.xlu1 %v2388_v54, %s2575_s16  ;;  %v1755_v15 = vpop.f32.mrf.mxu0 }
 0x528   : > { %v2317_v18 = vpop.f32.mrf.mxu0 }
 0x529   : > { %v2403_v50 = vpack.i.bf16 %v2317_v18, %v2316_v56 }
 0x52a   : > { %v1758_v25 = vpop.f32.mrf.mxu0 }
 0x52b   : > { %v2398_v57 = vpack.i.bf16 %v1758_v25, %v1755_v15  ;;  %2404 = vrot.lane.b32.xlu0 %v2403_v50, %s2576_s17 }
 0x52d   : > { %2399 = vrot.lane.b32.xlu1 %v2398_v57, %s2576_s17 }
 0x548   : > { %v2350_v39 = vpop.permute.xlu0 %2349 }
 0x549   : > { %v2352_v36 = vunpack.i.h.bf16 %v2350_v39  ;;  %v2351_v7 = vunpack.i.l.bf16 %v2350_v39  ;;  %v2178_v39 = vld [vmem:[%s3246_s11] ss:$0 sm:$0xff] }
 0x54a   : > { %v2360_v30 = vpop.permute.xlu1 %2359 }
 0x54b   : > { %v2362_v59 = vunpack.i.h.bf16 %v2360_v30  ;;  %v2361_v61 = vunpack.i.l.bf16 %v2360_v30  ;;  %v1869_v17 = vsel %vm936_vm5, %v3135_v28, %v2352_v36  ;;  %v1868_v10 = vsel %vm936_vm5, %v3131_v23, %v2351_v7  ;;  %v1996_v36 = vld [vmem:[%s3197_s20] sm:$0xff] }
 0x54d   : > { %v1867_v51 = vsel %vm936_vm5, %v3137_v33, %v2362_v59  ;;  %v1866_v60 = vsel %vm936_vm5, %v3133_v27, %v2361_v61 }
 0x55c   : > { %v2355_v37 = vpop.permute.xlu0 %2354 }
 0x55d   : > { %v2357_v4 = vunpack.i.h.bf16 %v2355_v37  ;;  %v2356_v1 = vunpack.i.l.bf16 %v2355_v37  ;;  %v1998_v37 = vld [vmem:[%s3197_s20 + $0x10] sm:$0xff] }
 0x55e   : > { %v2365_v32 = vpop.permute.xlu1 %2364 }
 0x55f   : > { %v2367_v3 = vunpack.i.h.bf16 %v2365_v32  ;;  %v2366_v14 = vunpack.i.l.bf16 %v2365_v32  ;;  %v1877_v31 = vsel %vm1874_vm7, %v1868_v10, %v2356_v1  ;;  %v1878_v6 = vsel %vm1874_vm7, %v1869_v17, %v2357_v4  ;;  %v2002_v10 = vld [vmem:[%s3197_s20 + $0x30] sm:$0xff] }
 0x560   : > { %v2370_v58 = vpop.permute.xlu0 %2369 }
 0x561   : > { %v1876_v35 = vsel %vm1874_vm7, %v1867_v51, %v2367_v3  ;;  %v1875_v28 = vsel %vm1874_vm7, %v1866_v60, %v2366_v14  ;;  %v2372_v16 = vunpack.i.h.bf16 %v2370_v58  ;;  %v2371_v21 = vunpack.i.l.bf16 %v2370_v58  ;;  %v1997_v14 = vld [vmem:[%s3197_s20 + $0x8] sm:$0xff] }
 0x562   : > { %v2375_v9 = vpop.permute.xlu1 %2374 }
 0x563   : > { %v2377_v62 = vunpack.i.h.bf16 %v2375_v9  ;;  %v2376_v26 = vunpack.i.l.bf16 %v2375_v9  ;;  %v1873_v48 = vsel %vm936_vm5, %v3145_v53, %v2372_v16  ;;  %v1872_v13 = vsel %vm936_vm5, %v3139_v41, %v2371_v21  ;;  %v1999_v9 = vld [vmem:[%s3197_s20 + $0x18] sm:$0xff] }
 0x564   : > { %v2380_v44 = vpop.permute.xlu0 %2379 }
 0x565   : > { %v2382_v19 = vunpack.i.h.bf16 %v2380_v44  ;;  %v2381_v8 = vunpack.i.l.bf16 %v2380_v44  ;;  %v1871_v0 = vsel %vm936_vm5, %v3147_v11, %v2377_v62  ;;  %v1870_v24 = vsel %vm936_vm5, %v3142_v46, %v2376_v26 }
 0x566   : > { %v2385_v45 = vpop.permute.xlu1 %2384 }
 0x567   : > { %v2387_v29 = vunpack.i.h.bf16 %v2385_v45  ;;  %v2386_v5 = vunpack.i.l.bf16 %v2385_v45  ;;  %v1886_v12 = vsel %vm1883_vm8, %v1877_v31, %v2381_v8  ;;  %v1887_v23 = vsel %vm1883_vm8, %v1878_v6, %v2382_v19  ;;  %v2000_v45 = vld [vmem:[%s3197_s20 + $0x20] sm:$0xff] }
 0x568   : > { %v1893_v2 = vpack.c.bf16 %v1887_v23, %v1886_v12  ;;  %v2001_v23 = vld [vmem:[%s3197_s20 + $0x28] sm:$0xff] }
 0x569   : > { %v1885_v33 = vsel %vm1883_vm8, %v1876_v35, %v2387_v29  ;;  %v1884_v40 = vsel %vm1883_vm8, %v1875_v28, %v2386_v5  ;;  %v2003_v5 = vld [vmem:[%s3197_s20 + $0x38] sm:$0xff] }
 0x56a   : > { %v1892_v27 = vpack.c.bf16 %v1885_v33, %v1884_v40 }
 0x56c   : > { %2322 = vmatprep.mubr.msk.bf16.mxu1 %vm544_vm0, %v1892_v27 }
 0x56d   : > { %2323 = vmatmul.mubr.msk.bf16.vlgmr.msra.gmra.mxu1 %vm544_vm0, %v1893_v2 }
 0x596   : > { %v2395_v47 = vpop.permute.xlu0 %2394 }
 0x597   : > { %v2397_v20 = vunpack.i.h.bf16 %v2395_v47  ;;  %v2396_v34 = vunpack.i.l.bf16 %v2395_v47 }
 0x598   : > { %v2390_v38 = vpop.permute.xlu1 %2389 }
 0x599   : > { %v2392_v22 = vunpack.i.h.bf16 %v2390_v38  ;;  %v2391_v52 = vunpack.i.l.bf16 %v2390_v38  ;;  %v1881_v55 = vsel %vm1874_vm7, %v1872_v13, %v2396_v34  ;;  %v1882_v54 = vsel %vm1874_vm7, %v1873_v48, %v2397_v20 }
 0x59b   : > { %v1880_v53 = vsel %vm1874_vm7, %v1871_v0, %v2392_v22  ;;  %v1879_v18 = vsel %vm1874_vm7, %v1870_v24, %v2391_v52 }
 0x59d   : > { %v2405_v43 = vpop.permute.xlu0 %2404 }
 0x59e   : > { %v2407_v63 = vunpack.i.h.bf16 %v2405_v43  ;;  %v2406_v42 = vunpack.i.l.bf16 %v2405_v43 }
 0x59f   : > { %v2400_v49 = vpop.permute.xlu1 %2399 }
 0x5a0   : > { %v2402_v56 = vunpack.i.h.bf16 %v2400_v49  ;;  %v2401_v15 = vunpack.i.l.bf16 %v2400_v49  ;;  %v1890_v41 = vsel %vm1883_vm8, %v1881_v55, %v2406_v42  ;;  %v1891_v11 = vsel %vm1883_vm8, %v1882_v54, %v2407_v63 }
 0x5a1   : > { %v1895_v57 = vpack.c.bf16 %v1891_v11, %v1890_v41 }
 0x5a2   : > { %v1889_v50 = vsel %vm1883_vm8, %v1880_v53, %v2402_v56  ;;  %v1888_v46 = vsel %vm1883_vm8, %v1879_v18, %v2401_v15 }
 0x5a3   : > { %v1894_v25 = vpack.c.bf16 %v1889_v50, %v1888_v46 }
 0x5a5   : > { %2326 = vmatprep.mubr.msk.bf16.mxu1 %vm544_vm0, %v1894_v25 }
 0x5a6   : > { %2327 = vmatmul.mubr.msk.bf16.gmra.mxu1 %vm544_vm0, %v1895_v57 }
 0x62d   : > { %v2324_v30 = vpop.f32.mrf.mxu1 }
 0x62e   : > { %v1974_v32 = vadd.f32 %v2324_v30, %v2178_v39 }
 0x62f   : > { %v1965_v58 = vpop.f32.mrf.mxu1 }
 0x630   : > { %v2006_v7 = vadd.f32 %v1998_v37, %v1974_v32  ;;  %v1966_v59 = vadd.f32 %v2178_v39, %v1965_v58 }
 0x631   : > { %v2325_v61 = vpop.f32.mrf.mxu1 }
 0x632   : > { %2014 = vst.msk [vmem:[%s3207_s27 + $0x10] sm:$0xff] %vm544_vm0, %v2006_v7  ;;  %v2004_v4 = vadd.f32 %v1996_v36, %v1966_v59  ;;  %v1977_v1 = vadd.f32 %v2325_v61, %v2178_v39 }
 0x633   : > { %v1968_v3 = vpop.f32.mrf.mxu1 }
 0x634   : > { %2012 = vst.msk [vmem:[%s3207_s27] sm:$0xff] %vm544_vm0, %v2004_v4  ;;  %v2007_v44 = vadd.f32 %v1999_v9, %v1977_v1  ;;  %v1969_v19 = vadd.f32 %v2178_v39, %v1968_v3 }
 0x636   : > { %2015 = vst.msk [vmem:[%s3207_s27 + $0x18] sm:$0xff] %vm544_vm0, %v2007_v44  ;;  %v2005_v8 = vadd.f32 %v1997_v14, %v1969_v19 }
 0x638   : > { %2013 = vst.msk [vmem:[%s3207_s27 + $0x8] sm:$0xff] %vm544_vm0, %v2005_v8 }
 0x666   : > { %v2328_v17 = vpop.f32.mrf.mxu1 }
 0x667   : > { %v1990_v51 = vadd.f32 %v2328_v17, %v2178_v39 }
 0x668   : > { %v1981_v60 = vpop.f32.mrf.mxu1 }
 0x669   : > { %v2010_v31 = vadd.f32 %v2002_v10, %v1990_v51  ;;  %v1982_v6 = vadd.f32 %v2178_v39, %v1981_v60 }
 0x66a   : > { %v2329_v29 = vpop.f32.mrf.mxu1 }
 0x66b   : > { %2018 = vst.msk [vmem:[%s3207_s27 + $0x30] sm:$0xff] %vm544_vm0, %v2010_v31  ;;  %v2008_v35 = vadd.f32 %v2000_v45, %v1982_v6  ;;  %v1993_v28 = vadd.f32 %v2329_v29, %v2178_v39 }
 0x66c   : > { %v1984_v12 = vpop.f32.mrf.mxu1 }
 0x66d   : > { %2016 = vst.msk [vmem:[%s3207_s27 + $0x20] sm:$0xff] %vm544_vm0, %v2008_v35  ;;  %v2011_v33 = vadd.f32 %v2003_v5, %v1993_v28  ;;  %v1985_v40 = vadd.f32 %v2178_v39, %v1984_v12 }
 0x66f   : > { %2019 = vst.msk [vmem:[%s3207_s27 + $0x38] sm:$0xff] %vm544_vm0, %v2011_v33  ;;  %v2009_v27 = vadd.f32 %v2001_v23, %v1985_v40 }
 0x671   : > { %2017 = vst.msk [vmem:[%s3207_s27 + $0x28] sm:$0xff] %vm544_vm0, %v2009_v27 }
 0x672 PF: > { %s22_s21 = sadd.s32 1, %s2569_s21  }
 0x673   : > { %p19_p4 = scmp.ge.s32.totalorder %s22_s21, 4  }
 0x675   :  { %21 = sbr.rel (!%p19_p4) target bundleno = 1 (0x1), region = 110 }

// kernel: graph_attention_forward.7
= control target key start
LH: loop header
LB: loop body
LE: loop exit
PB: predicated region body
PF: predicated region fallthrough
CT: control target
= control target key end

     0   :  { %s893_s18 = smov 0   ;;  %s1061_s0 = inlined_call_operand.vmem [shape: bf16[160,32], index: 0, kind: input, shape index: {}]   ;;  %s1062_s1 = inlined_call_operand.vmem [shape: bf16[32,128], index: 1, kind: input, shape index: {}]   ;;  %s1063_s2 = inlined_call_operand.vmem [shape: f32[1,128], index: 2, kind: input, shape index: {}]   ;;  %s1064_s3 = inlined_call_operand.vmem [shape: bf16[128,128], index: 3, kind: input, shape index: {}]   ;;  %s1065_s4 = inlined_call_operand.vmem [shape: f32[1,128], index: 4, kind: input, shape index: {}]   ;;  %s1066_s5 = inlined_call_operand.vmem [shape: f32[160,128], index: 5, kind: output, shape index: {}]  }
   0x1 LB: > { %s681_s19 = sadd.s32 4294967295, %s859_s18   ;;  %p685_p0 = scmp.ge.s32.totalorder %s859_s18, 1  ;;  %s859_s18 = sphi %s893_s18, %s15_s18  }
   0x2   : > { %p188_p1 = scmp.lt.s32.totalorder %s859_s18, 3 }
   0x4   : > { %p189_p2 = pnand %p685_p0, %p188_p1 }
   0x5   : > { %s216_s24 = smul.u32 (!%p189_p2), 10, %s681_s19 }
   0x6   : > { %192 = sbr.rel (%p189_p2) target bundleno = 481 (0x1e1), region = 40 }
   0x7   : > { %p217_p3 = scmp.lt.s32.totalorder (!%p189_p2), %s216_s24, 19 }
   0xb   : > { %v818_v0 = vld [vmem:[%s1062_s1 + $0x8] sm:$0xff]   ;;  %v861_v1 = vmov 0.0   ;;  %v819_v2 = vld [vmem:[%s1062_s1] sm:$0xff]   ;;  %vm862_vm0 = vmmov 0   ;;  %s1068_s24 = smov (!%p217_p3, %s216_s24), 19  ;;  %vm287_vm1 = vcmask 261120  }
   0xc   : > { %732 = vmatprep.subr.bf16.mxu0 %v861_v1  ;;  %792 = vmatprep.subr.bf16.mxu1 %v861_v1  ;;  %s686_s25 = sshll.u32 %s1068_s24, 2  ;;  %v825_v8 = vld [vmem:[%s1064_s3 + $0x38] sm:$0xff]   ;;  %v826_v9 = vld [vmem:[%s1064_s3 + $0x30] sm:$0xff]   ;;  %v827_v10 = vld [vmem:[%s1064_s3 + $0x28] sm:$0xff]   ;;  %s687_s23 = sshll.u32 %s1068_s24, 3 }
   0xd   : > { %733 = vmatpush3.bf16.msra.mxu0 %v818_v0  ;;  %736 = vmatprep.mubr.msk.bf16.mxu0 %vm862_vm0, %v861_v1  ;;  %s220_s28 = scalar_lea.vmem %s1061_s0, %s686_s25  ;;  %v828_v11 = vld [vmem:[%s1064_s3 + $0x20] sm:$0xff]   ;;  %v829_v12 = vld [vmem:[%s1064_s3 + $0x18] sm:$0xff]   ;;  %v830_v13 = vld [vmem:[%s1064_s3 + $0x10] sm:$0xff]   ;;  %s1046_s29 = scalar_lea.vmem %s1066_s5, %s687_s23 }
   0xe   : > { %734 = vmatprep.subr.bf16.mxu0 %v861_v1  ;;  %776 = vmatprep.mubr.msk.bf16.mxu1 %vm862_vm0, %v861_v1  ;;  %v820_v3 = vld [vmem:[%s220_s28] sm:$0xff]   ;;  %v821_v4 = vld [vmem:[%s220_s28 + $0x8] sm:$0xff]   ;;  %v822_v5 = vld [vmem:[%s220_s28 + $0x10] sm:$0xff]  }
   0xf   : > { %v823_v6 = vld [vmem:[%s220_s28 + $0x18] sm:$0xff]   ;;  %v824_v7 = vld [vmem:[%s220_s28 + $0x20] sm:$0xff]   ;;  %800 = vmatpush3.bf16.msra.mxu1 %v825_v8  ;;  %v831_v14 = vld [vmem:[%s1064_s3 + $0x8] sm:$0xff]  }
  0x10   : > { %793 = vmatprep.subr.bf16.mxu1 %v861_v1  ;;  %v832_v15 = vld [vmem:[%s1064_s3] sm:$0xff]  }
  0x11   : > { %735 = vmatpush3.bf16.msra.mxu0 %v819_v2  ;;  %v972_v16 = vld [vmem:[%s1063_s2] ss:$0 sm:$0xff] }
  0x12   : > { %756 = vmatprep.subr.bf16.mxu0 %v861_v1 }
  0x13   : > { %801 = vmatpush3.bf16.msra.mxu1 %v826_v9 }
  0x14   : > { %737 = vmatmul.mubr.msk.bf16.vlgmr.msra.gmra.mxu0 %vm287_vm1, %v820_v3  ;;  %794 = vmatprep.subr.bf16.mxu1 %v861_v1 }
  0x15   : > { %740 = vmatprep.mubr.msk.bf16.mxu0 %vm862_vm0, %v861_v1  ;;  %757 = vmatpush3.bf16.msra.mxu0 %v825_v8 }
  0x16   : > { %758 = vmatprep.subr.bf16.mxu0 %v861_v1 }
  0x17   : > { %802 = vmatpush3.bf16.msra.mxu1 %v827_v10 }
  0x18   : > { %795 = vmatprep.subr.bf16.mxu1 %v861_v1 }
  0x19   : > { %759 = vmatpush3.bf16.msra.mxu0 %v826_v9 }
  0x1a   : > { %760 = vmatprep.subr.bf16.mxu0 %v861_v1 }
  0x1b   : > { %803 = vmatpush3.bf16.msra.mxu1 %v828_v11 }
  0x1c   : > { %741 = vmatmul.mubr.msk.bf16.gmra.mxu0 %vm287_vm1, %v821_v4  ;;  %796 = vmatprep.subr.bf16.mxu1 %v861_v1 }
  0x1d   : > { %744 = vmatprep.mubr.msk.bf16.mxu0 %vm862_vm0, %v861_v1  ;;  %761 = vmatpush3.bf16.msra.mxu0 %v827_v10 }
  0x1e   : > { %762 = vmatprep.subr.bf16.mxu0 %v861_v1 }
  0x1f   : > { %804 = vmatpush3.bf16.msra.mxu1 %v829_v12 }
  0x20   : > { %797 = vmatprep.subr.bf16.mxu1 %v861_v1 }
  0x21   : > { %763 = vmatpush3.bf16.msra.mxu0 %v828_v11 }
  0x22   : > { %764 = vmatprep.subr.bf16.mxu0 %v861_v1 }
  0x23   : > { %805 = vmatpush3.bf16.msra.mxu1 %v830_v13 }
  0x24   : > { %745 = vmatmul.mubr.msk.bf16.gmra.mxu0 %vm287_vm1, %v822_v5  ;;  %798 = vmatprep.subr.bf16.mxu1 %v861_v1 }
  0x25   : > { %748 = vmatprep.mubr.msk.bf16.mxu0 %vm862_vm0, %v861_v1  ;;  %765 = vmatpush3.bf16.msra.mxu0 %v829_v12 }
  0x26   : > { %766 = vmatprep.subr.bf16.mxu0 %v861_v1 }
  0x27   : > { %806 = vmatpush3.bf16.msra.mxu1 %v831_v14 }
  0x28   : > { %799 = vmatprep.subr.bf16.mxu1 %v861_v1 }
  0x29   : > { %767 = vmatpush3.bf16.msra.mxu0 %v830_v13 }
  0x2a   : > { %768 = vmatprep.subr.bf16.mxu0 %v861_v1 }
  0x2b   : > { %807 = vmatpush3.bf16.msra.mxu1 %v832_v15 }
  0x2c   : > { %749 = vmatmul.mubr.msk.bf16.gmra.mxu0 %vm287_vm1, %v823_v6 }
  0x2d   : > { %752 = vmatprep.mubr.msk.bf16.mxu0 %vm862_vm0, %v861_v1  ;;  %769 = vmatpush3.bf16.msra.mxu0 %v831_v14 }
  0x2e   : > { %770 = vmatprep.subr.bf16.mxu0 %v861_v1 }
  0x31   : > { %771 = vmatpush3.bf16.msra.mxu0 %v832_v15 }
  0x34   : > { %753 = vmatmul.mubr.msk.bf16.gmra.mxu0 %vm287_vm1, %v824_v7 }
  0x35   : > { %772 = vmatprep.mubr.msk.bf16.mxu0 %vm862_vm0, %v861_v1 }
  0xd4   : > { %v337_v17 = vpop.f32.mrf.mxu0 }
  0xd5   : > { %v338_v18 = vadd.f32 %v972_v16, %v337_v17 }
  0xd6   : > { %v738_v19 = vpop.f32.mrf.mxu0 }
  0xd7   : > { %v386_v20 = vmul.f32 0.044715, %v338_v18  ;;  %v376_v11 = vmul.f32 0.5, %v338_v18 }
  0xd8   : > { %v340_v21 = vpop.f32.mrf.mxu0 }
  0xd9   : > { %v396_v22 = vmul.f32 %v386_v20, %v338_v18  ;;  %v341_v23 = vadd.f32 %v972_v16, %v340_v21 }
  0xda   : > { %v739_v24 = vpop.f32.mrf.mxu0 }
  0xdb   : > { %v406_v25 = vmul.f32 %v396_v22, %v338_v18  ;;  %v387_v26 = vmul.f32 0.044715, %v341_v23  ;;  %v377_v12 = vmul.f32 0.5, %v341_v23 }
  0xdc   : > { %v345_v27 = vpop.f32.mrf.mxu0 }
  0xdd   : > { %v416_v28 = vadd.f32 %v406_v25, %v338_v18  ;;  %v397_v29 = vmul.f32 %v387_v26, %v341_v23  ;;  %v977_v30 = vadd.f32 %v972_v16, %v345_v27 }
  0xde   : > { %v742_v31 = vpop.f32.mrf.mxu0 }
  0xdf   : > { %v426_v32 = vmul.f32 0.7978846, %v416_v28  ;;  %v407_v33 = vmul.f32 %v397_v29, %v341_v23  ;;  %v388_v34 = vmul.f32 0.044715, %v977_v30 }
  0xe0   : > { %v348_v35 = vpop.f32.mrf.mxu0 }
  0xe1   : > { %833 = vtanh.f32 %v426_v32  ;;  %v417_v36 = vadd.f32 %v407_v33, %v341_v23  ;;  %v398_v37 = vmul.f32 %v388_v34, %v977_v30  ;;  %v982_v38 = vadd.f32 %v972_v16, %v348_v35 }
  0xe2   : > { %v743_v39 = vpop.f32.mrf.mxu0 }
  0xe3   : > { %v427_v40 = vmul.f32 0.7978846, %v417_v36  ;;  %v408_v41 = vmul.f32 %v398_v37, %v977_v30  ;;  %v389_v42 = vmul.f32 0.044715, %v982_v38 }
  0xe4   : > { %v353_v43 = vpop.f32.mrf.mxu0 }
  0xe5   : > { %835 = vtanh.f32 %v427_v40  ;;  %v399_v44 = vmul.f32 %v389_v42, %v982_v38  ;;  %v988_v45 = vadd.f32 %v972_v16, %v353_v43  ;;  %v418_v46 = vadd.f32 %v408_v41, %v977_v30 }
  0xe6   : > { %v746_v47 = vpop.f32.mrf.mxu0  ;;  %v378_v40 = vmul.f32 0.5, %v977_v30  ;;  %v379_v41 = vmul.f32 0.5, %v982_v38 }
  0xe7   : > { %v409_v48 = vmul.f32 %v399_v44, %v982_v38  ;;  %v390_v49 = vmul.f32 0.044715, %v988_v45  ;;  %v428_v50 = vmul.f32 0.7978846, %v418_v46 }
  0xe8   : > { %v356_v51 = vpop.f32.mrf.mxu0 }
  0xe9   : > { %v400_v52 = vmul.f32 %v390_v49, %v988_v45  ;;  %v995_v53 = vadd.f32 %v972_v16, %v356_v51  ;;  %v419_v54 = vadd.f32 %v409_v48, %v982_v38  ;;  %837 = vtanh.f32 %v428_v50 }
  0xea   : > { %v747_v55 = vpop.f32.mrf.mxu0 }
  0xeb   : > { %v410_v56 = vmul.f32 %v400_v52, %v988_v45  ;;  %v391_v57 = vmul.f32 0.044715, %v995_v53  ;;  %v429_v58 = vmul.f32 0.7978846, %v419_v54 }
  0xec   : > { %v361_v59 = vpop.f32.mrf.mxu0 }
  0xed   : > { %v401_v60 = vmul.f32 %v391_v57, %v995_v53  ;;  %v1002_v61 = vadd.f32 %v972_v16, %v361_v59  ;;  %839 = vtanh.f32 %v429_v58  ;;  %v420_v62 = vadd.f32 %v410_v56, %v988_v45 }
  0xee   : > { %v834_v63 = vpop.eup %833  ;;  %v750_v0 = vpop.f32.mrf.mxu0  ;;  %v380_v56 = vmul.f32 0.5, %v988_v45  ;;  %v381_v57 = vmul.f32 0.5, %v995_v53 }
  0xef   : > { %v411_v2 = vmul.f32 %v401_v60, %v995_v53  ;;  %v392_v3 = vmul.f32 0.044715, %v1002_v61  ;;  %v430_v4 = vmul.f32 0.7978846, %v420_v62  ;;  %v446_v6 = vadd.f32 1.0, %v834_v63 }
  0xf0   : > { %v364_v5 = vpop.f32.mrf.mxu0 }
  0xf1   : > { %v402_v7 = vmul.f32 %v392_v3, %v1002_v61  ;;  %v1009_v8 = vadd.f32 %v972_v16, %v364_v5  ;;  %v421_v9 = vadd.f32 %v411_v2, %v995_v53  ;;  %841 = vtanh.f32 %v430_v4 }
  0xf2   : > { %v836_v10 = vpop.eup %835  ;;  %v751_v13 = vpop.f32.mrf.mxu0  ;;  %v456_v21 = vmul.f32 %v446_v6, %v376_v11  ;;  %v382_v4 = vmul.f32 0.5, %v1002_v61 }
  0xf3   : > { %v412_v14 = vmul.f32 %v402_v7, %v1002_v61  ;;  %v393_v15 = vmul.f32 0.044715, %v1009_v8  ;;  %v447_v17 = vadd.f32 1.0, %v836_v10  ;;  %v431_v19 = vmul.f32 0.7978846, %v421_v9 }
  0xf4   : > { %v369_v20 = vpop.f32.mrf.mxu0  ;;  %v383_v5 = vmul.f32 0.5, %v1009_v8 }
  0xf5   : > { %v403_v22 = vmul.f32 %v393_v15, %v1009_v8  ;;  %v1016_v24 = vadd.f32 %v972_v16, %v369_v20  ;;  %v457_v25 = vmul.f32 %v447_v17, %v377_v12  ;;  %843 = vtanh.f32 %v431_v19 }
  0xf6   : > { %v838_v26 = vpop.eup %837  ;;  %v754_v18 = vpop.f32.mrf.mxu0  ;;  %v422_v23 = vadd.f32 %v412_v14, %v1002_v61 }
  0xf7   : > { %v413_v27 = vmul.f32 %v403_v22, %v1009_v8  ;;  %v394_v28 = vmul.f32 0.044715, %v1016_v24  ;;  %v466_v29 = vpack.c.bf16 %v457_v25, %v456_v21  ;;  %v448_v32 = vadd.f32 1.0, %v838_v26 }
  0xf8   : > { %v372_v31 = vpop.f32.mrf.mxu0  ;;  %v432_v33 = vmul.f32 0.7978846, %v422_v23  ;;  %v384_v12 = vmul.f32 0.5, %v1016_v24 }
  0xf9   : > { %v404_v34 = vmul.f32 %v394_v28, %v1016_v24  ;;  %v373_v35 = vadd.f32 %v972_v16, %v372_v31  ;;  %773 = vmatmul.mubr.bf16.vlgmr.msra.gmra.mxu0 %v466_v29  ;;  %v423_v36 = vadd.f32 %v413_v27, %v1009_v8  ;;  %v458_v47 = vmul.f32 %v448_v32, %v378_v40  ;;  %v701_v8 = vld [vmem:[%s1065_s4] ss:$0 sm:$0xff] }
  0xfa   : > { %v840_v37 = vpop.eup %839  ;;  %v755_v39 = vpop.f32.mrf.mxu0  ;;  %845 = vtanh.f32 %v432_v33 }
  0xfb   : > { %v414_v42 = vmul.f32 %v404_v34, %v1016_v24  ;;  %v395_v43 = vmul.f32 0.044715, %v373_v35  ;;  %v449_v44 = vadd.f32 1.0, %v840_v37  ;;  %v433_v46 = vmul.f32 0.7978846, %v423_v36 }
  0xfc   : > { %v385_v13 = vmul.f32 0.5, %v373_v35 }
  0xfd   : > { %v405_v48 = vmul.f32 %v395_v43, %v373_v35  ;;  %v459_v49 = vmul.f32 %v449_v44, %v379_v41  ;;  %847 = vtanh.f32 %v433_v46  ;;  %v424_v16 = vadd.f32 %v414_v42, %v1016_v24 }
  0xfe   : > { %v842_v50 = vpop.eup %841 }
  0xff   : > { %v415_v51 = vmul.f32 %v405_v48, %v373_v35  ;;  %v467_v52 = vpack.c.bf16 %v459_v49, %v458_v47  ;;  %v434_v54 = vmul.f32 0.7978846, %v424_v16  ;;  %v450_v30 = vadd.f32 1.0, %v842_v50 }
 0x101   : > { %777 = vmatmul.mubr.bf16.vlgmr.msra.gmra.mxu1 %v467_v52  ;;  %v425_v55 = vadd.f32 %v415_v51, %v373_v35  ;;  %849 = vtanh.f32 %v434_v54  ;;  %v460_v60 = vmul.f32 %v450_v30, %v380_v56 }
 0x102   : > { %v844_v38 = vpop.eup %843  ;;  %780 = vmatprep.mubr.msk.bf16.mxu1 %vm862_vm0, %v861_v1 }
 0x103   : > { %v451_v58 = vadd.f32 1.0, %v844_v38  ;;  %v435_v59 = vmul.f32 0.7978846, %v425_v55 }
 0x105   : > { %v461_v62 = vmul.f32 %v451_v58, %v381_v57  ;;  %851 = vtanh.f32 %v435_v59 }
 0x107   : > { %v846_v63 = vpop.eup %845  ;;  %v468_v0 = vpack.c.bf16 %v461_v62, %v460_v60 }
 0x108   : > { %v452_v2 = vadd.f32 1.0, %v846_v63 }
 0x109   : > { %781 = vmatmul.mubr.bf16.gmra.mxu1 %v468_v0 }
 0x10a   : > { %v848_v3 = vpop.eup %847  ;;  %784 = vmatprep.mubr.msk.bf16.mxu1 %vm862_vm0, %v861_v1  ;;  %v462_v53 = vmul.f32 %v452_v2, %v382_v4 }
 0x10b   : > { %v453_v45 = vadd.f32 1.0, %v848_v3 }
 0x10d   : > { %v463_v6 = vmul.f32 %v453_v45, %v383_v5 }
 0x10e   : > { %v850_v7 = vpop.eup %849 }
 0x10f   : > { %v469_v9 = vpack.c.bf16 %v463_v6, %v462_v53  ;;  %v454_v10 = vadd.f32 1.0, %v850_v7 }
 0x111   : > { %785 = vmatmul.mubr.bf16.gmra.mxu1 %v469_v9  ;;  %v464_v15 = vmul.f32 %v454_v10, %v384_v12 }
 0x112   : > { %v852_v11 = vpop.eup %851  ;;  %788 = vmatprep.mubr.msk.bf16.mxu1 %vm862_vm0, %v861_v1 }
 0x113   : > { %v455_v14 = vadd.f32 1.0, %v852_v11 }
 0x115   : > { %v465_v61 = vmul.f32 %v455_v14, %v385_v13 }
 0x117   : > { %v470_v17 = vpack.c.bf16 %v465_v61, %v464_v15 }
 0x119   : > { %789 = vmatmul.mubr.bf16.gmra.mxu1 %v470_v17 }
 0x1b9   : > { %v576_v1 = vpop.f32.mrf.mxu0 }
 0x1ba   : > { %v577_v19 = vadd.f32 %v701_v8, %v576_v1 }
 0x1bb   : > { %v774_v20 = vpop.f32.mrf.mxu0 }
 0x1bc   : > { %615 = vst [vmem:[%s1046_s29] sm:$0xff] %v577_v19 }
 0x1bd   : > { %v579_v21 = vpop.f32.mrf.mxu0 }
 0x1be   : > { %v580_v22 = vadd.f32 %v701_v8, %v579_v21 }
 0x1bf   : > { %v775_v24 = vpop.f32.mrf.mxu0 }
 0x1c0   : > { %616 = vst [vmem:[%s1046_s29 + $0x8] sm:$0xff] %v580_v22 }
 0x1c1   : > { %v584_v25 = vpop.f32.mrf.mxu1 }
 0x1c2   : > { %v585_v26 = vadd.f32 %v701_v8, %v584_v25 }
 0x1c3   : > { %v778_v18 = vpop.f32.mrf.mxu1 }
 0x1c4   : > { %617 = vst [vmem:[%s1046_s29 + $0x10] sm:$0xff] %v585_v26 }
 0x1c5   : > { %v587_v23 = vpop.f32.mrf.mxu1 }
 0x1c6   : > { %v588_v27 = vadd.f32 %v701_v8, %v587_v23 }
 0x1c7   : > { %v779_v28 = vpop.f32.mrf.mxu1 }
 0x1c8   : > { %618 = vst [vmem:[%s1046_s29 + $0x18] sm:$0xff] %v588_v27 }
 0x1c9   : > { %v592_v29 = vpop.f32.mrf.mxu1 }
 0x1ca   : > { %v593_v31 = vadd.f32 %v701_v8, %v592_v29 }
 0x1cb   : > { %v782_v32 = vpop.f32.mrf.mxu1 }
 0x1cc   : > { %619 = vst [vmem:[%s1046_s29 + $0x20] sm:$0xff] %v593_v31 }
 0x1cd   : > { %v595_v33 = vpop.f32.mrf.mxu1 }
 0x1ce   : > { %v596_v34 = vadd.f32 %v701_v8, %v595_v33 }
 0x1cf   : > { %v783_v35 = vpop.f32.mrf.mxu1 }
 0x1d0   : > { %620 = vst [vmem:[%s1046_s29 + $0x28] sm:$0xff] %v596_v34 }
 0x1d1   : > { %v600_v36 = vpop.f32.mrf.mxu1 }
 0x1d2   : > { %v601_v37 = vadd.f32 %v701_v8, %v600_v36 }
 0x1d3   : > { %v786_v39 = vpop.f32.mrf.mxu1 }
 0x1d4   : > { %621 = vst [vmem:[%s1046_s29 + $0x30] sm:$0xff] %v601_v37 }
 0x1d5   : > { %v603_v40 = vpop.f32.mrf.mxu1 }
 0x1d6   : > { %v604_v41 = vadd.f32 %v701_v8, %v603_v40 }
 0x1d7   : > { %v787_v42 = vpop.f32.mrf.mxu1 }
 0x1d8   : > { %622 = vst [vmem:[%s1046_s29 + $0x38] sm:$0xff] %v604_v41 }
 0x1d9   : > { %v608_v43 = vpop.f32.mrf.mxu1 }
 0x1da   : > { %v609_v44 = vadd.f32 %v701_v8, %v608_v43 }
 0x1db   : > { %v790_v46 = vpop.f32.mrf.mxu1 }
 0x1dc   : > { %623 = vst [vmem:[%s1046_s29 + $0x40] sm:$0xff] %v609_v44 }
 0x1dd   : > { %v611_v47 = vpop.f32.mrf.mxu1 }
 0x1de   : > { %v612_v48 = vadd.f32 %v701_v8, %v611_v47 }
 0x1df   : > { %v791_v49 = vpop.f32.mrf.mxu1 }
 0x1e0   : > { %624 = vst [vmem:[%s1046_s29 + $0x48] sm:$0xff] %v612_v48 }
 0x1e1 PF: > { %s15_s18 = sadd.s32 1, %s859_s18  }
 0x1e2   : > { %p12_p4 = scmp.ge.s32.totalorder %s15_s18, 4  }
 0x1e4   :  { %14 = sbr.rel (!%p12_p4) target bundleno = 1 (0x1), region = 70 }

</bundles_post_ra>
